<compile_context>
chip_gen: v6e
topology: v6e:2x2x1
jax: 0.10.0
libtpu: 0.0.40
codegen_flags: <defaults>
</compile_context>

<pallas_src>
import functools
import math

import jax
import jax.numpy as jnp
from jax.experimental import pallas as pl
from jax.experimental.pallas import tpu as pltpu

HIDDEN = 768
NUM_HEADS = 12
HEAD_DIM = HIDDEN // NUM_HEADS  # 64


def _bert_self_attn_kernel(x_ref, w_ref, b_ref, o_ref, qkv_ref):
    """One (batch, query-tile) grid step.

    x_ref   : (1, S, 768)  bf16  full-sequence hidden states for this batch elem
    w_ref   : (768, 2304)  bf16  fused [Wq*scale | Wk | Wv]
    b_ref   : (1, 2304)    f32   fused [bq*scale | bk | bv]
    o_ref   : (1, tq, 768)       lane-dense context output for this query tile
    qkv_ref : (36, S, 64)  bf16  scratch: per-head Q (0:12), K (12:24), V (24:36)
    """
    S = x_ref.shape[1]
    tq = o_ref.shape[1]
    qi = pl.program_id(1)

    # Fused QKV projection: one (S,768)x(768,2304) bf16 matmul, f32 accumulate.
    # Runs once per batch element (query-tile axis is innermost); the result is
    # cached head-major in VMEM scratch and reused by every query tile.
    @pl.when(qi == 0)
    def _project_qkv():
        x = x_ref[0]                                                   # (S, 768) bf16
        qkv = jnp.dot(x, w_ref[...], preferred_element_type=jnp.float32)
        qkv = (qkv + b_ref[0]).astype(qkv_ref.dtype)                   # (S, 2304) bf16
        for hh in range(3 * NUM_HEADS):                                # head-major cache
            qkv_ref[hh] = qkv[:, hh * HEAD_DIM:(hh + 1) * HEAD_DIM]

    if tq == S:                                   # single query tile (small S path)
        q_h = qkv_ref[0:NUM_HEADS]                                     # (12, tq, 64)
    else:
        row0 = pl.multiple_of(qi * tq, tq)
        q_h = qkv_ref[0:NUM_HEADS, pl.ds(row0, tq), :]                 # (12, tq, 64)
    k_h = qkv_ref[NUM_HEADS:2 * NUM_HEADS]                             # (12, S, 64)
    v_h = qkv_ref[2 * NUM_HEADS:3 * NUM_HEADS]                         # (12, S, 64)

    # Head-batched scores; 1/sqrt(head_dim) is already folded into Wq/bq.
    scores = jnp.einsum("hqd,hkd->hqk", q_h, k_h,
                        preferred_element_type=jnp.float32)            # (12, tq, S) f32
    scores = scores - jnp.max(scores, axis=-1, keepdims=True)
    e = jnp.exp(scores)
    denom = jnp.sum(e, axis=-1, keepdims=True)
    probs = e * pl.reciprocal(denom, approx=True)
    # TODO(synk): training-mode dropout(p=0.1) would mask `probs` here.

    ctx = jnp.einsum("hqk,hkd->hqd", probs.astype(jnp.bfloat16), v_h,
                     preferred_element_type=jnp.float32)               # (12, tq, 64)

    # Recombine heads in-kernel: (12, tq, 64) -> (tq, 768).  The lane concat is
    # a one-shot XLU relayout per tile; the payoff is a single unmasked,
    # 768-lane-dense store and no wrapper-side transpose/reshape HBM pass.
    merged = jnp.concatenate([ctx[h] for h in range(NUM_HEADS)], axis=-1)
    o_ref[0] = merged.astype(o_ref.dtype)         # one dense store per grid step


@functools.partial(jax.jit, static_argnames=("q_block",))
def bert_self_attention(hidden_states, wq, wk, wv, bq, bk, bv, q_block=256):
    """hidden_states: (B, S, 768); wq/wk/wv: (768, 768) in (in, out) layout;
    bq/bk/bv: (1, 768). Returns the (B, S, 768) context layer."""
    B, S, H = hidden_states.shape
    assert H == HIDDEN

    scale = 1.0 / math.sqrt(HEAD_DIM)
    # Fold the softmax scale into the query projection and fuse Q|K|V weights.
    w_qkv = jnp.concatenate([wq * scale, wk, wv], axis=1)              # (768, 2304) f32
    b_qkv = jnp.concatenate([bq * scale, bk, bv], axis=1)              # (1, 2304)   f32

    # bf16 MXU operands (halves weight/activation DMA); accumulation stays f32.
    x_bf16 = hidden_states.astype(jnp.bfloat16)
    w_bf16 = w_qkv.astype(jnp.bfloat16)

    # Query tiling bounds the (12, tq, S) score tile for long sequences (v7x VMEM).
    tq = q_block if (S > q_block and S % q_block == 0) else S
    nq = S // tq

    grid_spec = pltpu.PrefetchScalarGridSpec(
        num_scalar_prefetch=0,
        grid=(B, nq),                                     # query tiles innermost
        in_specs=[
            pl.BlockSpec((1, S, H), lambda b, qi: (b, 0, 0)),          # hidden states
            pl.BlockSpec((H, 3 * H), lambda b, qi: (0, 0)),            # fused W_qkv
            pl.BlockSpec((1, 3 * H), lambda b, qi: (0, 0)),            # fused bias
        ],
        out_specs=pl.BlockSpec((1, tq, H), lambda b, qi: (b, qi, 0)),  # lane-dense
        scratch_shapes=[pltpu.VMEM((3 * NUM_HEADS, S, HEAD_DIM), jnp.bfloat16)],
    )

    return pl.pallas_call(
        _bert_self_attn_kernel,
        out_shape=jax.ShapeDtypeStruct((B, S, HIDDEN), hidden_states.dtype),
        grid_spec=grid_spec,
        compiler_params=pltpu.CompilerParams(
            # QKV scratch carries state across query tiles -> that axis is arbitrary.
            dimension_semantics=("parallel", "arbitrary"),
            vmem_limit_bytes=64 * 1024 * 1024,
        ),
    )(x_bf16, w_bf16, b_qkv)


def bert_self_attention_ref_f32(hidden_states, wq, wk, wv, bq, bk, bv):
    """Pure-f32 JAX reference mirroring the PyTorch forward (eval-mode dropout)."""
    B, S, H = hidden_states.shape
    x = hidden_states.astype(jnp.float32)

    def proj(w, b):
        y = x @ w + b[0]
        return y.reshape(B, S, NUM_HEADS, HEAD_DIM).transpose(0, 2, 1, 3)

    q, k, v = proj(wq, bq), proj(wk, bk), proj(wv, bv)
    scores = jnp.einsum("bhqd,bhkd->bhqk", q, k) / math.sqrt(HEAD_DIM)
    probs = jax.nn.softmax(scores, axis=-1)
    ctx = jnp.einsum("bhqk,bhkd->bhqd", probs, v)
    return ctx.transpose(0, 2, 1, 3).reshape(B, S, H).astype(hidden_states.dtype)


def bert_self_attention_ref_bf16(hidden_states, wq, wk, wv, bq, bk, bv):
    """Reference that mirrors the kernel's bf16-operand / f32-accumulate arithmetic."""
    B, S, H = hidden_states.shape
    scale = 1.0 / math.sqrt(HEAD_DIM)
    x = hidden_states.astype(jnp.bfloat16)

    def proj(w, b):
        y = jnp.dot(x.reshape(B * S, H), w.astype(jnp.bfloat16),
                    preferred_element_type=jnp.float32) + b[0]
        return y.reshape(B, S, H)

    q = (proj(wq, bq) * scale).astype(jnp.bfloat16)
    k = proj(wk, bk).astype(jnp.bfloat16)
    v = proj(wv, bv).astype(jnp.bfloat16)

    def heads(t):
        return t.reshape(B, S, NUM_HEADS, HEAD_DIM).transpose(0, 2, 1, 3)

    qh, kh, vh = heads(q), heads(k), heads(v)
    scores = jnp.einsum("bhqd,bhkd->bhqk", qh, kh, preferred_element_type=jnp.float32)
    scores = scores - scores.max(axis=-1, keepdims=True)
    e = jnp.exp(scores)
    probs = e / e.sum(axis=-1, keepdims=True)
    ctx = jnp.einsum("bhqk,bhkd->bhqd", probs.astype(jnp.bfloat16), vh,
                     preferred_element_type=jnp.float32)
    return ctx.transpose(0, 2, 1, 3).reshape(B, S, H).astype(hidden_states.dtype)


if __name__ == "__main__":
    key = jax.random.PRNGKey(0)
    k_x, k_wq, k_wk, k_wv, k_bq, k_bk, k_bv = jax.random.split(key, 7)

    B, S = 2, 8
    init_scale = 1.0 / math.sqrt(HIDDEN)

    hidden_states = jax.random.normal(k_x, (B, S, HIDDEN), dtype=jnp.float32)
    wq = jax.random.normal(k_wq, (HIDDEN, HIDDEN), dtype=jnp.float32) * init_scale
    wk = jax.random.normal(k_wk, (HIDDEN, HIDDEN), dtype=jnp.float32) * init_scale
    wv = jax.random.normal(k_wv, (HIDDEN, HIDDEN), dtype=jnp.float32) * init_scale
    bq = jax.random.normal(k_bq, (1, HIDDEN), dtype=jnp.float32) * 0.01
    bk = jax.random.normal(k_bk, (1, HIDDEN), dtype=jnp.float32) * 0.01
    bv = jax.random.normal(k_bv, (1, HIDDEN), dtype=jnp.float32) * 0.01

    out = bert_self_attention(hidden_states, wq, wk, wv, bq, bk, bv)
    out = jax.block_until_ready(out)
    assert out.shape == (B, S, HIDDEN)

    # Tight check vs a reference matching the kernel's bf16/f32 arithmetic.
    ref_bf16 = bert_self_attention_ref_bf16(hidden_states, wq, wk, wv, bq, bk, bv)
    assert jnp.allclose(out, ref_bf16, atol=1e-2, rtol=1e-2), (
        "mismatch vs bf16-matched reference, max abs diff = %e"
        % float(jnp.max(jnp.abs(out - ref_bf16))))

    # Loose sanity check vs the full-f32 reference (bf16 MXU operands ~1e-2 err).
    ref_f32 = bert_self_attention_ref_f32(hidden_states, wq, wk, wv, bq, bk, bv)
    assert jnp.allclose(out, ref_f32, atol=1e-1, rtol=1e-1), (
        "mismatch vs f32 reference, max abs diff = %e"
        % float(jnp.max(jnp.abs(out - ref_f32))))

    print("KERNEL_OK")
</pallas_src>

<mosaic_0001>
module attributes {stable_mosaic.version = 11 : i64} {
  func.func @_bert_self_attn_kernel(%arg0: i32, %arg1: i32, %arg2: memref<1x8x768xbf16, #tpu.memory_space<vmem>>, %arg3: memref<768x2304xbf16, #tpu.memory_space<vmem>>, %arg4: memref<1x2304xf32, #tpu.memory_space<vmem>>, %arg5: memref<1x8x768xf32, #tpu.memory_space<vmem>>, %arg6: memref<36x8x64xbf16, #tpu.memory_space<vmem>>) attributes {dimension_semantics = [#tpu.dimension_semantics<parallel>, #tpu.dimension_semantics<arbitrary>], iteration_bounds = array<i64: 2, 1>, scalar_prefetch = 0 : i64, scratch_operands = 1 : i64, tpu.core_type = #tpu.core_type<tc>, window_params = [{transform_indices = @transform_0, window_bounds = array<i64: 1, 8, 768>}, {pipeline_mode = #tpu.pipeline_mode<synchronous>, transform_indices = @transform_1, window_bounds = array<i64: 768, 2304>}, {pipeline_mode = #tpu.pipeline_mode<synchronous>, transform_indices = @transform_2, window_bounds = array<i64: 1, 2304>}, {transform_indices = @transform_3, window_bounds = array<i64: 1, 8, 768>}]} {
    %c0_i32 = arith.constant 0 : i32
    %0 = arith.cmpi eq, %arg1, %c0_i32 : i32
    %1 = arith.extui %0 : i1 to i32
    %c0_i32_0 = arith.constant 0 : i32
    %2 = arith.cmpi ne, %1, %c0_i32_0 : i32
    scf.if %2 {
      %c0_13 = arith.constant 0 : index
      %c0_14 = arith.constant 0 : index
      %c0_15 = arith.constant 0 : index
      %47 = vector.load %arg2[%c0_13, %c0_14, %c0_15] : memref<1x8x768xbf16, #tpu.memory_space<vmem>>, vector<1x8x768xbf16>
      %48 = vector.shape_cast %47 : vector<1x8x768xbf16> to vector<8x768xbf16>
      %c0_16 = arith.constant 0 : index
      %c0_17 = arith.constant 0 : index
      %49 = vector.load %arg3[%c0_16, %c0_17] : memref<768x2304xbf16, #tpu.memory_space<vmem>>, vector<768x2304xbf16>
      %cst_18 = arith.constant dense<0.000000e+00> : vector<8x2304xf32>
      %50 = tpu.matmul %48, %49, %cst_18 {dimension_numbers = #tpu.dot_dimension_numbers<[1], [0], [0], [1], [0, 0, 1, 1], [], []>} : vector<8x768xbf16>, vector<768x2304xbf16>, vector<8x2304xf32> -> vector<8x2304xf32>
      %c0_19 = arith.constant 0 : index
      %c0_20 = arith.constant 0 : index
      %51 = vector.load %arg4[%c0_19, %c0_20] : memref<1x2304xf32, #tpu.memory_space<vmem>>, vector<1x2304xf32>
      %52 = vector.shape_cast %51 : vector<1x2304xf32> to vector<2304xf32>
      %53 = vector.shape_cast %52 : vector<2304xf32> to vector<1x2304xf32>
      %54 = vector.broadcast %53 : vector<1x2304xf32> to vector<8x2304xf32>
      %55 = arith.addf %50, %54 : vector<8x2304xf32>
      %56 = arith.truncf %55 : vector<8x2304xf32> to vector<8x2304xbf16>
      %57 = vector.extract_strided_slice %56 {offsets = [0, 0], sizes = [8, 64], strides = [1, 1]} : vector<8x2304xbf16> to vector<8x64xbf16>
      %c0_21 = arith.constant 0 : index
      %c0_22 = arith.constant 0 : index
      %c0_23 = arith.constant 0 : index
      %58 = vector.load %arg6[%c0_21, %c0_22, %c0_23] : memref<36x8x64xbf16, #tpu.memory_space<vmem>>, vector<1x8x64xbf16>
      %59 = vector.shape_cast %58 : vector<1x8x64xbf16> to vector<8x64xbf16>
      %60 = vector.shape_cast %57 : vector<8x64xbf16> to vector<1x8x64xbf16>
      tpu.vector_store %arg6[%c0_21, %c0_22, %c0_23], %60 {strides = array<i32>} : memref<36x8x64xbf16, #tpu.memory_space<vmem>>, vector<1x8x64xbf16>,
      %61 = vector.extract_strided_slice %56 {offsets = [0, 64], sizes = [8, 64], strides = [1, 1]} : vector<8x2304xbf16> to vector<8x64xbf16>
      %c1 = arith.constant 1 : index
      %c0_24 = arith.constant 0 : index
      %c0_25 = arith.constant 0 : index
      %62 = vector.load %arg6[%c1, %c0_24, %c0_25] : memref<36x8x64xbf16, #tpu.memory_space<vmem>>, vector<1x8x64xbf16>
      %63 = vector.shape_cast %62 : vector<1x8x64xbf16> to vector<8x64xbf16>
      %64 = vector.shape_cast %61 : vector<8x64xbf16> to vector<1x8x64xbf16>
      tpu.vector_store %arg6[%c1, %c0_24, %c0_25], %64 {strides = array<i32>} : memref<36x8x64xbf16, #tpu.memory_space<vmem>>, vector<1x8x64xbf16>,
      %65 = vector.extract_strided_slice %56 {offsets = [0, 128], sizes = [8, 64], strides = [1, 1]} : vector<8x2304xbf16> to vector<8x64xbf16>
      %c2 = arith.constant 2 : index
      %c0_26 = arith.constant 0 : index
      %c0_27 = arith.constant 0 : index
      %66 = vector.load %arg6[%c2, %c0_26, %c0_27] : memref<36x8x64xbf16, #tpu.memory_space<vmem>>, vector<1x8x64xbf16>
      %67 = vector.shape_cast %66 : vector<1x8x64xbf16> to vector<8x64xbf16>
      %68 = vector.shape_cast %65 : vector<8x64xbf16> to vector<1x8x64xbf16>
      tpu.vector_store %arg6[%c2, %c0_26, %c0_27], %68 {strides = array<i32>} : memref<36x8x64xbf16, #tpu.memory_space<vmem>>, vector<1x8x64xbf16>,
      %69 = vector.extract_strided_slice %56 {offsets = [0, 192], sizes = [8, 64], strides = [1, 1]} : vector<8x2304xbf16> to vector<8x64xbf16>
      %c3 = arith.constant 3 : index
      %c0_28 = arith.constant 0 : index
      %c0_29 = arith.constant 0 : index
      %70 = vector.load %arg6[%c3, %c0_28, %c0_29] : memref<36x8x64xbf16, #tpu.memory_space<vmem>>, vector<1x8x64xbf16>
      %71 = vector.shape_cast %70 : vector<1x8x64xbf16> to vector<8x64xbf16>
      %72 = vector.shape_cast %69 : vector<8x64xbf16> to vector<1x8x64xbf16>
      tpu.vector_store %arg6[%c3, %c0_28, %c0_29], %72 {strides = array<i32>} : memref<36x8x64xbf16, #tpu.memory_space<vmem>>, vector<1x8x64xbf16>,
      %73 = vector.extract_strided_slice %56 {offsets = [0, 256], sizes = [8, 64], strides = [1, 1]} : vector<8x2304xbf16> to vector<8x64xbf16>
      %c4 = arith.constant 4 : index
      %c0_30 = arith.constant 0 : index
      %c0_31 = arith.constant 0 : index
      %74 = vector.load %arg6[%c4, %c0_30, %c0_31] : memref<36x8x64xbf16, #tpu.memory_space<vmem>>, vector<1x8x64xbf16>
      %75 = vector.shape_cast %74 : vector<1x8x64xbf16> to vector<8x64xbf16>
      %76 = vector.shape_cast %73 : vector<8x64xbf16> to vector<1x8x64xbf16>
      tpu.vector_store %arg6[%c4, %c0_30, %c0_31], %76 {strides = array<i32>} : memref<36x8x64xbf16, #tpu.memory_space<vmem>>, vector<1x8x64xbf16>,
      %77 = vector.extract_strided_slice %56 {offsets = [0, 320], sizes = [8, 64], strides = [1, 1]} : vector<8x2304xbf16> to vector<8x64xbf16>
      %c5 = arith.constant 5 : index
      %c0_32 = arith.constant 0 : index
      %c0_33 = arith.constant 0 : index
      %78 = vector.load %arg6[%c5, %c0_32, %c0_33] : memref<36x8x64xbf16, #tpu.memory_space<vmem>>, vector<1x8x64xbf16>
      %79 = vector.shape_cast %78 : vector<1x8x64xbf16> to vector<8x64xbf16>
      %80 = vector.shape_cast %77 : vector<8x64xbf16> to vector<1x8x64xbf16>
      tpu.vector_store %arg6[%c5, %c0_32, %c0_33], %80 {strides = array<i32>} : memref<36x8x64xbf16, #tpu.memory_space<vmem>>, vector<1x8x64xbf16>,
      %81 = vector.extract_strided_slice %56 {offsets = [0, 384], sizes = [8, 64], strides = [1, 1]} : vector<8x2304xbf16> to vector<8x64xbf16>
      %c6 = arith.constant 6 : index
      %c0_34 = arith.constant 0 : index
      %c0_35 = arith.constant 0 : index
      %82 = vector.load %arg6[%c6, %c0_34, %c0_35] : memref<36x8x64xbf16, #tpu.memory_space<vmem>>, vector<1x8x64xbf16>
      %83 = vector.shape_cast %82 : vector<1x8x64xbf16> to vector<8x64xbf16>
      %84 = vector.shape_cast %81 : vector<8x64xbf16> to vector<1x8x64xbf16>
      tpu.vector_store %arg6[%c6, %c0_34, %c0_35], %84 {strides = array<i32>} : memref<36x8x64xbf16, #tpu.memory_space<vmem>>, vector<1x8x64xbf16>,
      %85 = vector.extract_strided_slice %56 {offsets = [0, 448], sizes = [8, 64], strides = [1, 1]} : vector<8x2304xbf16> to vector<8x64xbf16>
      %c7 = arith.constant 7 : index
      %c0_36 = arith.constant 0 : index
      %c0_37 = arith.constant 0 : index
      %86 = vector.load %arg6[%c7, %c0_36, %c0_37] : memref<36x8x64xbf16, #tpu.memory_space<vmem>>, vector<1x8x64xbf16>
      %87 = vector.shape_cast %86 : vector<1x8x64xbf16> to vector<8x64xbf16>
      %88 = vector.shape_cast %85 : vector<8x64xbf16> to vector<1x8x64xbf16>
      tpu.vector_store %arg6[%c7, %c0_36, %c0_37], %88 {strides = array<i32>} : memref<36x8x64xbf16, #tpu.memory_space<vmem>>, vector<1x8x64xbf16>,
      %89 = vector.extract_strided_slice %56 {offsets = [0, 512], sizes = [8, 64], strides = [1, 1]} : vector<8x2304xbf16> to vector<8x64xbf16>
      %c8 = arith.constant 8 : index
      %c0_38 = arith.constant 0 : index
      %c0_39 = arith.constant 0 : index
      %90 = vector.load %arg6[%c8, %c0_38, %c0_39] : memref<36x8x64xbf16, #tpu.memory_space<vmem>>, vector<1x8x64xbf16>
      %91 = vector.shape_cast %90 : vector<1x8x64xbf16> to vector<8x64xbf16>
      %92 = vector.shape_cast %89 : vector<8x64xbf16> to vector<1x8x64xbf16>
      tpu.vector_store %arg6[%c8, %c0_38, %c0_39], %92 {strides = array<i32>} : memref<36x8x64xbf16, #tpu.memory_space<vmem>>, vector<1x8x64xbf16>,
      %93 = vector.extract_strided_slice %56 {offsets = [0, 576], sizes = [8, 64], strides = [1, 1]} : vector<8x2304xbf16> to vector<8x64xbf16>
      %c9 = arith.constant 9 : index
      %c0_40 = arith.constant 0 : index
      %c0_41 = arith.constant 0 : index
      %94 = vector.load %arg6[%c9, %c0_40, %c0_41] : memref<36x8x64xbf16, #tpu.memory_space<vmem>>, vector<1x8x64xbf16>
      %95 = vector.shape_cast %94 : vector<1x8x64xbf16> to vector<8x64xbf16>
      %96 = vector.shape_cast %93 : vector<8x64xbf16> to vector<1x8x64xbf16>
      tpu.vector_store %arg6[%c9, %c0_40, %c0_41], %96 {strides = array<i32>} : memref<36x8x64xbf16, #tpu.memory_space<vmem>>, vector<1x8x64xbf16>,
      %97 = vector.extract_strided_slice %56 {offsets = [0, 640], sizes = [8, 64], strides = [1, 1]} : vector<8x2304xbf16> to vector<8x64xbf16>
      %c10 = arith.constant 10 : index
      %c0_42 = arith.constant 0 : index
      %c0_43 = arith.constant 0 : index
      %98 = vector.load %arg6[%c10, %c0_42, %c0_43] : memref<36x8x64xbf16, #tpu.memory_space<vmem>>, vector<1x8x64xbf16>
      %99 = vector.shape_cast %98 : vector<1x8x64xbf16> to vector<8x64xbf16>
      %100 = vector.shape_cast %97 : vector<8x64xbf16> to vector<1x8x64xbf16>
      tpu.vector_store %arg6[%c10, %c0_42, %c0_43], %100 {strides = array<i32>} : memref<36x8x64xbf16, #tpu.memory_space<vmem>>, vector<1x8x64xbf16>,
      %101 = vector.extract_strided_slice %56 {offsets = [0, 704], sizes = [8, 64], strides = [1, 1]} : vector<8x2304xbf16> to vector<8x64xbf16>
      %c11 = arith.constant 11 : index
      %c0_44 = arith.constant 0 : index
      %c0_45 = arith.constant 0 : index
      %102 = vector.load %arg6[%c11, %c0_44, %c0_45] : memref<36x8x64xbf16, #tpu.memory_space<vmem>>, vector<1x8x64xbf16>
      %103 = vector.shape_cast %102 : vector<1x8x64xbf16> to vector<8x64xbf16>
      %104 = vector.shape_cast %101 : vector<8x64xbf16> to vector<1x8x64xbf16>
      tpu.vector_store %arg6[%c11, %c0_44, %c0_45], %104 {strides = array<i32>} : memref<36x8x64xbf16, #tpu.memory_space<vmem>>, vector<1x8x64xbf16>,
      %105 = vector.extract_strided_slice %56 {offsets = [0, 768], sizes = [8, 64], strides = [1, 1]} : vector<8x2304xbf16> to vector<8x64xbf16>
      %c12_46 = arith.constant 12 : index
      %c0_47 = arith.constant 0 : index
      %c0_48 = arith.constant 0 : index
      %106 = vector.load %arg6[%c12_46, %c0_47, %c0_48] : memref<36x8x64xbf16, #tpu.memory_space<vmem>>, vector<1x8x64xbf16>
      %107 = vector.shape_cast %106 : vector<1x8x64xbf16> to vector<8x64xbf16>
      %108 = vector.shape_cast %105 : vector<8x64xbf16> to vector<1x8x64xbf16>
      tpu.vector_store %arg6[%c12_46, %c0_47, %c0_48], %108 {strides = array<i32>} : memref<36x8x64xbf16, #tpu.memory_space<vmem>>, vector<1x8x64xbf16>,
      %109 = vector.extract_strided_slice %56 {offsets = [0, 832], sizes = [8, 64], strides = [1, 1]} : vector<8x2304xbf16> to vector<8x64xbf16>
      %c13 = arith.constant 13 : index
      %c0_49 = arith.constant 0 : index
      %c0_50 = arith.constant 0 : index
      %110 = vector.load %arg6[%c13, %c0_49, %c0_50] : memref<36x8x64xbf16, #tpu.memory_space<vmem>>, vector<1x8x64xbf16>
      %111 = vector.shape_cast %110 : vector<1x8x64xbf16> to vector<8x64xbf16>
      %112 = vector.shape_cast %109 : vector<8x64xbf16> to vector<1x8x64xbf16>
      tpu.vector_store %arg6[%c13, %c0_49, %c0_50], %112 {strides = array<i32>} : memref<36x8x64xbf16, #tpu.memory_space<vmem>>, vector<1x8x64xbf16>,
      %113 = vector.extract_strided_slice %56 {offsets = [0, 896], sizes = [8, 64], strides = [1, 1]} : vector<8x2304xbf16> to vector<8x64xbf16>
      %c14 = arith.constant 14 : index
      %c0_51 = arith.constant 0 : index
      %c0_52 = arith.constant 0 : index
      %114 = vector.load %arg6[%c14, %c0_51, %c0_52] : memref<36x8x64xbf16, #tpu.memory_space<vmem>>, vector<1x8x64xbf16>
      %115 = vector.shape_cast %114 : vector<1x8x64xbf16> to vector<8x64xbf16>
      %116 = vector.shape_cast %113 : vector<8x64xbf16> to vector<1x8x64xbf16>
      tpu.vector_store %arg6[%c14, %c0_51, %c0_52], %116 {strides = array<i32>} : memref<36x8x64xbf16, #tpu.memory_space<vmem>>, vector<1x8x64xbf16>,
      %117 = vector.extract_strided_slice %56 {offsets = [0, 960], sizes = [8, 64], strides = [1, 1]} : vector<8x2304xbf16> to vector<8x64xbf16>
      %c15 = arith.constant 15 : index
      %c0_53 = arith.constant 0 : index
      %c0_54 = arith.constant 0 : index
      %118 = vector.load %arg6[%c15, %c0_53, %c0_54] : memref<36x8x64xbf16, #tpu.memory_space<vmem>>, vector<1x8x64xbf16>
      %119 = vector.shape_cast %118 : vector<1x8x64xbf16> to vector<8x64xbf16>
      %120 = vector.shape_cast %117 : vector<8x64xbf16> to vector<1x8x64xbf16>
      tpu.vector_store %arg6[%c15, %c0_53, %c0_54], %120 {strides = array<i32>} : memref<36x8x64xbf16, #tpu.memory_space<vmem>>, vector<1x8x64xbf16>,
      %121 = vector.extract_strided_slice %56 {offsets = [0, 1024], sizes = [8, 64], strides = [1, 1]} : vector<8x2304xbf16> to vector<8x64xbf16>
      %c16 = arith.constant 16 : index
      %c0_55 = arith.constant 0 : index
      %c0_56 = arith.constant 0 : index
      %122 = vector.load %arg6[%c16, %c0_55, %c0_56] : memref<36x8x64xbf16, #tpu.memory_space<vmem>>, vector<1x8x64xbf16>
      %123 = vector.shape_cast %122 : vector<1x8x64xbf16> to vector<8x64xbf16>
      %124 = vector.shape_cast %121 : vector<8x64xbf16> to vector<1x8x64xbf16>
      tpu.vector_store %arg6[%c16, %c0_55, %c0_56], %124 {strides = array<i32>} : memref<36x8x64xbf16, #tpu.memory_space<vmem>>, vector<1x8x64xbf16>,
      %125 = vector.extract_strided_slice %56 {offsets = [0, 1088], sizes = [8, 64], strides = [1, 1]} : vector<8x2304xbf16> to vector<8x64xbf16>
      %c17 = arith.constant 17 : index
      %c0_57 = arith.constant 0 : index
      %c0_58 = arith.constant 0 : index
      %126 = vector.load %arg6[%c17, %c0_57, %c0_58] : memref<36x8x64xbf16, #tpu.memory_space<vmem>>, vector<1x8x64xbf16>
      %127 = vector.shape_cast %126 : vector<1x8x64xbf16> to vector<8x64xbf16>
      %128 = vector.shape_cast %125 : vector<8x64xbf16> to vector<1x8x64xbf16>
      tpu.vector_store %arg6[%c17, %c0_57, %c0_58], %128 {strides = array<i32>} : memref<36x8x64xbf16, #tpu.memory_space<vmem>>, vector<1x8x64xbf16>,
      %129 = vector.extract_strided_slice %56 {offsets = [0, 1152], sizes = [8, 64], strides = [1, 1]} : vector<8x2304xbf16> to vector<8x64xbf16>
      %c18 = arith.constant 18 : index
      %c0_59 = arith.constant 0 : index
      %c0_60 = arith.constant 0 : index
      %130 = vector.load %arg6[%c18, %c0_59, %c0_60] : memref<36x8x64xbf16, #tpu.memory_space<vmem>>, vector<1x8x64xbf16>
      %131 = vector.shape_cast %130 : vector<1x8x64xbf16> to vector<8x64xbf16>
      %132 = vector.shape_cast %129 : vector<8x64xbf16> to vector<1x8x64xbf16>
      tpu.vector_store %arg6[%c18, %c0_59, %c0_60], %132 {strides = array<i32>} : memref<36x8x64xbf16, #tpu.memory_space<vmem>>, vector<1x8x64xbf16>,
      %133 = vector.extract_strided_slice %56 {offsets = [0, 1216], sizes = [8, 64], strides = [1, 1]} : vector<8x2304xbf16> to vector<8x64xbf16>
      %c19 = arith.constant 19 : index
      %c0_61 = arith.constant 0 : index
      %c0_62 = arith.constant 0 : index
      %134 = vector.load %arg6[%c19, %c0_61, %c0_62] : memref<36x8x64xbf16, #tpu.memory_space<vmem>>, vector<1x8x64xbf16>
      %135 = vector.shape_cast %134 : vector<1x8x64xbf16> to vector<8x64xbf16>
      %136 = vector.shape_cast %133 : vector<8x64xbf16> to vector<1x8x64xbf16>
      tpu.vector_store %arg6[%c19, %c0_61, %c0_62], %136 {strides = array<i32>} : memref<36x8x64xbf16, #tpu.memory_space<vmem>>, vector<1x8x64xbf16>,
      %137 = vector.extract_strided_slice %56 {offsets = [0, 1280], sizes = [8, 64], strides = [1, 1]} : vector<8x2304xbf16> to vector<8x64xbf16>
      %c20 = arith.constant 20 : index
      %c0_63 = arith.constant 0 : index
      %c0_64 = arith.constant 0 : index
      %138 = vector.load %arg6[%c20, %c0_63, %c0_64] : memref<36x8x64xbf16, #tpu.memory_space<vmem>>, vector<1x8x64xbf16>
      %139 = vector.shape_cast %138 : vector<1x8x64xbf16> to vector<8x64xbf16>
      %140 = vector.shape_cast %137 : vector<8x64xbf16> to vector<1x8x64xbf16>
      tpu.vector_store %arg6[%c20, %c0_63, %c0_64], %140 {strides = array<i32>} : memref<36x8x64xbf16, #tpu.memory_space<vmem>>, vector<1x8x64xbf16>,
      %141 = vector.extract_strided_slice %56 {offsets = [0, 1344], sizes = [8, 64], strides = [1, 1]} : vector<8x2304xbf16> to vector<8x64xbf16>
      %c21 = arith.constant 21 : index
      %c0_65 = arith.constant 0 : index
      %c0_66 = arith.constant 0 : index
      %142 = vector.load %arg6[%c21, %c0_65, %c0_66] : memref<36x8x64xbf16, #tpu.memory_space<vmem>>, vector<1x8x64xbf16>
      %143 = vector.shape_cast %142 : vector<1x8x64xbf16> to vector<8x64xbf16>
      %144 = vector.shape_cast %141 : vector<8x64xbf16> to vector<1x8x64xbf16>
      tpu.vector_store %arg6[%c21, %c0_65, %c0_66], %144 {strides = array<i32>} : memref<36x8x64xbf16, #tpu.memory_space<vmem>>, vector<1x8x64xbf16>,
      %145 = vector.extract_strided_slice %56 {offsets = [0, 1408], sizes = [8, 64], strides = [1, 1]} : vector<8x2304xbf16> to vector<8x64xbf16>
      %c22 = arith.constant 22 : index
      %c0_67 = arith.constant 0 : index
      %c0_68 = arith.constant 0 : index
      %146 = vector.load %arg6[%c22, %c0_67, %c0_68] : memref<36x8x64xbf16, #tpu.memory_space<vmem>>, vector<1x8x64xbf16>
      %147 = vector.shape_cast %146 : vector<1x8x64xbf16> to vector<8x64xbf16>
      %148 = vector.shape_cast %145 : vector<8x64xbf16> to vector<1x8x64xbf16>
      tpu.vector_store %arg6[%c22, %c0_67, %c0_68], %148 {strides = array<i32>} : memref<36x8x64xbf16, #tpu.memory_space<vmem>>, vector<1x8x64xbf16>,
      %149 = vector.extract_strided_slice %56 {offsets = [0, 1472], sizes = [8, 64], strides = [1, 1]} : vector<8x2304xbf16> to vector<8x64xbf16>
      %c23 = arith.constant 23 : index
      %c0_69 = arith.constant 0 : index
      %c0_70 = arith.constant 0 : index
      %150 = vector.load %arg6[%c23, %c0_69, %c0_70] : memref<36x8x64xbf16, #tpu.memory_space<vmem>>, vector<1x8x64xbf16>
      %151 = vector.shape_cast %150 : vector<1x8x64xbf16> to vector<8x64xbf16>
      %152 = vector.shape_cast %149 : vector<8x64xbf16> to vector<1x8x64xbf16>
      tpu.vector_store %arg6[%c23, %c0_69, %c0_70], %152 {strides = array<i32>} : memref<36x8x64xbf16, #tpu.memory_space<vmem>>, vector<1x8x64xbf16>,
      %153 = vector.extract_strided_slice %56 {offsets = [0, 1536], sizes = [8, 64], strides = [1, 1]} : vector<8x2304xbf16> to vector<8x64xbf16>
      %c24_71 = arith.constant 24 : index
      %c0_72 = arith.constant 0 : index
      %c0_73 = arith.constant 0 : index
      %154 = vector.load %arg6[%c24_71, %c0_72, %c0_73] : memref<36x8x64xbf16, #tpu.memory_space<vmem>>, vector<1x8x64xbf16>
      %155 = vector.shape_cast %154 : vector<1x8x64xbf16> to vector<8x64xbf16>
      %156 = vector.shape_cast %153 : vector<8x64xbf16> to vector<1x8x64xbf16>
      tpu.vector_store %arg6[%c24_71, %c0_72, %c0_73], %156 {strides = array<i32>} : memref<36x8x64xbf16, #tpu.memory_space<vmem>>, vector<1x8x64xbf16>,
      %157 = vector.extract_strided_slice %56 {offsets = [0, 1600], sizes = [8, 64], strides = [1, 1]} : vector<8x2304xbf16> to vector<8x64xbf16>
      %c25 = arith.constant 25 : index
      %c0_74 = arith.constant 0 : index
      %c0_75 = arith.constant 0 : index
      %158 = vector.load %arg6[%c25, %c0_74, %c0_75] : memref<36x8x64xbf16, #tpu.memory_space<vmem>>, vector<1x8x64xbf16>
      %159 = vector.shape_cast %158 : vector<1x8x64xbf16> to vector<8x64xbf16>
      %160 = vector.shape_cast %157 : vector<8x64xbf16> to vector<1x8x64xbf16>
      tpu.vector_store %arg6[%c25, %c0_74, %c0_75], %160 {strides = array<i32>} : memref<36x8x64xbf16, #tpu.memory_space<vmem>>, vector<1x8x64xbf16>,
      %161 = vector.extract_strided_slice %56 {offsets = [0, 1664], sizes = [8, 64], strides = [1, 1]} : vector<8x2304xbf16> to vector<8x64xbf16>
      %c26 = arith.constant 26 : index
      %c0_76 = arith.constant 0 : index
      %c0_77 = arith.constant 0 : index
      %162 = vector.load %arg6[%c26, %c0_76, %c0_77] : memref<36x8x64xbf16, #tpu.memory_space<vmem>>, vector<1x8x64xbf16>
      %163 = vector.shape_cast %162 : vector<1x8x64xbf16> to vector<8x64xbf16>
      %164 = vector.shape_cast %161 : vector<8x64xbf16> to vector<1x8x64xbf16>
      tpu.vector_store %arg6[%c26, %c0_76, %c0_77], %164 {strides = array<i32>} : memref<36x8x64xbf16, #tpu.memory_space<vmem>>, vector<1x8x64xbf16>,
      %165 = vector.extract_strided_slice %56 {offsets = [0, 1728], sizes = [8, 64], strides = [1, 1]} : vector<8x2304xbf16> to vector<8x64xbf16>
      %c27 = arith.constant 27 : index
      %c0_78 = arith.constant 0 : index
      %c0_79 = arith.constant 0 : index
      %166 = vector.load %arg6[%c27, %c0_78, %c0_79] : memref<36x8x64xbf16, #tpu.memory_space<vmem>>, vector<1x8x64xbf16>
      %167 = vector.shape_cast %166 : vector<1x8x64xbf16> to vector<8x64xbf16>
      %168 = vector.shape_cast %165 : vector<8x64xbf16> to vector<1x8x64xbf16>
      tpu.vector_store %arg6[%c27, %c0_78, %c0_79], %168 {strides = array<i32>} : memref<36x8x64xbf16, #tpu.memory_space<vmem>>, vector<1x8x64xbf16>,
      %169 = vector.extract_strided_slice %56 {offsets = [0, 1792], sizes = [8, 64], strides = [1, 1]} : vector<8x2304xbf16> to vector<8x64xbf16>
      %c28 = arith.constant 28 : index
      %c0_80 = arith.constant 0 : index
      %c0_81 = arith.constant 0 : index
      %170 = vector.load %arg6[%c28, %c0_80, %c0_81] : memref<36x8x64xbf16, #tpu.memory_space<vmem>>, vector<1x8x64xbf16>
      %171 = vector.shape_cast %170 : vector<1x8x64xbf16> to vector<8x64xbf16>
      %172 = vector.shape_cast %169 : vector<8x64xbf16> to vector<1x8x64xbf16>
      tpu.vector_store %arg6[%c28, %c0_80, %c0_81], %172 {strides = array<i32>} : memref<36x8x64xbf16, #tpu.memory_space<vmem>>, vector<1x8x64xbf16>,
      %173 = vector.extract_strided_slice %56 {offsets = [0, 1856], sizes = [8, 64], strides = [1, 1]} : vector<8x2304xbf16> to vector<8x64xbf16>
      %c29 = arith.constant 29 : index
      %c0_82 = arith.constant 0 : index
      %c0_83 = arith.constant 0 : index
      %174 = vector.load %arg6[%c29, %c0_82, %c0_83] : memref<36x8x64xbf16, #tpu.memory_space<vmem>>, vector<1x8x64xbf16>
      %175 = vector.shape_cast %174 : vector<1x8x64xbf16> to vector<8x64xbf16>
      %176 = vector.shape_cast %173 : vector<8x64xbf16> to vector<1x8x64xbf16>
      tpu.vector_store %arg6[%c29, %c0_82, %c0_83], %176 {strides = array<i32>} : memref<36x8x64xbf16, #tpu.memory_space<vmem>>, vector<1x8x64xbf16>,
      %177 = vector.extract_strided_slice %56 {offsets = [0, 1920], sizes = [8, 64], strides = [1, 1]} : vector<8x2304xbf16> to vector<8x64xbf16>
      %c30 = arith.constant 30 : index
      %c0_84 = arith.constant 0 : index
      %c0_85 = arith.constant 0 : index
      %178 = vector.load %arg6[%c30, %c0_84, %c0_85] : memref<36x8x64xbf16, #tpu.memory_space<vmem>>, vector<1x8x64xbf16>
      %179 = vector.shape_cast %178 : vector<1x8x64xbf16> to vector<8x64xbf16>
      %180 = vector.shape_cast %177 : vector<8x64xbf16> to vector<1x8x64xbf16>
      tpu.vector_store %arg6[%c30, %c0_84, %c0_85], %180 {strides = array<i32>} : memref<36x8x64xbf16, #tpu.memory_space<vmem>>, vector<1x8x64xbf16>,
      %181 = vector.extract_strided_slice %56 {offsets = [0, 1984], sizes = [8, 64], strides = [1, 1]} : vector<8x2304xbf16> to vector<8x64xbf16>
      %c31 = arith.constant 31 : index
      %c0_86 = arith.constant 0 : index
      %c0_87 = arith.constant 0 : index
      %182 = vector.load %arg6[%c31, %c0_86, %c0_87] : memref<36x8x64xbf16, #tpu.memory_space<vmem>>, vector<1x8x64xbf16>
      %183 = vector.shape_cast %182 : vector<1x8x64xbf16> to vector<8x64xbf16>
      %184 = vector.shape_cast %181 : vector<8x64xbf16> to vector<1x8x64xbf16>
      tpu.vector_store %arg6[%c31, %c0_86, %c0_87], %184 {strides = array<i32>} : memref<36x8x64xbf16, #tpu.memory_space<vmem>>, vector<1x8x64xbf16>,
      %185 = vector.extract_strided_slice %56 {offsets = [0, 2048], sizes = [8, 64], strides = [1, 1]} : vector<8x2304xbf16> to vector<8x64xbf16>
      %c32 = arith.constant 32 : index
      %c0_88 = arith.constant 0 : index
      %c0_89 = arith.constant 0 : index
      %186 = vector.load %arg6[%c32, %c0_88, %c0_89] : memref<36x8x64xbf16, #tpu.memory_space<vmem>>, vector<1x8x64xbf16>
      %187 = vector.shape_cast %186 : vector<1x8x64xbf16> to vector<8x64xbf16>
      %188 = vector.shape_cast %185 : vector<8x64xbf16> to vector<1x8x64xbf16>
      tpu.vector_store %arg6[%c32, %c0_88, %c0_89], %188 {strides = array<i32>} : memref<36x8x64xbf16, #tpu.memory_space<vmem>>, vector<1x8x64xbf16>,
      %189 = vector.extract_strided_slice %56 {offsets = [0, 2112], sizes = [8, 64], strides = [1, 1]} : vector<8x2304xbf16> to vector<8x64xbf16>
      %c33 = arith.constant 33 : index
      %c0_90 = arith.constant 0 : index
      %c0_91 = arith.constant 0 : index
      %190 = vector.load %arg6[%c33, %c0_90, %c0_91] : memref<36x8x64xbf16, #tpu.memory_space<vmem>>, vector<1x8x64xbf16>
      %191 = vector.shape_cast %190 : vector<1x8x64xbf16> to vector<8x64xbf16>
      %192 = vector.shape_cast %189 : vector<8x64xbf16> to vector<1x8x64xbf16>
      tpu.vector_store %arg6[%c33, %c0_90, %c0_91], %192 {strides = array<i32>} : memref<36x8x64xbf16, #tpu.memory_space<vmem>>, vector<1x8x64xbf16>,
      %193 = vector.extract_strided_slice %56 {offsets = [0, 2176], sizes = [8, 64], strides = [1, 1]} : vector<8x2304xbf16> to vector<8x64xbf16>
      %c34 = arith.constant 34 : index
      %c0_92 = arith.constant 0 : index
      %c0_93 = arith.constant 0 : index
      %194 = vector.load %arg6[%c34, %c0_92, %c0_93] : memref<36x8x64xbf16, #tpu.memory_space<vmem>>, vector<1x8x64xbf16>
      %195 = vector.shape_cast %194 : vector<1x8x64xbf16> to vector<8x64xbf16>
      %196 = vector.shape_cast %193 : vector<8x64xbf16> to vector<1x8x64xbf16>
      tpu.vector_store %arg6[%c34, %c0_92, %c0_93], %196 {strides = array<i32>} : memref<36x8x64xbf16, #tpu.memory_space<vmem>>, vector<1x8x64xbf16>,
      %197 = vector.extract_strided_slice %56 {offsets = [0, 2240], sizes = [8, 64], strides = [1, 1]} : vector<8x2304xbf16> to vector<8x64xbf16>
      %c35 = arith.constant 35 : index
      %c0_94 = arith.constant 0 : index
      %c0_95 = arith.constant 0 : index
      %198 = vector.load %arg6[%c35, %c0_94, %c0_95] : memref<36x8x64xbf16, #tpu.memory_space<vmem>>, vector<1x8x64xbf16>
      %199 = vector.shape_cast %198 : vector<1x8x64xbf16> to vector<8x64xbf16>
      %200 = vector.shape_cast %197 : vector<8x64xbf16> to vector<1x8x64xbf16>
      tpu.vector_store %arg6[%c35, %c0_94, %c0_95], %200 {strides = array<i32>} : memref<36x8x64xbf16, #tpu.memory_space<vmem>>, vector<1x8x64xbf16>,
    } else {
    }
    %c0 = arith.constant 0 : index
    %c0_1 = arith.constant 0 : index
    %c0_2 = arith.constant 0 : index
    %3 = vector.load %arg6[%c0, %c0_1, %c0_2] : memref<36x8x64xbf16, #tpu.memory_space<vmem>>, vector<12x8x64xbf16>
    %c12 = arith.constant 12 : index
    %c0_3 = arith.constant 0 : index
    %c0_4 = arith.constant 0 : index
    %4 = vector.load %arg6[%c12, %c0_3, %c0_4] : memref<36x8x64xbf16, #tpu.memory_space<vmem>>, vector<12x8x64xbf16>
    %c24 = arith.constant 24 : index
    %c0_5 = arith.constant 0 : index
    %c0_6 = arith.constant 0 : index
    %5 = vector.load %arg6[%c24, %c0_5, %c0_6] : memref<36x8x64xbf16, #tpu.memory_space<vmem>>, vector<12x8x64xbf16>
    "tpu.trace_start"() <{level = 10 : i32, message = "hqd,hkd->hqk"}> : () -> ()
    %cst = arith.constant dense<0.000000e+00> : vector<12x8x8xf32>
    %6 = tpu.matmul %3, %4, %cst {dimension_numbers = #tpu.dot_dimension_numbers<[2], [2], [1], [1], [0, 0, 0, 1, 1, 1], [0], [0]>} : vector<12x8x64xbf16>, vector<12x8x64xbf16>, vector<12x8x8xf32> -> vector<12x8x8xf32>
    "tpu.trace_stop"() : () -> ()
    %cst_7 = arith.constant dense<0xFF800000> : vector<12x8xf32>
    %7 = vector.multi_reduction <maximumf>, %6, %cst_7 [2] : vector<12x8x8xf32> to vector<12x8xf32>
    %8 = vector.shape_cast %7 : vector<12x8xf32> to vector<12x8x1xf32>
    %9 = vector.broadcast %8 : vector<12x8x1xf32> to vector<12x8x8xf32>
    %10 = arith.subf %6, %9 : vector<12x8x8xf32>
    %11 = math.exp %10 : vector<12x8x8xf32>
    %cst_8 = arith.constant dense<0.000000e+00> : vector<12x8xf32>
    %12 = vector.multi_reduction <add>, %11, %cst_8 [2] : vector<12x8x8xf32> to vector<12x8xf32>
    %13 = vector.shape_cast %12 : vector<12x8xf32> to vector<12x8x1xf32>
    %14 = tpu.reciprocal %13 {approx = true} : vector<12x8x1xf32> -> vector<12x8x1xf32>
    %15 = vector.broadcast %14 : vector<12x8x1xf32> to vector<12x8x8xf32>
    %16 = arith.mulf %11, %15 : vector<12x8x8xf32>
    %17 = arith.truncf %16 : vector<12x8x8xf32> to vector<12x8x8xbf16>
    "tpu.trace_start"() <{level = 10 : i32, message = "hqk,hkd->hqd"}> : () -> ()
    %cst_9 = arith.constant dense<0.000000e+00> : vector<12x8x64xf32>
    %18 = tpu.matmul %17, %5, %cst_9 {dimension_numbers = #tpu.dot_dimension_numbers<[2], [1], [1], [2], [0, 0, 0, 1, 1, 2], [0], [0]>} : vector<12x8x8xbf16>, vector<12x8x64xbf16>, vector<12x8x64xf32> -> vector<12x8x64xf32>
    "tpu.trace_stop"() : () -> ()
    %19 = vector.extract_strided_slice %18 {offsets = [0, 0, 0], sizes = [1, 8, 64], strides = [1, 1, 1]} : vector<12x8x64xf32> to vector<1x8x64xf32>
    %20 = vector.shape_cast %19 : vector<1x8x64xf32> to vector<8x64xf32>
    %21 = vector.extract_strided_slice %18 {offsets = [1, 0, 0], sizes = [1, 8, 64], strides = [1, 1, 1]} : vector<12x8x64xf32> to vector<1x8x64xf32>
    %22 = vector.shape_cast %21 : vector<1x8x64xf32> to vector<8x64xf32>
    %23 = vector.extract_strided_slice %18 {offsets = [2, 0, 0], sizes = [1, 8, 64], strides = [1, 1, 1]} : vector<12x8x64xf32> to vector<1x8x64xf32>
    %24 = vector.shape_cast %23 : vector<1x8x64xf32> to vector<8x64xf32>
    %25 = vector.extract_strided_slice %18 {offsets = [3, 0, 0], sizes = [1, 8, 64], strides = [1, 1, 1]} : vector<12x8x64xf32> to vector<1x8x64xf32>
    %26 = vector.shape_cast %25 : vector<1x8x64xf32> to vector<8x64xf32>
    %27 = vector.extract_strided_slice %18 {offsets = [4, 0, 0], sizes = [1, 8, 64], strides = [1, 1, 1]} : vector<12x8x64xf32> to vector<1x8x64xf32>
    %28 = vector.shape_cast %27 : vector<1x8x64xf32> to vector<8x64xf32>
    %29 = vector.extract_strided_slice %18 {offsets = [5, 0, 0], sizes = [1, 8, 64], strides = [1, 1, 1]} : vector<12x8x64xf32> to vector<1x8x64xf32>
    %30 = vector.shape_cast %29 : vector<1x8x64xf32> to vector<8x64xf32>
    %31 = vector.extract_strided_slice %18 {offsets = [6, 0, 0], sizes = [1, 8, 64], strides = [1, 1, 1]} : vector<12x8x64xf32> to vector<1x8x64xf32>
    %32 = vector.shape_cast %31 : vector<1x8x64xf32> to vector<8x64xf32>
    %33 = vector.extract_strided_slice %18 {offsets = [7, 0, 0], sizes = [1, 8, 64], strides = [1, 1, 1]} : vector<12x8x64xf32> to vector<1x8x64xf32>
    %34 = vector.shape_cast %33 : vector<1x8x64xf32> to vector<8x64xf32>
    %35 = vector.extract_strided_slice %18 {offsets = [8, 0, 0], sizes = [1, 8, 64], strides = [1, 1, 1]} : vector<12x8x64xf32> to vector<1x8x64xf32>
    %36 = vector.shape_cast %35 : vector<1x8x64xf32> to vector<8x64xf32>
    %37 = vector.extract_strided_slice %18 {offsets = [9, 0, 0], sizes = [1, 8, 64], strides = [1, 1, 1]} : vector<12x8x64xf32> to vector<1x8x64xf32>
    %38 = vector.shape_cast %37 : vector<1x8x64xf32> to vector<8x64xf32>
    %39 = vector.extract_strided_slice %18 {offsets = [10, 0, 0], sizes = [1, 8, 64], strides = [1, 1, 1]} : vector<12x8x64xf32> to vector<1x8x64xf32>
    %40 = vector.shape_cast %39 : vector<1x8x64xf32> to vector<8x64xf32>
    %41 = vector.extract_strided_slice %18 {offsets = [11, 0, 0], sizes = [1, 8, 64], strides = [1, 1, 1]} : vector<12x8x64xf32> to vector<1x8x64xf32>
    %42 = vector.shape_cast %41 : vector<1x8x64xf32> to vector<8x64xf32>
    %43 = tpu.concatenate %20, %22, %24, %26, %28, %30, %32, %34, %36, %38, %40, %42 in 1 : vector<8x64xf32>, vector<8x64xf32>, vector<8x64xf32>, vector<8x64xf32>, vector<8x64xf32>, vector<8x64xf32>, vector<8x64xf32>, vector<8x64xf32>, vector<8x64xf32>, vector<8x64xf32>, vector<8x64xf32>, vector<8x64xf32> -> vector<8x768xf32>
    %c0_10 = arith.constant 0 : index
    %c0_11 = arith.constant 0 : index
    %c0_12 = arith.constant 0 : index
    %44 = vector.load %arg5[%c0_10, %c0_11, %c0_12] : memref<1x8x768xf32, #tpu.memory_space<vmem>>, vector<1x8x768xf32>
    %45 = vector.shape_cast %44 : vector<1x8x768xf32> to vector<8x768xf32>
    %46 = vector.shape_cast %43 : vector<8x768xf32> to vector<1x8x768xf32>
    tpu.vector_store %arg5[%c0_10, %c0_11, %c0_12], %46 {strides = array<i32>} : memref<1x8x768xf32, #tpu.memory_space<vmem>>, vector<1x8x768xf32>,
    return
  }
  func.func @transform_0(%arg0: i32, %arg1: i32) -> (i32, i32, i32) {
    %c0_i32 = arith.constant 0 : i32
    %c0_i32_0 = arith.constant 0 : i32
    %c0_i32_1 = arith.constant 0 : i32
    return %arg0, %c0_i32, %c0_i32_0 : i32, i32, i32
  }
  func.func @transform_1(%arg0: i32, %arg1: i32) -> (i32, i32) {
    %c0_i32 = arith.constant 0 : i32
    %c0_i32_0 = arith.constant 0 : i32
    %c0_i32_1 = arith.constant 0 : i32
    return %c0_i32, %c0_i32_0 : i32, i32
  }
  func.func @transform_2(%arg0: i32, %arg1: i32) -> (i32, i32) {
    %c0_i32 = arith.constant 0 : i32
    %c0_i32_0 = arith.constant 0 : i32
    %c0_i32_1 = arith.constant 0 : i32
    return %c0_i32, %c0_i32_0 : i32, i32
  }
  func.func @transform_3(%arg0: i32, %arg1: i32) -> (i32, i32, i32) {
    %c0_i32 = arith.constant 0 : i32
    %c0_i32_0 = arith.constant 0 : i32
    return %arg0, %arg1, %c0_i32 : i32, i32, i32
  }
}

</mosaic_0001>

<bundles_post_ra>
// kernel: bert_self_attention.1
= control target key start
LH: loop header
LB: loop body
LE: loop exit
PB: predicated region body
PF: predicated region fallthrough
CT: control target
= control target key end

     0   :  { %8 = vsyncpa [#allocation4], 0  ;;  %s14140_s0 = inlined_call_operand.vmem [shape: bf16[2,8,768], index: 0, kind: input, shape index: {}]   ;;  %s14141_s1 = inlined_call_operand.vmem [shape: bf16[768,2304], index: 1, kind: input, shape index: {}]   ;;  %s14142_s2 = inlined_call_operand.vmem [shape: f32[1,2304], index: 2, kind: input, shape index: {}]   ;;  %s14143_s3 = inlined_call_operand.hbm [shape: f32[2,8,768], index: 3, kind: output, shape index: {}]  }
   0x1   :  { %10 = vsyncpa [#allocation4 + $0x1], 0  ;;  %s10855_s12 = smov 0   ;;  %s10857_s13 = smov 0  }
   0x2   :  { %s10859_s14 = smov 0   ;;  %s10861_s15 = smov 0  }
   0x3   :  { %s10863_s16 = smov 0   ;;  %s10865_s17 = smov 0  }
   0x4 LB: > { %s8209_s18 = sadd.s32 4294967295, %s10829_s17   ;;  %s8210_s19 = sadd.s32 4294967294, %s10829_s17   ;;  %s10829_s17 = sphi %s10865_s17, %s16_s17   ;;  %s10825_s16 = sphi %s10863_s16, %s14150_s16   ;;  %s10821_s15 = sphi %s10861_s15, %s14149_s15   ;;  %s10817_s14 = sphi %s10859_s14, %s14148_s14   ;;  %s10813_s13 = sphi %s10857_s13, %s14147_s13   ;;  %s10809_s12 = sphi %s10855_s12, %s14146_s12  }
   0x5   : > { %s28_s20 = sadd.s32 1, %s10825_s16  ;;  %s105_s21 = sadd.s32 1, %s10817_s14 }
   0x6   : > { %p30_p0 = scmp.ge.s32.totalorder %s28_s20, 2  ;;  %p115_p1 = scmp.ne.s32.totalorder %s10817_s14, %s10813_s13 }
   0x7   : > { %p116_p2 = scmp.eq.s32.totalorder %s8209_s18, 1  ;;  %p121_p3 = scmp.ne.s32.totalorder %s10813_s13, %s10809_s12 }
   0x8   : > { %s14152_s20 = smov (%p30_p0, %s28_s20), 0  ;;  %p122_p5 = scmp.eq.s32.totalorder %s8210_s19, 1 }
   0x9   : > { %p10895_p4 = por %p116_p2, %p115_p1  ;;  %s100_s23 = ssub.s32 %s10825_s16, %s14152_s20 }
   0xa   : > { %p8213_p6 = scmp.ge.s32.totalorder %s10829_s17, 1  ;;  %p103_p7 = scmp.eq.s32.totalorder %s100_s23, 0 }
   0xb   : > { %p10902_p8 = por %p122_p5, %p121_p3  ;;  %p154_p9 = scmp.lt.s32.totalorder %s10829_s17, 3 }
   0xc   : > { %s10908_s25 = scalar_select %p103_p7, %s10817_s14, %s105_s21  }
   0xd   : > { %p155_p10 = pnand %p8213_p6, %p154_p9 }
   0xe   : > { %p178_p11 = scmp.lt.s32.totalorder (!%p155_p10), %s10821_s15, 1  ;;  %s10831_s28 = smov (!%p155_p10), 64  }
   0xf   : > { %158 = sbr.rel (%p155_p10) target bundleno = 1800 (0x708), region = 32  ;;  %s175_s21 = sand.u32 (!%p155_p10), 1, %s10813_s13  }
  0x10   : > { %s9340_s23 = smul.u32 (!%p155_p10), 48, %s175_s21  ;;  %s8123_s5 = scalar_lea.sflag (!%p155_p10), [#allocation4], %s175_s21 }
  0x11   : > { %s10834_s8 = smov (!%p155_p10), [#allocation3]  }
  0x12   : > { %s14080_s26 = scalar_lea.vmem (!%p155_p10), [#allocation3], %s9340_s23 }
  0x13   : > { %s8139_s27 = sshll.u32 (!%p155_p10), %s14080_s26, 4  ;;  %s8140_s27 = int_to_ptr.vmem [resolvable:$true] %s8139_s27 }
  0x14   : > { %v9401_v0 = vld [vmem:[%s14141_s1 + $0x3f4] ss:$72 sps:$4 sm:$0xff]   ;;  %v9405_v2 = vld [vmem:[%s14141_s1 + $0x3f0] ss:$72 sps:$4 sm:$0xff]   ;;  %v9407_v4 = vld [vmem:[%s14141_s1 + $0x364] ss:$72 sps:$4 sm:$0xff]  }
  0x15   : > { %v9403_v1 = vld [vmem:[%s14141_s1 + $0xcf4] ss:$72 sps:$4 sm:$0xff]   ;;  %5492 = vmatprep.subr.bf16.mxu0 %v9401_v0  ;;  %v9406_v3 = vld [vmem:[%s14141_s1 + $0xcf0] ss:$72 sps:$4 sm:$0xff]   ;;  %v9409_v5 = vld [vmem:[%s14141_s1 + $0xc64] ss:$72 sps:$4 sm:$0xff]  }
  0x16   : > { %5533 = vmatprep.subr.bf16.mxu1 %v9403_v1  ;;  %5493 = vmatpush1.bf16.msra.mxu0 %v9405_v2  ;;  %v9411_v6 = vld [vmem:[%s14141_s1 + $0x360] ss:$72 sps:$4 sm:$0xff]   ;;  %v9413_v8 = vld [vmem:[%s14141_s1 + $0x2d4] ss:$72 sps:$4 sm:$0xff]   ;;  %v9417_v10 = vld [vmem:[%s14141_s1 + $0x2d0] ss:$72 sps:$4 sm:$0xff]  }
  0x17   : > { %5534 = vmatpush1.bf16.msra.mxu1 %v9406_v3  ;;  %5494 = vmatprep.subr.bf16.mxu0 %v9407_v4  ;;  %v9412_v7 = vld [vmem:[%s14141_s1 + $0xc60] ss:$72 sps:$4 sm:$0xff]   ;;  %v9415_v9 = vld [vmem:[%s14141_s1 + $0xbd4] ss:$72 sps:$4 sm:$0xff]   ;;  %v9418_v11 = vld [vmem:[%s14141_s1 + $0xbd0] ss:$72 sps:$4 sm:$0xff]  }
  0x18   : > { %5535 = vmatprep.subr.bf16.mxu1 %v9409_v5  ;;  %v9419_v12 = vld [vmem:[%s14141_s1 + $0x244] ss:$72 sps:$4 sm:$0xff]   ;;  %v9423_v14 = vld [vmem:[%s14141_s1 + $0x240] ss:$72 sps:$4 sm:$0xff]   ;;  %v9425_v16 = vld [vmem:[%s14141_s1 + $0x1b4] ss:$72 sps:$4 sm:$0xff]  }
  0x19   : > { %v9421_v13 = vld [vmem:[%s14141_s1 + $0xb44] ss:$72 sps:$4 sm:$0xff]   ;;  %v9424_v15 = vld [vmem:[%s14141_s1 + $0xb40] ss:$72 sps:$4 sm:$0xff]   ;;  %v9427_v17 = vld [vmem:[%s14141_s1 + $0xab4] ss:$72 sps:$4 sm:$0xff]  }
  0x1a   : > { %5495 = vmatpush1.bf16.msra.mxu0 %v9411_v6  ;;  %v9429_v18 = vld [vmem:[%s14141_s1 + $0x1b0] ss:$72 sps:$4 sm:$0xff]   ;;  %v9431_v20 = vld [vmem:[%s14141_s1 + $0x124] ss:$72 sps:$4 sm:$0xff]   ;;  %v9435_v22 = vld [vmem:[%s14141_s1 + $0x120] ss:$72 sps:$4 sm:$0xff]  }
  0x1b   : > { %5536 = vmatpush1.bf16.msra.mxu1 %v9412_v7  ;;  %5496 = vmatprep.subr.bf16.mxu0 %v9413_v8  ;;  %v9430_v19 = vld [vmem:[%s14141_s1 + $0xab0] ss:$72 sps:$4 sm:$0xff]   ;;  %v9433_v21 = vld [vmem:[%s14141_s1 + $0xa24] ss:$72 sps:$4 sm:$0xff]   ;;  %v9436_v23 = vld [vmem:[%s14141_s1 + $0xa20] ss:$72 sps:$4 sm:$0xff]  }
  0x1c   : > { %5537 = vmatprep.subr.bf16.mxu1 %v9415_v9  ;;  %v9437_v24 = vld [vmem:[%s14141_s1 + $0x94] ss:$72 sps:$4 sm:$0xff]   ;;  %v9441_v26 = vld [vmem:[%s14141_s1 + $0x90] ss:$72 sps:$4 sm:$0xff]   ;;  %v9443_v28 = vld [vmem:[%s14141_s1 + $0x4] ss:$72 sps:$4 sm:$0xff]  }
  0x1d   : > { %v9439_v25 = vld [vmem:[%s14141_s1 + $0x994] ss:$72 sps:$4 sm:$0xff]   ;;  %v9442_v27 = vld [vmem:[%s14141_s1 + $0x990] ss:$72 sps:$4 sm:$0xff]   ;;  %v9445_v29 = vld [vmem:[%s14141_s1 + $0x904] ss:$72 sps:$4 sm:$0xff]  }
  0x1e   : > { %5497 = vmatpush1.bf16.msra.mxu0 %v9417_v10  ;;  %v9447_v30 = vld [vmem:[%s14141_s1] ss:$72 sps:$4 sm:$0xff]   ;;  %v9449_v32 = vld [vmem:[%s14141_s1 + $0x874] ss:$72 sps:$4 sm:$0xff]   ;;  %v9453_v34 = vld [vmem:[%s14141_s1 + $0x870] ss:$72 sps:$4 sm:$0xff]  }
  0x1f   : > { %5538 = vmatpush1.bf16.msra.mxu1 %v9418_v11  ;;  %5498 = vmatprep.subr.bf16.mxu0 %v9419_v12  ;;  %v9448_v31 = vld [vmem:[%s14141_s1 + $0x900] ss:$72 sps:$4 sm:$0xff]   ;;  %v9451_v33 = vld [vmem:[%s14141_s1 + $0x1174] ss:$72 sps:$4 sm:$0xff]   ;;  %v9454_v35 = vld [vmem:[%s14141_s1 + $0x1170] ss:$72 sps:$4 sm:$0xff]  }
  0x20   : > { %5539 = vmatprep.subr.bf16.mxu1 %v9421_v13  ;;  %s179_s30 = scalar_select %p178_p11, %s10821_s15, 1  ;;  %v9455_v36 = vld [vmem:[%s14141_s1 + $0x7e4] ss:$72 sps:$4 sm:$0xff]   ;;  %v9459_v38 = vld [vmem:[%s14141_s1 + $0x7e0] ss:$72 sps:$4 sm:$0xff]   ;;  %vm6617_vm0 = vcmask 519168  }
  0x21   : > { %v9457_v37 = vld [vmem:[%s14141_s1 + $0x10e4] ss:$72 sps:$4 sm:$0xff]   ;;  %v9460_v39 = vld [vmem:[%s14141_s1 + $0x10e0] ss:$72 sps:$4 sm:$0xff]   ;;  %v9461_v40 = vld [vmem:[%s14141_s1 + $0x754] ss:$72 sps:$4 sm:$0xff]  }
  0x22   : > { %5499 = vmatpush1.bf16.msra.mxu0 %v9423_v14  ;;  %s9341_s10 = smul.u32 24, %s179_s30  ;;  %v9463_v41 = vld [vmem:[%s14141_s1 + $0x1054] ss:$72 sps:$4 sm:$0xff]   ;;  %v9465_v42 = vld [vmem:[%s14141_s1 + $0x750] ss:$72 sps:$4 sm:$0xff]   ;;  %vm6835_vm1 = vcmask 523264  }
  0x23   : > { %5540 = vmatpush1.bf16.msra.mxu1 %v9424_v15  ;;  %5500 = vmatprep.subr.bf16.mxu0 %v9425_v16  ;;  %v9466_v43 = vld [vmem:[%s14141_s1 + $0x1050] ss:$72 sps:$4 sm:$0xff]   ;;  %v9467_v44 = vld [vmem:[%s14141_s1 + $0x6c4] ss:$72 sps:$4 sm:$0xff]   ;;  %v9471_v49 = vld [vmem:[%s14141_s1 + $0x6c0] ss:$72 sps:$4 sm:$0xff]  }
  0x24   : > { %5541 = vmatprep.subr.bf16.mxu1 %v9427_v17  ;;  %s11047_s6 = scalar_lea.vmem %s14140_s0, %s9341_s10  ;;  %v9469_v45 = vld [vmem:[%s14141_s1 + $0xfc4] ss:$72 sps:$4 sm:$0xff]   ;;  %v9472_v50 = vld [vmem:[%s14141_s1 + $0xfc0] ss:$72 sps:$4 sm:$0xff]   ;;  %v9473_v52 = vld [vmem:[%s14141_s1 + $0x634] ss:$72 sps:$4 sm:$0xff]  }
  0x25   : > { %v188_v46 = vld [vmem:[%s11047_s6] sm:$0xff]  ;;  %v189_v48 = vld [vmem:[%s11047_s6 + $0x8] sm:$0xff]  ;;  %v9475_v53 = vld [vmem:[%s14141_s1 + $0xf34] ss:$72 sps:$4 sm:$0xff]   ;;  %vm10833_vm2 = vmmov 0   ;;  %vm7536_vm3 = vcmask 1043456  }
  0x26   : > { %5501 = vmatpush1.bf16.msra.mxu0 %v9429_v18  ;;  %v11056_v47 = vcombine.high %v188_v46, %v188_v46  ;;  %v11065_v51 = vcombine.high %v189_v48, %v189_v48  ;;  %v9477_v54 = vld [vmem:[%s14141_s1 + $0x630] ss:$72 sps:$4 sm:$0xff]   ;;  %v9479_v56 = vld [vmem:[%s14141_s1 + $0x5a4] ss:$72 sps:$4 sm:$0xff]   ;;  %v9483_v58 = vld [vmem:[%s14141_s1 + $0x5a0] ss:$72 sps:$4 sm:$0xff]   ;;  %v11123_v6 = vcombine.low %v188_v46, %v188_v46  ;;  %v11125_v7 = vcombine.low %v189_v48, %v189_v48 }
  0x27   : > { %5542 = vmatpush1.bf16.msra.mxu1 %v9430_v19  ;;  %5502 = vmatprep.subr.bf16.mxu0 %v9431_v20  ;;  %v9478_v55 = vld [vmem:[%s14141_s1 + $0xf30] ss:$72 sps:$4 sm:$0xff]   ;;  %v9481_v57 = vld [vmem:[%s14141_s1 + $0xea4] ss:$72 sps:$4 sm:$0xff]   ;;  %v9484_v59 = vld [vmem:[%s14141_s1 + $0xea0] ss:$72 sps:$4 sm:$0xff]  }
  0x28   : > { %5543 = vmatprep.subr.bf16.mxu1 %v9433_v21  ;;  %5524 = vmatprep.mubr.bf16.mxu0 %v11056_v47  ;;  %v9485_v60 = vld [vmem:[%s14141_s1 + $0x514] ss:$72 sps:$4 sm:$0xff]   ;;  %v9489_v62 = vld [vmem:[%s14141_s1 + $0x510] ss:$72 sps:$4 sm:$0xff]   ;;  %v9491_v0 = vld [vmem:[%s14141_s1 + $0x484] ss:$72 sps:$4 sm:$0xff]  }
  0x29   : > { %5565 = vmatprep.mubr.bf16.mxu1 %v11065_v51  ;;  %v9487_v61 = vld [vmem:[%s14141_s1 + $0xe14] ss:$72 sps:$4 sm:$0xff]   ;;  %v9490_v63 = vld [vmem:[%s14141_s1 + $0xe10] ss:$72 sps:$4 sm:$0xff]   ;;  %v9493_v1 = vld [vmem:[%s14141_s1 + $0xd84] ss:$72 sps:$4 sm:$0xff]  }
  0x2a   : > { %5503 = vmatpush1.bf16.msra.mxu0 %v9435_v22  ;;  %v9495_v2 = vld [vmem:[%s14141_s1 + $0x480] ss:$72 sps:$4 sm:$0xff]   ;;  %v9503_v4 = vld [vmem:[%s14141_s1 + $0x15f4] ss:$72 sps:$4 sm:$0xff]   ;;  %v9501_v8 = vld [vmem:[%s14141_s1 + $0x15f0] ss:$72 sps:$4 sm:$0xff]  }
  0x2b   : > { %5544 = vmatpush1.bf16.msra.mxu1 %v9436_v23  ;;  %5504 = vmatprep.subr.bf16.mxu0 %v9437_v24  ;;  %v9496_v3 = vld [vmem:[%s14141_s1 + $0xd80] ss:$72 sps:$4 sm:$0xff]   ;;  %v9506_v5 = vld [vmem:[%s14141_s1 + $0x3fc] ss:$72 sps:$4 sm:$0xff]   ;;  %v9512_v11 = vld [vmem:[%s14141_s1 + $0x36c] ss:$72 sps:$4 sm:$0xff]  }
  0x2c   : > { %5545 = vmatprep.subr.bf16.mxu1 %v9439_v25  ;;  %v9504_v9 = vld [vmem:[%s14141_s1 + $0x3f8] ss:$72 sps:$4 sm:$0xff]   ;;  %v9509_v10 = vld [vmem:[%s14141_s1 + $0x1564] ss:$72 sps:$4 sm:$0xff]   ;;  %v9510_v13 = vld [vmem:[%s14141_s1 + $0x368] ss:$72 sps:$4 sm:$0xff]  }
  0x2d   : > { %v9507_v12 = vld [vmem:[%s14141_s1 + $0x1560] ss:$72 sps:$4 sm:$0xff]   ;;  %v9515_v14 = vld [vmem:[%s14141_s1 + $0x14d4] ss:$72 sps:$4 sm:$0xff]   ;;  %v9513_v16 = vld [vmem:[%s14141_s1 + $0x14d0] ss:$72 sps:$4 sm:$0xff]  }
  0x2e   : > { %5505 = vmatpush1.bf16.msra.mxu0 %v9441_v26  ;;  %v9518_v15 = vld [vmem:[%s14141_s1 + $0x2dc] ss:$72 sps:$4 sm:$0xff]   ;;  %v9516_v17 = vld [vmem:[%s14141_s1 + $0x2d8] ss:$72 sps:$4 sm:$0xff]   ;;  %v9524_v19 = vld [vmem:[%s14141_s1 + $0x24c] ss:$72 sps:$4 sm:$0xff]  }
  0x2f   : > { %5546 = vmatpush1.bf16.msra.mxu1 %v9442_v27  ;;  %5506 = vmatprep.subr.bf16.mxu0 %v9443_v28  ;;  %v9521_v18 = vld [vmem:[%s14141_s1 + $0x1444] ss:$72 sps:$4 sm:$0xff]   ;;  %v9519_v20 = vld [vmem:[%s14141_s1 + $0x1440] ss:$72 sps:$4 sm:$0xff]   ;;  %v9527_v22 = vld [vmem:[%s14141_s1 + $0x13b4] ss:$72 sps:$4 sm:$0xff]  }
  0x30   : > { %5547 = vmatprep.subr.bf16.mxu1 %v9445_v29  ;;  %v9522_v21 = vld [vmem:[%s14141_s1 + $0x248] ss:$72 sps:$4 sm:$0xff]   ;;  %v9530_v23 = vld [vmem:[%s14141_s1 + $0x1bc] ss:$72 sps:$4 sm:$0xff]   ;;  %v9528_v25 = vld [vmem:[%s14141_s1 + $0x1b8] ss:$72 sps:$4 sm:$0xff]  }
  0x31   : > { %v9525_v24 = vld [vmem:[%s14141_s1 + $0x13b0] ss:$72 sps:$4 sm:$0xff]   ;;  %v9533_v26 = vld [vmem:[%s14141_s1 + $0x1324] ss:$72 sps:$4 sm:$0xff]   ;;  %v9531_v28 = vld [vmem:[%s14141_s1 + $0x1320] ss:$72 sps:$4 sm:$0xff]  }
  0x32   : > { %5507 = vmatpush1.bf16.msra.mxu0 %v9447_v30  ;;  %v9536_v27 = vld [vmem:[%s14141_s1 + $0x12c] ss:$72 sps:$4 sm:$0xff]   ;;  %v9534_v29 = vld [vmem:[%s14141_s1 + $0x128] ss:$72 sps:$4 sm:$0xff]   ;;  %vm7388_vm4 = vcmask 64512   ;;  %s10753_s7 = scalar_lea.vmem %s8140_s27, 768 }
  0x33   : > { %5548 = vmatpush1.bf16.msra.mxu1 %v9448_v31  ;;  %5508 = vmatprep.subr.bf16.mxu0 %v9449_v32  ;;  %v9539_v30 = vld [vmem:[%s14141_s1 + $0x1294] ss:$72 sps:$4 sm:$0xff]   ;;  %v9555_v46 = vld [vmem:[%s14141_s1 + $0x19e0] ss:$72 sps:$4 sm:$0xff]   ;;  %p10754_p12 = scmp.ne.s32.totalorder %s8140_s27, %s10753_s7 }
  0x34   : > { %5549 = vmatprep.subr.bf16.mxu1 %v9451_v33  ;;  %v9542_v31 = vld [vmem:[%s14141_s1 + $0x9c] ss:$72 sps:$4 sm:$0xff]   ;;  %v11203_v32 = vld [vmem:[%s11047_s6 + $0x10] sm:$0xff] }
  0x35   : > { %v9537_v33 = vld [vmem:[%s14141_s1 + $0x1290] ss:$72 sps:$4 sm:$0xff]   ;;  %p10755_p13 = pnand %p10754_p12, %p10895_p4 }
  0x36   : > { %5509 = vmatpush2.bf16.msra.mxu0 %v9453_v34  ;;  %v11210_v34 = vcombine.high %v11203_v32, %v11203_v32  ;;  %v9558_v48 = vld [vmem:[%s14141_s1 + $0x7e8] ss:$72 sps:$4 sm:$0xff]  }
  0x37   : > { %5550 = vmatpush2.bf16.msra.mxu1 %v9454_v35  ;;  %5510 = vmatprep.subr.bf16.mxu0 %v9455_v36  ;;  %v9540_v35 = vld [vmem:[%s14141_s1 + $0x98] ss:$72 sps:$4 sm:$0xff]   ;;  %v9545_v36 = vld [vmem:[%s14141_s1 + $0x1204] ss:$72 sps:$4 sm:$0xff]   ;;  %p10756_p0 = pneg %p10755_p13 }
  0x38   : > { %5551 = vmatprep.subr.bf16.mxu1 %v9457_v37  ;;  %v9548_v37 = vld [vmem:[%s14141_s1 + $0xc] ss:$72 sps:$4 sm:$0xff]  }
  0x3a   : > { %5511 = vmatpush2.bf16.msra.mxu0 %v9459_v38  ;;  %v9543_v38 = vld [vmem:[%s14141_s1 + $0x1200] ss:$72 sps:$4 sm:$0xff]  }
  0x3b   : > { %5552 = vmatpush2.bf16.msra.mxu1 %v9460_v39  ;;  %5512 = vmatprep.subr.bf16.mxu0 %v9461_v40  ;;  %v9546_v39 = vld [vmem:[%s14141_s1 + $0x8] ss:$72 sps:$4 sm:$0xff]   ;;  %v9551_v40 = vld [vmem:[%s14141_s1 + $0x1a74] ss:$72 sps:$4 sm:$0xff]  }
  0x3c   : > { %5553 = vmatprep.subr.bf16.mxu1 %v9463_v41  ;;  %v9554_v41 = vld [vmem:[%s14141_s1 + $0x87c] ss:$72 sps:$4 sm:$0xff]  }
  0x3e   : > { %5513 = vmatpush2.bf16.msra.mxu0 %v9465_v42  ;;  %v9549_v42 = vld [vmem:[%s14141_s1 + $0x1a70] ss:$72 sps:$4 sm:$0xff]  }
  0x3f   : > { %5554 = vmatpush2.bf16.msra.mxu1 %v9466_v43  ;;  %5514 = vmatprep.subr.bf16.mxu0 %v9467_v44  ;;  %v9552_v43 = vld [vmem:[%s14141_s1 + $0x878] ss:$72 sps:$4 sm:$0xff]   ;;  %v9557_v44 = vld [vmem:[%s14141_s1 + $0x19e4] ss:$72 sps:$4 sm:$0xff]  }
  0x40   : > { %5555 = vmatprep.subr.bf16.mxu1 %v9469_v45  ;;  %v9560_v45 = vld [vmem:[%s14141_s1 + $0x7ec] ss:$72 sps:$4 sm:$0xff]  }
  0x42   : > { %5515 = vmatpush2.bf16.msra.mxu0 %v9471_v49  ;;  %v9563_v49 = vld [vmem:[%s14141_s1 + $0x1954] ss:$72 sps:$4 sm:$0xff]  }
  0x43   : > { %5556 = vmatpush2.bf16.msra.mxu1 %v9472_v50  ;;  %5516 = vmatprep.subr.bf16.mxu0 %v9473_v52  ;;  %v9566_v50 = vld [vmem:[%s14141_s1 + $0x75c] ss:$72 sps:$4 sm:$0xff]   ;;  %v9561_v52 = vld [vmem:[%s14141_s1 + $0x1950] ss:$72 sps:$4 sm:$0xff]  }
  0x44   : > { %5557 = vmatprep.subr.bf16.mxu1 %v9475_v53  ;;  %v9564_v53 = vld [vmem:[%s14141_s1 + $0x758] ss:$72 sps:$4 sm:$0xff]  }
  0x46   : > { %5517 = vmatpush2.bf16.msra.mxu0 %v9477_v54  ;;  %v9569_v54 = vld [vmem:[%s14141_s1 + $0x18c4] ss:$72 sps:$4 sm:$0xff]  }
  0x47   : > { %5558 = vmatpush2.bf16.msra.mxu1 %v9478_v55  ;;  %5518 = vmatprep.subr.bf16.mxu0 %v9479_v56  ;;  %v9572_v55 = vld [vmem:[%s14141_s1 + $0x6cc] ss:$72 sps:$4 sm:$0xff]   ;;  %v9567_v56 = vld [vmem:[%s14141_s1 + $0x18c0] ss:$72 sps:$4 sm:$0xff]  }
  0x48   : > { %5559 = vmatprep.subr.bf16.mxu1 %v9481_v57  ;;  %v9570_v57 = vld [vmem:[%s14141_s1 + $0x6c8] ss:$72 sps:$4 sm:$0xff]  }
  0x4a   : > { %5519 = vmatpush2.bf16.msra.mxu0 %v9483_v58  ;;  %v9575_v58 = vld [vmem:[%s14141_s1 + $0x1834] ss:$72 sps:$4 sm:$0xff]  }
  0x4b   : > { %5560 = vmatpush2.bf16.msra.mxu1 %v9484_v59  ;;  %5520 = vmatprep.subr.bf16.mxu0 %v9485_v60  ;;  %v9578_v59 = vld [vmem:[%s14141_s1 + $0x63c] ss:$72 sps:$4 sm:$0xff]   ;;  %v9573_v60 = vld [vmem:[%s14141_s1 + $0x1830] ss:$72 sps:$4 sm:$0xff]  }
  0x4c   : > { %5561 = vmatprep.subr.bf16.mxu1 %v9487_v61  ;;  %v9576_v61 = vld [vmem:[%s14141_s1 + $0x638] ss:$72 sps:$4 sm:$0xff]  }
  0x4e   : > { %5521 = vmatpush2.bf16.msra.mxu0 %v9489_v62  ;;  %v9581_v62 = vld [vmem:[%s14141_s1 + $0x17a4] ss:$72 sps:$4 sm:$0xff]  }
  0x4f   : > { %5562 = vmatpush2.bf16.msra.mxu1 %v9490_v63  ;;  %5522 = vmatprep.subr.bf16.mxu0 %v9491_v0  ;;  %v9584_v63 = vld [vmem:[%s14141_s1 + $0x5ac] ss:$72 sps:$4 sm:$0xff]   ;;  %v9579_v0 = vld [vmem:[%s14141_s1 + $0x17a0] ss:$72 sps:$4 sm:$0xff]  }
  0x50   : > { %5563 = vmatprep.subr.bf16.mxu1 %v9493_v1  ;;  %v9582_v1 = vld [vmem:[%s14141_s1 + $0x5a8] ss:$72 sps:$4 sm:$0xff]  }
  0x52   : > { %5523 = vmatpush2.bf16.msra.mxu0 %v9495_v2  ;;  %v9587_v2 = vld [vmem:[%s14141_s1 + $0x1714] ss:$72 sps:$4 sm:$0xff]  }
  0x53   : > { %5564 = vmatpush2.bf16.msra.mxu1 %v9496_v3  ;;  %5574 = vmatprep.subr.bf16.mxu0 %v9503_v4  ;;  %v9590_v3 = vld [vmem:[%s14141_s1 + $0x51c] ss:$72 sps:$4 sm:$0xff]   ;;  %v9585_v4 = vld [vmem:[%s14141_s1 + $0x1710] ss:$72 sps:$4 sm:$0xff]  }
  0x54   : > { %5615 = vmatprep.subr.bf16.mxu1 %v9506_v5  ;;  %v9588_v5 = vld [vmem:[%s14141_s1 + $0x518] ss:$72 sps:$4 sm:$0xff]  }
  0x55   : > { %5525 = vmatmul.mubr.bf16.vlgmr.msra.gmra.mxu0 %v11123_v6 }
  0x56   : > { %5566 = vmatmul.mubr.bf16.vlgmr.msra.gmra.mxu1 %v11125_v7  ;;  %5575 = vmatpush1.bf16.msra.mxu0 %v9501_v8  ;;  %v9593_v8 = vld [vmem:[%s14141_s1 + $0x1684] ss:$72 sps:$4 sm:$0xff]  }
  0x57   : > { %5616 = vmatpush1.bf16.msra.mxu1 %v9504_v9  ;;  %5576 = vmatprep.subr.bf16.mxu0 %v9509_v10  ;;  %v9596_v9 = vld [vmem:[%s14141_s1 + $0x48c] ss:$72 sps:$4 sm:$0xff]   ;;  %v9591_v10 = vld [vmem:[%s14141_s1 + $0x1680] ss:$72 sps:$4 sm:$0xff]  }
  0x58   : > { %5617 = vmatprep.subr.bf16.mxu1 %v9512_v11  ;;  %5647 = vmatprep.mubr.bf16.mxu1 %v11056_v47  ;;  %v9594_v11 = vld [vmem:[%s14141_s1 + $0x488] ss:$72 sps:$4 sm:$0xff]  }
  0x59   : > { %5606 = vmatprep.mubr.bf16.mxu0 %v11210_v34 }
  0x5a   : > { %5577 = vmatpush1.bf16.msra.mxu0 %v9507_v12  ;;  %v9601_v12 = vld [vmem:[%s14141_s1 + $0xcfc] ss:$72 sps:$4 sm:$0xff]  }
  0x5b   : > { %5618 = vmatpush1.bf16.msra.mxu1 %v9510_v13  ;;  %5578 = vmatprep.subr.bf16.mxu0 %v9515_v14  ;;  %v9604_v13 = vld [vmem:[%s14141_s1 + $0x15fc] ss:$72 sps:$4 sm:$0xff]   ;;  %v11332_v14 = vcombine.low %v11203_v32, %v11203_v32  ;;  %v9626_v32 = vld [vmem:[%s14141_s1 + $0x13b8] ss:$72 sps:$4 sm:$0xff]  }
  0x5c   : > { %5619 = vmatprep.subr.bf16.mxu1 %v9518_v15  ;;  %v9599_v15 = vld [vmem:[%s14141_s1 + $0xcf8] ss:$72 sps:$4 sm:$0xff]  }
  0x5e   : > { %5579 = vmatpush1.bf16.msra.mxu0 %v9513_v16  ;;  %v9602_v16 = vld [vmem:[%s14141_s1 + $0x15f8] ss:$72 sps:$4 sm:$0xff]  }
  0x5f   : > { %5620 = vmatpush1.bf16.msra.mxu1 %v9516_v17  ;;  %5580 = vmatprep.subr.bf16.mxu0 %v9521_v18  ;;  %v9607_v17 = vld [vmem:[%s14141_s1 + $0xc6c] ss:$72 sps:$4 sm:$0xff]  }
  0x60   : > { %5621 = vmatprep.subr.bf16.mxu1 %v9524_v19  ;;  %v9610_v18 = vld [vmem:[%s14141_s1 + $0x156c] ss:$72 sps:$4 sm:$0xff]   ;;  %v9605_v19 = vld [vmem:[%s14141_s1 + $0xc68] ss:$72 sps:$4 sm:$0xff]  }
  0x62   : > { %5581 = vmatpush1.bf16.msra.mxu0 %v9519_v20  ;;  %v9608_v20 = vld [vmem:[%s14141_s1 + $0x1568] ss:$72 sps:$4 sm:$0xff]  }
  0x63   : > { %5622 = vmatpush1.bf16.msra.mxu1 %v9522_v21  ;;  %5582 = vmatprep.subr.bf16.mxu0 %v9527_v22  ;;  %v9613_v21 = vld [vmem:[%s14141_s1 + $0xbdc] ss:$72 sps:$4 sm:$0xff]  }
  0x64   : > { %5623 = vmatprep.subr.bf16.mxu1 %v9530_v23  ;;  %v9616_v22 = vld [vmem:[%s14141_s1 + $0x14dc] ss:$72 sps:$4 sm:$0xff]   ;;  %v9611_v23 = vld [vmem:[%s14141_s1 + $0xbd8] ss:$72 sps:$4 sm:$0xff]  }
  0x66   : > { %5583 = vmatpush1.bf16.msra.mxu0 %v9525_v24  ;;  %v9614_v24 = vld [vmem:[%s14141_s1 + $0x14d8] ss:$72 sps:$4 sm:$0xff]  }
  0x67   : > { %5624 = vmatpush1.bf16.msra.mxu1 %v9528_v25  ;;  %5584 = vmatprep.subr.bf16.mxu0 %v9533_v26  ;;  %v9619_v25 = vld [vmem:[%s14141_s1 + $0xb4c] ss:$72 sps:$4 sm:$0xff]  }
  0x68   : > { %5625 = vmatprep.subr.bf16.mxu1 %v9536_v27  ;;  %v9622_v26 = vld [vmem:[%s14141_s1 + $0x144c] ss:$72 sps:$4 sm:$0xff]   ;;  %v9617_v27 = vld [vmem:[%s14141_s1 + $0xb48] ss:$72 sps:$4 sm:$0xff]  }
  0x6a   : > { %5585 = vmatpush1.bf16.msra.mxu0 %v9531_v28  ;;  %v9620_v28 = vld [vmem:[%s14141_s1 + $0x1448] ss:$72 sps:$4 sm:$0xff]  }
  0x6b   : > { %5626 = vmatpush1.bf16.msra.mxu1 %v9534_v29  ;;  %5586 = vmatprep.subr.bf16.mxu0 %v9539_v30  ;;  %v9625_v29 = vld [vmem:[%s14141_s1 + $0xabc] ss:$72 sps:$4 sm:$0xff]  }
  0x6c   : > { %5627 = vmatprep.subr.bf16.mxu1 %v9542_v31  ;;  %v9628_v30 = vld [vmem:[%s14141_s1 + $0x13bc] ss:$72 sps:$4 sm:$0xff]   ;;  %v9623_v31 = vld [vmem:[%s14141_s1 + $0xab8] ss:$72 sps:$4 sm:$0xff]  }
  0x6e   : > { %5587 = vmatpush1.bf16.msra.mxu0 %v9537_v33  ;;  %v9631_v33 = vld [vmem:[%s14141_s1 + $0xa2c] ss:$72 sps:$4 sm:$0xff]  }
  0x6f   : > { %5628 = vmatpush1.bf16.msra.mxu1 %v9540_v35  ;;  %5588 = vmatprep.subr.bf16.mxu0 %v9545_v36  ;;  %v9634_v35 = vld [vmem:[%s14141_s1 + $0x132c] ss:$72 sps:$4 sm:$0xff]   ;;  %v9629_v36 = vld [vmem:[%s14141_s1 + $0xa28] ss:$72 sps:$4 sm:$0xff]  }
  0x70   : > { %5629 = vmatprep.subr.bf16.mxu1 %v9548_v37  ;;  %v9632_v37 = vld [vmem:[%s14141_s1 + $0x1328] ss:$72 sps:$4 sm:$0xff]  }
  0x72   : > { %5589 = vmatpush1.bf16.msra.mxu0 %v9543_v38  ;;  %v9637_v38 = vld [vmem:[%s14141_s1 + $0x99c] ss:$72 sps:$4 sm:$0xff]  }
  0x73   : > { %5630 = vmatpush1.bf16.msra.mxu1 %v9546_v39  ;;  %5590 = vmatprep.subr.bf16.mxu0 %v9551_v40  ;;  %v9640_v39 = vld [vmem:[%s14141_s1 + $0x129c] ss:$72 sps:$4 sm:$0xff]   ;;  %v9635_v40 = vld [vmem:[%s14141_s1 + $0x998] ss:$72 sps:$4 sm:$0xff]  }
  0x74   : > { %5631 = vmatprep.subr.bf16.mxu1 %v9554_v41  ;;  %v9638_v41 = vld [vmem:[%s14141_s1 + $0x1298] ss:$72 sps:$4 sm:$0xff]  }
  0x76   : > { %5591 = vmatpush2.bf16.msra.mxu0 %v9549_v42  ;;  %v9643_v42 = vld [vmem:[%s14141_s1 + $0x90c] ss:$72 sps:$4 sm:$0xff]  }
  0x77   : > { %5632 = vmatpush2.bf16.msra.mxu1 %v9552_v43  ;;  %5592 = vmatprep.subr.bf16.mxu0 %v9557_v44  ;;  %v9646_v43 = vld [vmem:[%s14141_s1 + $0x120c] ss:$72 sps:$4 sm:$0xff]   ;;  %v9641_v44 = vld [vmem:[%s14141_s1 + $0x908] ss:$72 sps:$4 sm:$0xff]  }
  0x78   : > { %5633 = vmatprep.subr.bf16.mxu1 %v9560_v45  ;;  %v9644_v45 = vld [vmem:[%s14141_s1 + $0x1208] ss:$72 sps:$4 sm:$0xff]  }
  0x7a   : > { %5593 = vmatpush2.bf16.msra.mxu0 %v9555_v46  ;;  %v9649_v46 = vld [vmem:[%s14141_s1 + $0x117c] ss:$72 sps:$4 sm:$0xff]  }
  0x7b   : > { %5634 = vmatpush2.bf16.msra.mxu1 %v9558_v48  ;;  %5594 = vmatprep.subr.bf16.mxu0 %v9563_v49  ;;  %v9652_v48 = vld [vmem:[%s14141_s1 + $0x1a7c] ss:$72 sps:$4 sm:$0xff]   ;;  %v9647_v49 = vld [vmem:[%s14141_s1 + $0x1178] ss:$72 sps:$4 sm:$0xff]  }
  0x7c   : > { %5635 = vmatprep.subr.bf16.mxu1 %v9566_v50  ;;  %v9650_v50 = vld [vmem:[%s14141_s1 + $0x1a78] ss:$72 sps:$4 sm:$0xff]  }
  0x7e   : > { %5595 = vmatpush2.bf16.msra.mxu0 %v9561_v52  ;;  %v9655_v52 = vld [vmem:[%s14141_s1 + $0x10ec] ss:$72 sps:$4 sm:$0xff]  }
  0x7f   : > { %5636 = vmatpush2.bf16.msra.mxu1 %v9564_v53  ;;  %5596 = vmatprep.subr.bf16.mxu0 %v9569_v54  ;;  %v9658_v53 = vld [vmem:[%s14141_s1 + $0x19ec] ss:$72 sps:$4 sm:$0xff]   ;;  %v9653_v54 = vld [vmem:[%s14141_s1 + $0x10e8] ss:$72 sps:$4 sm:$0xff]  }
  0x80   : > { %5637 = vmatprep.subr.bf16.mxu1 %v9572_v55  ;;  %v9656_v55 = vld [vmem:[%s14141_s1 + $0x19e8] ss:$72 sps:$4 sm:$0xff]  }
  0x82   : > { %5597 = vmatpush2.bf16.msra.mxu0 %v9567_v56  ;;  %v9661_v56 = vld [vmem:[%s14141_s1 + $0x105c] ss:$72 sps:$4 sm:$0xff]  }
  0x83   : > { %5638 = vmatpush2.bf16.msra.mxu1 %v9570_v57  ;;  %5598 = vmatprep.subr.bf16.mxu0 %v9575_v58  ;;  %v9664_v57 = vld [vmem:[%s14141_s1 + $0x195c] ss:$72 sps:$4 sm:$0xff]   ;;  %v9659_v58 = vld [vmem:[%s14141_s1 + $0x1058] ss:$72 sps:$4 sm:$0xff]  }
  0x84   : > { %5639 = vmatprep.subr.bf16.mxu1 %v9578_v59  ;;  %v9662_v59 = vld [vmem:[%s14141_s1 + $0x1958] ss:$72 sps:$4 sm:$0xff]  }
  0x86   : > { %5599 = vmatpush2.bf16.msra.mxu0 %v9573_v60  ;;  %v9667_v60 = vld [vmem:[%s14141_s1 + $0xfcc] ss:$72 sps:$4 sm:$0xff]  }
  0x87   : > { %5640 = vmatpush2.bf16.msra.mxu1 %v9576_v61  ;;  %5600 = vmatprep.subr.bf16.mxu0 %v9581_v62  ;;  %v9670_v61 = vld [vmem:[%s14141_s1 + $0x18cc] ss:$72 sps:$4 sm:$0xff]   ;;  %v9665_v62 = vld [vmem:[%s14141_s1 + $0xfc8] ss:$72 sps:$4 sm:$0xff]  }
  0x88   : > { %5641 = vmatprep.subr.bf16.mxu1 %v9584_v63  ;;  %v9668_v63 = vld [vmem:[%s14141_s1 + $0x18c8] ss:$72 sps:$4 sm:$0xff]  }
  0x8a   : > { %5601 = vmatpush2.bf16.msra.mxu0 %v9579_v0  ;;  %v9673_v0 = vld [vmem:[%s14141_s1 + $0xf3c] ss:$72 sps:$4 sm:$0xff]  }
  0x8b   : > { %5642 = vmatpush2.bf16.msra.mxu1 %v9582_v1  ;;  %5602 = vmatprep.subr.bf16.mxu0 %v9587_v2  ;;  %v9676_v1 = vld [vmem:[%s14141_s1 + $0x183c] ss:$72 sps:$4 sm:$0xff]   ;;  %v9671_v2 = vld [vmem:[%s14141_s1 + $0xf38] ss:$72 sps:$4 sm:$0xff]  }
  0x8c   : > { %5643 = vmatprep.subr.bf16.mxu1 %v9590_v3  ;;  %v9674_v3 = vld [vmem:[%s14141_s1 + $0x1838] ss:$72 sps:$4 sm:$0xff]  }
  0x8e   : > { %5603 = vmatpush2.bf16.msra.mxu0 %v9585_v4  ;;  %v9679_v4 = vld [vmem:[%s14141_s1 + $0xeac] ss:$72 sps:$4 sm:$0xff]  }
  0x8f   : > { %5644 = vmatpush2.bf16.msra.mxu1 %v9588_v5  ;;  %5604 = vmatprep.subr.bf16.mxu0 %v9593_v8  ;;  %v9682_v5 = vld [vmem:[%s14141_s1 + $0x17ac] ss:$72 sps:$4 sm:$0xff]   ;;  %v9677_v8 = vld [vmem:[%s14141_s1 + $0xea8] ss:$72 sps:$4 sm:$0xff]  }
  0x90   : > { %5645 = vmatprep.subr.bf16.mxu1 %v9596_v9  ;;  %v9680_v9 = vld [vmem:[%s14141_s1 + $0x17a8] ss:$72 sps:$4 sm:$0xff]  }
  0x92   : > { %5605 = vmatpush2.bf16.msra.mxu0 %v9591_v10  ;;  %v9685_v10 = vld [vmem:[%s14141_s1 + $0xe1c] ss:$72 sps:$4 sm:$0xff]  }
  0x93   : > { %5646 = vmatpush2.bf16.msra.mxu1 %v9594_v11  ;;  %5656 = vmatprep.subr.bf16.mxu0 %v9601_v12  ;;  %v9688_v11 = vld [vmem:[%s14141_s1 + $0x171c] ss:$72 sps:$4 sm:$0xff]   ;;  %v9683_v12 = vld [vmem:[%s14141_s1 + $0xe18] ss:$72 sps:$4 sm:$0xff]  }
  0x94   : > { %5697 = vmatprep.subr.bf16.mxu1 %v9604_v13  ;;  %v9686_v13 = vld [vmem:[%s14141_s1 + $0x1718] ss:$72 sps:$4 sm:$0xff]  }
  0x95   : > { %5607 = vmatmul.mubr.bf16.vlgmr.msra.gmra.mxu0 %v11332_v14 }
  0x96   : > { %5648 = vmatmul.mubr.bf16.vlgmr.msra.gmra.mxu1 %v11123_v6  ;;  %5657 = vmatpush1.bf16.msra.mxu0 %v9599_v15  ;;  %v9691_v15 = vld [vmem:[%s14141_s1 + $0xd8c] ss:$72 sps:$4 sm:$0xff]  }
  0x97   : > { %5698 = vmatpush1.bf16.msra.mxu1 %v9602_v16  ;;  %5658 = vmatprep.subr.bf16.mxu0 %v9607_v17  ;;  %v9694_v16 = vld [vmem:[%s14141_s1 + $0x168c] ss:$72 sps:$4 sm:$0xff]   ;;  %v9689_v17 = vld [vmem:[%s14141_s1 + $0xd88] ss:$72 sps:$4 sm:$0xff]  }
  0x98   : > { %5699 = vmatprep.subr.bf16.mxu1 %v9610_v18  ;;  %5688 = vmatprep.mubr.bf16.mxu0 %v11065_v51  ;;  %v9692_v18 = vld [vmem:[%s14141_s1 + $0x1688] ss:$72 sps:$4 sm:$0xff]  }
  0x99   : > { %5729 = vmatprep.mubr.bf16.mxu1 %v11210_v34 }
  0x9a   : > { %5659 = vmatpush1.bf16.msra.mxu0 %v9605_v19  ;;  %v9697_v19 = vld [vmem:[%s14141_s1 + $0x404] ss:$72 sps:$4 sm:$0xff]  }
  0x9b   : > { %5700 = vmatpush1.bf16.msra.mxu1 %v9608_v20  ;;  %5660 = vmatprep.subr.bf16.mxu0 %v9613_v21  ;;  %v9700_v20 = vld [vmem:[%s14141_s1 + $0xd04] ss:$72 sps:$4 sm:$0xff]   ;;  %v9695_v21 = vld [vmem:[%s14141_s1 + $0x400] ss:$72 sps:$4 sm:$0xff]  }
  0x9c   : > { %5701 = vmatprep.subr.bf16.mxu1 %v9616_v22  ;;  %v9698_v22 = vld [vmem:[%s14141_s1 + $0xd00] ss:$72 sps:$4 sm:$0xff]  }
  0x9e   : > { %5661 = vmatpush1.bf16.msra.mxu0 %v9611_v23  ;;  %v9703_v23 = vld [vmem:[%s14141_s1 + $0x374] ss:$72 sps:$4 sm:$0xff]  }
  0x9f   : > { %5702 = vmatpush1.bf16.msra.mxu1 %v9614_v24  ;;  %5662 = vmatprep.subr.bf16.mxu0 %v9619_v25  ;;  %v9706_v24 = vld [vmem:[%s14141_s1 + $0xc74] ss:$72 sps:$4 sm:$0xff]   ;;  %v9701_v25 = vld [vmem:[%s14141_s1 + $0x370] ss:$72 sps:$4 sm:$0xff]  }
  0xa0   : > { %5703 = vmatprep.subr.bf16.mxu1 %v9622_v26  ;;  %v9704_v26 = vld [vmem:[%s14141_s1 + $0xc70] ss:$72 sps:$4 sm:$0xff]  }
  0xa2   : > { %5663 = vmatpush1.bf16.msra.mxu0 %v9617_v27  ;;  %v9709_v27 = vld [vmem:[%s14141_s1 + $0x2e4] ss:$72 sps:$4 sm:$0xff]  }
  0xa3   : > { %5704 = vmatpush1.bf16.msra.mxu1 %v9620_v28  ;;  %5664 = vmatprep.subr.bf16.mxu0 %v9625_v29  ;;  %v9712_v28 = vld [vmem:[%s14141_s1 + $0xbe4] ss:$72 sps:$4 sm:$0xff]   ;;  %v9707_v29 = vld [vmem:[%s14141_s1 + $0x2e0] ss:$72 sps:$4 sm:$0xff]  }
  0xa4   : > { %5705 = vmatprep.subr.bf16.mxu1 %v9628_v30  ;;  %v9710_v30 = vld [vmem:[%s14141_s1 + $0xbe0] ss:$72 sps:$4 sm:$0xff]  }
  0xa6   : > { %5665 = vmatpush1.bf16.msra.mxu0 %v9623_v31  ;;  %v9715_v31 = vld [vmem:[%s14141_s1 + $0x254] ss:$72 sps:$4 sm:$0xff]  }
  0xa7   : > { %5706 = vmatpush1.bf16.msra.mxu1 %v9626_v32  ;;  %5666 = vmatprep.subr.bf16.mxu0 %v9631_v33  ;;  %v9718_v32 = vld [vmem:[%s14141_s1 + $0xb54] ss:$72 sps:$4 sm:$0xff]   ;;  %v9713_v33 = vld [vmem:[%s14141_s1 + $0x250] ss:$72 sps:$4 sm:$0xff]  }
  0xa8   : > { %5707 = vmatprep.subr.bf16.mxu1 %v9634_v35  ;;  %v9716_v35 = vld [vmem:[%s14141_s1 + $0xb50] ss:$72 sps:$4 sm:$0xff]  }
  0xaa   : > { %5667 = vmatpush1.bf16.msra.mxu0 %v9629_v36  ;;  %v9721_v36 = vld [vmem:[%s14141_s1 + $0x1c4] ss:$72 sps:$4 sm:$0xff]  }
  0xab   : > { %5708 = vmatpush1.bf16.msra.mxu1 %v9632_v37  ;;  %5668 = vmatprep.subr.bf16.mxu0 %v9637_v38  ;;  %v9724_v37 = vld [vmem:[%s14141_s1 + $0xac4] ss:$72 sps:$4 sm:$0xff]   ;;  %v9719_v38 = vld [vmem:[%s14141_s1 + $0x1c0] ss:$72 sps:$4 sm:$0xff]  }
  0xac   : > { %5709 = vmatprep.subr.bf16.mxu1 %v9640_v39  ;;  %v9722_v39 = vld [vmem:[%s14141_s1 + $0xac0] ss:$72 sps:$4 sm:$0xff]  }
  0xae   : > { %5669 = vmatpush1.bf16.msra.mxu0 %v9635_v40  ;;  %v9727_v40 = vld [vmem:[%s14141_s1 + $0x134] ss:$72 sps:$4 sm:$0xff]  }
  0xaf   : > { %5710 = vmatpush1.bf16.msra.mxu1 %v9638_v41  ;;  %5670 = vmatprep.subr.bf16.mxu0 %v9643_v42  ;;  %v9730_v41 = vld [vmem:[%s14141_s1 + $0xa34] ss:$72 sps:$4 sm:$0xff]   ;;  %v9725_v42 = vld [vmem:[%s14141_s1 + $0x130] ss:$72 sps:$4 sm:$0xff]  }
  0xb0   : > { %5711 = vmatprep.subr.bf16.mxu1 %v9646_v43  ;;  %v9728_v43 = vld [vmem:[%s14141_s1 + $0xa30] ss:$72 sps:$4 sm:$0xff]  }
  0xb2   : > { %5671 = vmatpush1.bf16.msra.mxu0 %v9641_v44  ;;  %v9733_v44 = vld [vmem:[%s14141_s1 + $0xa4] ss:$72 sps:$4 sm:$0xff]  }
  0xb3   : > { %5712 = vmatpush1.bf16.msra.mxu1 %v9644_v45  ;;  %5672 = vmatprep.subr.bf16.mxu0 %v9649_v46  ;;  %v9736_v45 = vld [vmem:[%s14141_s1 + $0x9a4] ss:$72 sps:$4 sm:$0xff]   ;;  %v9731_v46 = vld [vmem:[%s14141_s1 + $0xa0] ss:$72 sps:$4 sm:$0xff]  }
  0xb4   : > { %5713 = vmatprep.subr.bf16.mxu1 %v9652_v48  ;;  %v9734_v48 = vld [vmem:[%s14141_s1 + $0x9a0] ss:$72 sps:$4 sm:$0xff]  }
  0xb6   : > { %5673 = vmatpush2.bf16.msra.mxu0 %v9647_v49  ;;  %v9739_v49 = vld [vmem:[%s14141_s1 + $0x14] ss:$72 sps:$4 sm:$0xff]  }
  0xb7   : > { %5714 = vmatpush2.bf16.msra.mxu1 %v9650_v50  ;;  %5674 = vmatprep.subr.bf16.mxu0 %v9655_v52  ;;  %v9742_v50 = vld [vmem:[%s14141_s1 + $0x914] ss:$72 sps:$4 sm:$0xff]   ;;  %v9737_v52 = vld [vmem:[%s14141_s1 + $0x10] ss:$72 sps:$4 sm:$0xff]  }
  0xb8   : > { %5715 = vmatprep.subr.bf16.mxu1 %v9658_v53  ;;  %v9740_v53 = vld [vmem:[%s14141_s1 + $0x910] ss:$72 sps:$4 sm:$0xff]  }
  0xba   : > { %5675 = vmatpush2.bf16.msra.mxu0 %v9653_v54  ;;  %v9745_v54 = vld [vmem:[%s14141_s1 + $0x884] ss:$72 sps:$4 sm:$0xff]  }
  0xbb   : > { %5716 = vmatpush2.bf16.msra.mxu1 %v9656_v55  ;;  %5676 = vmatprep.subr.bf16.mxu0 %v9661_v56  ;;  %v9748_v55 = vld [vmem:[%s14141_s1 + $0x1184] ss:$72 sps:$4 sm:$0xff]   ;;  %v9743_v56 = vld [vmem:[%s14141_s1 + $0x880] ss:$72 sps:$4 sm:$0xff]  }
  0xbc   : > { %5717 = vmatprep.subr.bf16.mxu1 %v9664_v57  ;;  %v9746_v57 = vld [vmem:[%s14141_s1 + $0x1180] ss:$72 sps:$4 sm:$0xff]  }
  0xbe   : > { %5677 = vmatpush2.bf16.msra.mxu0 %v9659_v58  ;;  %v9751_v58 = vld [vmem:[%s14141_s1 + $0x7f4] ss:$72 sps:$4 sm:$0xff]  }
  0xbf   : > { %5718 = vmatpush2.bf16.msra.mxu1 %v9662_v59  ;;  %5678 = vmatprep.subr.bf16.mxu0 %v9667_v60  ;;  %v9754_v59 = vld [vmem:[%s14141_s1 + $0x10f4] ss:$72 sps:$4 sm:$0xff]   ;;  %v9749_v60 = vld [vmem:[%s14141_s1 + $0x7f0] ss:$72 sps:$4 sm:$0xff]  }
  0xc0   : > { %5719 = vmatprep.subr.bf16.mxu1 %v9670_v61  ;;  %v9752_v61 = vld [vmem:[%s14141_s1 + $0x10f0] ss:$72 sps:$4 sm:$0xff]  }
  0xc2   : > { %5679 = vmatpush2.bf16.msra.mxu0 %v9665_v62  ;;  %v9757_v62 = vld [vmem:[%s14141_s1 + $0x764] ss:$72 sps:$4 sm:$0xff]  }
  0xc3   : > { %5720 = vmatpush2.bf16.msra.mxu1 %v9668_v63  ;;  %5680 = vmatprep.subr.bf16.mxu0 %v9673_v0  ;;  %v9760_v63 = vld [vmem:[%s14141_s1 + $0x1064] ss:$72 sps:$4 sm:$0xff]   ;;  %v9755_v0 = vld [vmem:[%s14141_s1 + $0x760] ss:$72 sps:$4 sm:$0xff]  }
  0xc4   : > { %5721 = vmatprep.subr.bf16.mxu1 %v9676_v1  ;;  %v9758_v1 = vld [vmem:[%s14141_s1 + $0x1060] ss:$72 sps:$4 sm:$0xff]  }
  0xc6   : > { %5681 = vmatpush2.bf16.msra.mxu0 %v9671_v2  ;;  %v9763_v2 = vld [vmem:[%s14141_s1 + $0x6d4] ss:$72 sps:$4 sm:$0xff]  }
  0xc7   : > { %5722 = vmatpush2.bf16.msra.mxu1 %v9674_v3  ;;  %5682 = vmatprep.subr.bf16.mxu0 %v9679_v4  ;;  %v9766_v3 = vld [vmem:[%s14141_s1 + $0xfd4] ss:$72 sps:$4 sm:$0xff]   ;;  %v9761_v4 = vld [vmem:[%s14141_s1 + $0x6d0] ss:$72 sps:$4 sm:$0xff]  }
  0xc8   : > { %5723 = vmatprep.subr.bf16.mxu1 %v9682_v5  ;;  %v9764_v5 = vld [vmem:[%s14141_s1 + $0xfd0] ss:$72 sps:$4 sm:$0xff]  }
  0xca   : > { %5683 = vmatpush2.bf16.msra.mxu0 %v9677_v8  ;;  %v9769_v8 = vld [vmem:[%s14141_s1 + $0x644] ss:$72 sps:$4 sm:$0xff]  }
  0xcb   : > { %5724 = vmatpush2.bf16.msra.mxu1 %v9680_v9  ;;  %5684 = vmatprep.subr.bf16.mxu0 %v9685_v10  ;;  %v9772_v9 = vld [vmem:[%s14141_s1 + $0xf44] ss:$72 sps:$4 sm:$0xff]   ;;  %v9767_v10 = vld [vmem:[%s14141_s1 + $0x640] ss:$72 sps:$4 sm:$0xff]  }
  0xcc   : > { %5725 = vmatprep.subr.bf16.mxu1 %v9688_v11  ;;  %v9770_v11 = vld [vmem:[%s14141_s1 + $0xf40] ss:$72 sps:$4 sm:$0xff]  }
  0xce   : > { %5685 = vmatpush2.bf16.msra.mxu0 %v9683_v12  ;;  %v9775_v12 = vld [vmem:[%s14141_s1 + $0x5b4] ss:$72 sps:$4 sm:$0xff]  }
  0xcf   : > { %5726 = vmatpush2.bf16.msra.mxu1 %v9686_v13  ;;  %5686 = vmatprep.subr.bf16.mxu0 %v9691_v15  ;;  %v9778_v13 = vld [vmem:[%s14141_s1 + $0xeb4] ss:$72 sps:$4 sm:$0xff]   ;;  %v9773_v15 = vld [vmem:[%s14141_s1 + $0x5b0] ss:$72 sps:$4 sm:$0xff]  }
  0xd0   : > { %5727 = vmatprep.subr.bf16.mxu1 %v9694_v16  ;;  %v9776_v16 = vld [vmem:[%s14141_s1 + $0xeb0] ss:$72 sps:$4 sm:$0xff]  }
  0xd2   : > { %5687 = vmatpush2.bf16.msra.mxu0 %v9689_v17  ;;  %v9781_v17 = vld [vmem:[%s14141_s1 + $0x524] ss:$72 sps:$4 sm:$0xff]  }
  0xd3   : > { %5728 = vmatpush2.bf16.msra.mxu1 %v9692_v18  ;;  %5738 = vmatprep.subr.bf16.mxu0 %v9697_v19  ;;  %v9784_v18 = vld [vmem:[%s14141_s1 + $0xe24] ss:$72 sps:$4 sm:$0xff]   ;;  %v9779_v19 = vld [vmem:[%s14141_s1 + $0x520] ss:$72 sps:$4 sm:$0xff]  }
  0xd4   : > { %5779 = vmatprep.subr.bf16.mxu1 %v9700_v20  ;;  %v9782_v20 = vld [vmem:[%s14141_s1 + $0xe20] ss:$72 sps:$4 sm:$0xff]  }
  0xd5   : > { %5689 = vmatmul.mubr.bf16.vlgmr.msra.gmra.mxu0 %v11125_v7 }
  0xd6   : > { %5730 = vmatmul.mubr.bf16.vlgmr.msra.gmra.mxu1 %v11332_v14  ;;  %5739 = vmatpush1.bf16.msra.mxu0 %v9695_v21  ;;  %v9787_v21 = vld [vmem:[%s14141_s1 + $0x494] ss:$72 sps:$4 sm:$0xff]  }
  0xd7   : > { %5780 = vmatpush1.bf16.msra.mxu1 %v9698_v22  ;;  %5740 = vmatprep.subr.bf16.mxu0 %v9703_v23  ;;  %v9790_v22 = vld [vmem:[%s14141_s1 + $0xd94] ss:$72 sps:$4 sm:$0xff]   ;;  %v9785_v23 = vld [vmem:[%s14141_s1 + $0x490] ss:$72 sps:$4 sm:$0xff]  }
  0xd8   : > { %5781 = vmatprep.subr.bf16.mxu1 %v9706_v24  ;;  %5770 = vmatprep.mubr.bf16.mxu0 %v11056_v47  ;;  %v9788_v24 = vld [vmem:[%s14141_s1 + $0xd90] ss:$72 sps:$4 sm:$0xff]  }
  0xd9   : > { %5811 = vmatprep.mubr.bf16.mxu1 %v11065_v51 }
  0xda   : > { %5741 = vmatpush1.bf16.msra.mxu0 %v9701_v25  ;;  %v9793_v25 = vld [vmem:[%s14141_s1 + $0x1604] ss:$72 sps:$4 sm:$0xff]  }
  0xdb   : > { %5782 = vmatpush1.bf16.msra.mxu1 %v9704_v26  ;;  %5742 = vmatprep.subr.bf16.mxu0 %v9709_v27  ;;  %v9796_v26 = vld [vmem:[%s14141_s1 + $0x40c] ss:$72 sps:$4 sm:$0xff]   ;;  %v9791_v27 = vld [vmem:[%s14141_s1 + $0x1600] ss:$72 sps:$4 sm:$0xff]  }
  0xdc   : > { %5783 = vmatprep.subr.bf16.mxu1 %v9712_v28  ;;  %v9794_v28 = vld [vmem:[%s14141_s1 + $0x408] ss:$72 sps:$4 sm:$0xff]  }
  0xde   : > { %5743 = vmatpush1.bf16.msra.mxu0 %v9707_v29  ;;  %v9799_v29 = vld [vmem:[%s14141_s1 + $0x1574] ss:$72 sps:$4 sm:$0xff]  }
  0xdf   : > { %5784 = vmatpush1.bf16.msra.mxu1 %v9710_v30  ;;  %5744 = vmatprep.subr.bf16.mxu0 %v9715_v31  ;;  %v9802_v30 = vld [vmem:[%s14141_s1 + $0x37c] ss:$72 sps:$4 sm:$0xff]  }
  0xe0   : > { %5785 = vmatprep.subr.bf16.mxu1 %v9718_v32 }
  0xe2   : > { %5745 = vmatpush1.bf16.msra.mxu0 %v9713_v33  ;;  %v9797_v33 = vld [vmem:[%s14141_s1 + $0x1570] ss:$72 sps:$4 sm:$0xff]  }
  0xe3   : > { %5786 = vmatpush1.bf16.msra.mxu1 %v9716_v35  ;;  %5746 = vmatprep.subr.bf16.mxu0 %v9721_v36  ;;  %v9800_v35 = vld [vmem:[%s14141_s1 + $0x378] ss:$72 sps:$4 sm:$0xff]  }
  0xe4   : > { %5787 = vmatprep.subr.bf16.mxu1 %v9724_v37 }
  0xe6   : > { %5747 = vmatpush1.bf16.msra.mxu0 %v9719_v38  ;;  %v9805_v38 = vld [vmem:[%s14141_s1 + $0x14e4] ss:$72 sps:$4 sm:$0xff]  }
  0xe7   : > { %5788 = vmatpush1.bf16.msra.mxu1 %v9722_v39  ;;  %5748 = vmatprep.subr.bf16.mxu0 %v9727_v40  ;;  %v9808_v39 = vld [vmem:[%s14141_s1 + $0x2ec] ss:$72 sps:$4 sm:$0xff]   ;;  %v9803_v40 = vld [vmem:[%s14141_s1 + $0x14e0] ss:$72 sps:$4 sm:$0xff]  }
  0xe8   : > { %5789 = vmatprep.subr.bf16.mxu1 %v9730_v41  ;;  %v9806_v41 = vld [vmem:[%s14141_s1 + $0x2e8] ss:$72 sps:$4 sm:$0xff]  }
  0xea   : > { %5749 = vmatpush1.bf16.msra.mxu0 %v9725_v42 }
  0xeb   : > { %5790 = vmatpush1.bf16.msra.mxu1 %v9728_v43  ;;  %5750 = vmatprep.subr.bf16.mxu0 %v9733_v44 }
  0xec   : > { %5791 = vmatprep.subr.bf16.mxu1 %v9736_v45  ;;  %v9811_v45 = vld [vmem:[%s14141_s1 + $0x1454] ss:$72 sps:$4 sm:$0xff]  }
  0xee   : > { %5751 = vmatpush1.bf16.msra.mxu0 %v9731_v46  ;;  %v9814_v46 = vld [vmem:[%s14141_s1 + $0x25c] ss:$72 sps:$4 sm:$0xff]  }
  0xef   : > { %5792 = vmatpush1.bf16.msra.mxu1 %v9734_v48  ;;  %5752 = vmatprep.subr.bf16.mxu0 %v9739_v49  ;;  %v9809_v49 = vld [vmem:[%s14141_s1 + $0x1450] ss:$72 sps:$4 sm:$0xff]  }
  0xf0   : > { %5793 = vmatprep.subr.bf16.mxu1 %v9742_v50  ;;  %v9812_v50 = vld [vmem:[%s14141_s1 + $0x258] ss:$72 sps:$4 sm:$0xff]  }
  0xf2   : > { %5753 = vmatpush1.bf16.msra.mxu0 %v9737_v52  ;;  %v9817_v52 = vld [vmem:[%s14141_s1 + $0x13c4] ss:$72 sps:$4 sm:$0xff]  }
  0xf3   : > { %5794 = vmatpush1.bf16.msra.mxu1 %v9740_v53  ;;  %5754 = vmatprep.subr.bf16.mxu0 %v9745_v54  ;;  %v9820_v53 = vld [vmem:[%s14141_s1 + $0x1cc] ss:$72 sps:$4 sm:$0xff]   ;;  %v9815_v54 = vld [vmem:[%s14141_s1 + $0x13c0] ss:$72 sps:$4 sm:$0xff]  }
  0xf4   : > { %5795 = vmatprep.subr.bf16.mxu1 %v9748_v55  ;;  %v9818_v55 = vld [vmem:[%s14141_s1 + $0x1c8] ss:$72 sps:$4 sm:$0xff]  }
  0xf6   : > { %5755 = vmatpush2.bf16.msra.mxu0 %v9743_v56  ;;  %v9823_v56 = vld [vmem:[%s14141_s1 + $0x1334] ss:$72 sps:$4 sm:$0xff]  }
  0xf7   : > { %5796 = vmatpush2.bf16.msra.mxu1 %v9746_v57  ;;  %5756 = vmatprep.subr.bf16.mxu0 %v9751_v58  ;;  %v9826_v57 = vld [vmem:[%s14141_s1 + $0x13c] ss:$72 sps:$4 sm:$0xff]   ;;  %v9821_v58 = vld [vmem:[%s14141_s1 + $0x1330] ss:$72 sps:$4 sm:$0xff]  }
  0xf8   : > { %5797 = vmatprep.subr.bf16.mxu1 %v9754_v59  ;;  %v9824_v59 = vld [vmem:[%s14141_s1 + $0x138] ss:$72 sps:$4 sm:$0xff]  }
  0xfa   : > { %5757 = vmatpush2.bf16.msra.mxu0 %v9749_v60  ;;  %v9829_v60 = vld [vmem:[%s14141_s1 + $0x12a4] ss:$72 sps:$4 sm:$0xff]  }
  0xfb   : > { %5798 = vmatpush2.bf16.msra.mxu1 %v9752_v61  ;;  %5758 = vmatprep.subr.bf16.mxu0 %v9757_v62  ;;  %v9832_v61 = vld [vmem:[%s14141_s1 + $0xac] ss:$72 sps:$4 sm:$0xff]   ;;  %v9827_v62 = vld [vmem:[%s14141_s1 + $0x12a0] ss:$72 sps:$4 sm:$0xff]  }
  0xfc   : > { %5799 = vmatprep.subr.bf16.mxu1 %v9760_v63  ;;  %v9830_v63 = vld [vmem:[%s14141_s1 + $0xa8] ss:$72 sps:$4 sm:$0xff]  }
  0xfe   : > { %5759 = vmatpush2.bf16.msra.mxu0 %v9755_v0  ;;  %v9835_v0 = vld [vmem:[%s14141_s1 + $0x1214] ss:$72 sps:$4 sm:$0xff]  }
  0xff   : > { %5800 = vmatpush2.bf16.msra.mxu1 %v9758_v1  ;;  %5760 = vmatprep.subr.bf16.mxu0 %v9763_v2  ;;  %v9838_v1 = vld [vmem:[%s14141_s1 + $0x1c] ss:$72 sps:$4 sm:$0xff]   ;;  %v9833_v2 = vld [vmem:[%s14141_s1 + $0x1210] ss:$72 sps:$4 sm:$0xff]  }
 0x100   : > { %5801 = vmatprep.subr.bf16.mxu1 %v9766_v3  ;;  %v9836_v3 = vld [vmem:[%s14141_s1 + $0x18] ss:$72 sps:$4 sm:$0xff]  }
 0x102   : > { %5761 = vmatpush2.bf16.msra.mxu0 %v9761_v4  ;;  %v9841_v4 = vld [vmem:[%s14141_s1 + $0x1a84] ss:$72 sps:$4 sm:$0xff]  }
 0x103   : > { %5802 = vmatpush2.bf16.msra.mxu1 %v9764_v5  ;;  %5762 = vmatprep.subr.bf16.mxu0 %v9769_v8  ;;  %v9844_v5 = vld [vmem:[%s14141_s1 + $0x88c] ss:$72 sps:$4 sm:$0xff]   ;;  %v9839_v8 = vld [vmem:[%s14141_s1 + $0x1a80] ss:$72 sps:$4 sm:$0xff]  }
 0x104   : > { %5803 = vmatprep.subr.bf16.mxu1 %v9772_v9  ;;  %v9842_v9 = vld [vmem:[%s14141_s1 + $0x888] ss:$72 sps:$4 sm:$0xff]  }
 0x106   : > { %5763 = vmatpush2.bf16.msra.mxu0 %v9767_v10  ;;  %v9847_v10 = vld [vmem:[%s14141_s1 + $0x19f4] ss:$72 sps:$4 sm:$0xff]  }
 0x107   : > { %5804 = vmatpush2.bf16.msra.mxu1 %v9770_v11  ;;  %5764 = vmatprep.subr.bf16.mxu0 %v9775_v12  ;;  %v9850_v11 = vld [vmem:[%s14141_s1 + $0x7fc] ss:$72 sps:$4 sm:$0xff]   ;;  %v9845_v12 = vld [vmem:[%s14141_s1 + $0x19f0] ss:$72 sps:$4 sm:$0xff]  }
 0x108   : > { %5805 = vmatprep.subr.bf16.mxu1 %v9778_v13  ;;  %v9848_v13 = vld [vmem:[%s14141_s1 + $0x7f8] ss:$72 sps:$4 sm:$0xff]  }
 0x10a   : > { %5765 = vmatpush2.bf16.msra.mxu0 %v9773_v15  ;;  %v9853_v15 = vld [vmem:[%s14141_s1 + $0x1964] ss:$72 sps:$4 sm:$0xff]  }
 0x10b   : > { %5806 = vmatpush2.bf16.msra.mxu1 %v9776_v16  ;;  %5766 = vmatprep.subr.bf16.mxu0 %v9781_v17  ;;  %v9856_v16 = vld [vmem:[%s14141_s1 + $0x76c] ss:$72 sps:$4 sm:$0xff]   ;;  %v9851_v17 = vld [vmem:[%s14141_s1 + $0x1960] ss:$72 sps:$4 sm:$0xff]  }
 0x10c   : > { %5807 = vmatprep.subr.bf16.mxu1 %v9784_v18  ;;  %v9854_v18 = vld [vmem:[%s14141_s1 + $0x768] ss:$72 sps:$4 sm:$0xff]  }
 0x10e   : > { %5767 = vmatpush2.bf16.msra.mxu0 %v9779_v19  ;;  %v9859_v19 = vld [vmem:[%s14141_s1 + $0x18d4] ss:$72 sps:$4 sm:$0xff]  }
 0x10f   : > { %5808 = vmatpush2.bf16.msra.mxu1 %v9782_v20  ;;  %5768 = vmatprep.subr.bf16.mxu0 %v9787_v21  ;;  %v9862_v20 = vld [vmem:[%s14141_s1 + $0x6dc] ss:$72 sps:$4 sm:$0xff]   ;;  %v9857_v21 = vld [vmem:[%s14141_s1 + $0x18d0] ss:$72 sps:$4 sm:$0xff]  }
 0x110   : > { %5809 = vmatprep.subr.bf16.mxu1 %v9790_v22  ;;  %v9860_v22 = vld [vmem:[%s14141_s1 + $0x6d8] ss:$72 sps:$4 sm:$0xff]  }
 0x112   : > { %5769 = vmatpush2.bf16.msra.mxu0 %v9785_v23  ;;  %v9865_v23 = vld [vmem:[%s14141_s1 + $0x1844] ss:$72 sps:$4 sm:$0xff]  }
 0x113   : > { %5810 = vmatpush2.bf16.msra.mxu1 %v9788_v24  ;;  %5820 = vmatprep.subr.bf16.mxu0 %v9793_v25  ;;  %v9868_v24 = vld [vmem:[%s14141_s1 + $0x64c] ss:$72 sps:$4 sm:$0xff]   ;;  %v1061_v25 = vlaneseq }
 0x114   : > { %5861 = vmatprep.subr.bf16.mxu1 %v9796_v26  ;;  %v9863_v26 = vld [vmem:[%s14141_s1 + $0x1840] ss:$72 sps:$4 sm:$0xff]  }
 0x115   : > { %v11738_v31 = vpop.f32.mrf.mxu0  ;;  %5771 = vmatmul.mubr.bf16.vlgmr.msra.gmra.mxu0 %v11123_v6 }
 0x116   : > { %v11740_v32 = vpop.f32.mrf.mxu1  ;;  %5812 = vmatmul.mubr.bf16.vlgmr.msra.gmra.mxu1 %v11125_v7  ;;  %5821 = vmatpush1.bf16.msra.mxu0 %v9791_v27  ;;  %v9866_v27 = vld [vmem:[%s14141_s1 + $0x648] ss:$72 sps:$4 sm:$0xff]  }
 0x117   : > { %5862 = vmatpush1.bf16.msra.mxu1 %v9794_v28  ;;  %v11750_v36 = vpop.f32.mrf.mxu0  ;;  %5822 = vmatprep.subr.bf16.mxu0 %v9799_v29  ;;  %v9871_v28 = vld [vmem:[%s14141_s1 + $0x17b4] ss:$72 sps:$4 sm:$0xff]  }
 0x118   : > { %v11752_v37 = vpop.f32.mrf.mxu1  ;;  %5863 = vmatprep.subr.bf16.mxu1 %v9802_v30  ;;  %5852 = vmatprep.mubr.bf16.mxu0 %v11210_v34  ;;  %v9874_v29 = vld [vmem:[%s14141_s1 + $0x5bc] ss:$72 sps:$4 sm:$0xff]   ;;  %v11894_v30 = vshrl.u32 %v1061_v25, 7 }
 0x119   : > { %5893 = vmatprep.mubr.bf16.mxu1 %v11056_v47  ;;  %v5530_v43 = vpop.f32.mrf.mxu0  ;;  %v9922_v25 = vld [vmem:[%s14141_s1 + $0x133c] ss:$72 sps:$4 sm:$0xff]  }
 0x11a   : > { %v5571_v42 = vpop.f32.mrf.mxu1  ;;  %5823 = vmatpush1.bf16.msra.mxu0 %v9797_v33  ;;  %v9869_v33 = vld [vmem:[%s14141_s1 + $0x17b0] ss:$72 sps:$4 sm:$0xff]   ;;  %v9875_v43 = vld [vmem:[%s14141_s1 + $0x1720] ss:$72 sps:$4 sm:$0xff]  }
 0x11b   : > { %5864 = vmatpush1.bf16.msra.mxu1 %v9800_v35  ;;  %5824 = vmatprep.subr.bf16.mxu0 %v9805_v38  ;;  %v5531_v48 = vpop.f32.mrf.mxu0  ;;  %v9872_v35 = vld [vmem:[%s14141_s1 + $0x5b8] ss:$72 sps:$4 sm:$0xff]   ;;  %v11917_v42 = vsub.s32 1, %v11894_v30 }
 0x11c   : > { %v5572_v44 = vpop.f32.mrf.mxu1  ;;  %5865 = vmatprep.subr.bf16.mxu1 %v9808_v39  ;;  %v11905_v38 = vld [vmem:[%s14142_s2] sm:$0xff] }
 0x11d   : > { %v9877_v39 = vld [vmem:[%s14141_s1 + $0x1724] ss:$72 sps:$4 sm:$0xff]   ;;  %v9878_v44 = vld [vmem:[%s14141_s1 + $0x528] ss:$72 sps:$4 sm:$0xff]  }
 0x11e   : > { %5825 = vmatpush1.bf16.msra.mxu0 %v9803_v40  ;;  %v9880_v40 = vld [vmem:[%s14141_s1 + $0x52c] ss:$72 sps:$4 sm:$0xff]  }
 0x11f   : > { %5866 = vmatpush1.bf16.msra.mxu1 %v9806_v41  ;;  %5826 = vmatprep.subr.bf16.mxu0 %v9811_v45  ;;  %v11914_v41 = vsub.s32 0, %v11894_v30  ;;  %v9883_v45 = vld [vmem:[%s14141_s1 + $0x1694] ss:$72 sps:$4 sm:$0xff]  }
 0x120   : > { %5867 = vmatprep.subr.bf16.mxu1 %v9814_v46  ;;  %v9886_v46 = vld [vmem:[%s14141_s1 + $0x49c] ss:$72 sps:$4 sm:$0xff]  }
 0x121   : > { %v1064_v48 = vrot.slane %v11905_v38, %v11914_v41 }
 0x122   : > { %5827 = vmatpush1.bf16.msra.mxu0 %v9809_v49  ;;  %v1068_v49 = vrot.slane %v11905_v38, %v11917_v42 }
 0x123   : > { %5868 = vmatpush1.bf16.msra.mxu1 %v9812_v50  ;;  %5828 = vmatprep.subr.bf16.mxu0 %v9817_v52  ;;  %v9881_v50 = vld [vmem:[%s14141_s1 + $0x1690] ss:$72 sps:$4 sm:$0xff]  }
 0x124   : > { %5869 = vmatprep.subr.bf16.mxu1 %v9820_v53  ;;  %v9884_v52 = vld [vmem:[%s14141_s1 + $0x498] ss:$72 sps:$4 sm:$0xff]   ;;  %v9889_v53 = vld [vmem:[%s14141_s1 + $0xd0c] ss:$72 sps:$4 sm:$0xff]  }
 0x126   : > { %5829 = vmatpush1.bf16.msra.mxu0 %v9815_v54  ;;  %v9892_v54 = vld [vmem:[%s14141_s1 + $0x160c] ss:$72 sps:$4 sm:$0xff]  }
 0x127   : > { %5870 = vmatpush1.bf16.msra.mxu1 %v9818_v55  ;;  %5830 = vmatprep.subr.bf16.mxu0 %v9823_v56  ;;  %v5527_v55 = vadd.f32 %v11738_v31, %v1064_v48  ;;  %v9887_v56 = vld [vmem:[%s14141_s1 + $0xd08] ss:$72 sps:$4 sm:$0xff]   ;;  %v9898_v31 = vld [vmem:[%s14141_s1 + $0x157c] ss:$72 sps:$4 sm:$0xff]  }
 0x128   : > { %5871 = vmatprep.subr.bf16.mxu1 %v9826_v57  ;;  %v9890_v57 = vld [vmem:[%s14141_s1 + $0x1608] ss:$72 sps:$4 sm:$0xff]  }
 0x129   : > { %v9935_v48 = vld [vmem:[%s14141_s1 + $0x1188] ss:$72 sps:$4 sm:$0xff]  }
 0x12a   : > { %5831 = vmatpush1.bf16.msra.mxu0 %v9821_v58  ;;  %v5529_v58 = vadd.f32 %v11750_v36, %v1068_v49  ;;  %v9896_v36 = vld [vmem:[%s14141_s1 + $0x1578] ss:$72 sps:$4 sm:$0xff]   ;;  %v9938_v49 = vld [vmem:[%s14141_s1 + $0x1a88] ss:$72 sps:$4 sm:$0xff]  }
 0x12b   : > { %5872 = vmatpush1.bf16.msra.mxu1 %v9824_v59  ;;  %5832 = vmatprep.subr.bf16.mxu0 %v9829_v60  ;;  %v9895_v59 = vld [vmem:[%s14141_s1 + $0xc7c] ss:$72 sps:$4 sm:$0xff]   ;;  %v5568_v60 = vadd.f32 %v11740_v32, %v5527_v55  ;;  %v9949_v55 = vld [vmem:[%s14141_s1 + $0x106c] ss:$72 sps:$4 sm:$0xff]  }
 0x12c   : > { %5873 = vmatprep.subr.bf16.mxu1 %v9832_v61  ;;  %v9893_v61 = vld [vmem:[%s14141_s1 + $0xc78] ss:$72 sps:$4 sm:$0xff]  }
 0x12e   : > { %5833 = vmatpush1.bf16.msra.mxu0 %v9827_v62 }
 0x12f   : > { %5874 = vmatpush1.bf16.msra.mxu1 %v9830_v63  ;;  %5834 = vmatprep.subr.bf16.mxu0 %v9835_v0  ;;  %v5570_v0 = vadd.f32 %v11752_v37, %v5529_v58  ;;  %v9950_v58 = vld [vmem:[%s14141_s1 + $0x1968] ss:$72 sps:$4 sm:$0xff]  }
 0x130   : > { %5875 = vmatprep.subr.bf16.mxu1 %v9838_v1 }
 0x132   : > { %5835 = vmatpush1.bf16.msra.mxu0 %v9833_v2 }
 0x133   : > { %5876 = vmatpush1.bf16.msra.mxu1 %v9836_v3  ;;  %5836 = vmatprep.subr.bf16.mxu0 %v9841_v4  ;;  %v9901_v3 = vld [vmem:[%s14141_s1 + $0xbec] ss:$72 sps:$4 sm:$0xff]  }
 0x134   : > { %5877 = vmatprep.subr.bf16.mxu1 %v9844_v5  ;;  %v9904_v4 = vld [vmem:[%s14141_s1 + $0x14ec] ss:$72 sps:$4 sm:$0xff]  }
 0x136   : > { %5837 = vmatpush2.bf16.msra.mxu0 %v9839_v8  ;;  %v9899_v8 = vld [vmem:[%s14141_s1 + $0xbe8] ss:$72 sps:$4 sm:$0xff]  }
 0x137   : > { %5878 = vmatpush2.bf16.msra.mxu1 %v9842_v9  ;;  %5838 = vmatprep.subr.bf16.mxu0 %v9847_v10  ;;  %v9902_v9 = vld [vmem:[%s14141_s1 + $0x14e8] ss:$72 sps:$4 sm:$0xff]  }
 0x138   : > { %5879 = vmatprep.subr.bf16.mxu1 %v9850_v11 }
 0x13a   : > { %5839 = vmatpush2.bf16.msra.mxu0 %v9845_v12 }
 0x13b   : > { %5880 = vmatpush2.bf16.msra.mxu1 %v9848_v13  ;;  %5840 = vmatprep.subr.bf16.mxu0 %v9853_v15  ;;  %v9907_v15 = vld [vmem:[%s14141_s1 + $0xb5c] ss:$72 sps:$4 sm:$0xff]  }
 0x13c   : > { %5881 = vmatprep.subr.bf16.mxu1 %v9856_v16  ;;  %v9910_v16 = vld [vmem:[%s14141_s1 + $0x145c] ss:$72 sps:$4 sm:$0xff]  }
 0x13e   : > { %5841 = vmatpush2.bf16.msra.mxu0 %v9851_v17 }
 0x13f   : > { %5882 = vmatpush2.bf16.msra.mxu1 %v9854_v18  ;;  %5842 = vmatprep.subr.bf16.mxu0 %v9859_v19  ;;  %v9905_v18 = vld [vmem:[%s14141_s1 + $0xb58] ss:$72 sps:$4 sm:$0xff]  }
 0x140   : > { %5883 = vmatprep.subr.bf16.mxu1 %v9862_v20  ;;  %v9908_v19 = vld [vmem:[%s14141_s1 + $0x1458] ss:$72 sps:$4 sm:$0xff]   ;;  %v9913_v20 = vld [vmem:[%s14141_s1 + $0xacc] ss:$72 sps:$4 sm:$0xff]  }
 0x142   : > { %5843 = vmatpush2.bf16.msra.mxu0 %v9857_v21  ;;  %v9916_v21 = vld [vmem:[%s14141_s1 + $0x13cc] ss:$72 sps:$4 sm:$0xff]  }
 0x143   : > { %5884 = vmatpush2.bf16.msra.mxu1 %v9860_v22  ;;  %5844 = vmatprep.subr.bf16.mxu0 %v9865_v23  ;;  %v9911_v22 = vld [vmem:[%s14141_s1 + $0xac8] ss:$72 sps:$4 sm:$0xff]  }
 0x144   : > { %5885 = vmatprep.subr.bf16.mxu1 %v9868_v24  ;;  %v9914_v23 = vld [vmem:[%s14141_s1 + $0x13c8] ss:$72 sps:$4 sm:$0xff]   ;;  %v9919_v24 = vld [vmem:[%s14141_s1 + $0xa3c] ss:$72 sps:$4 sm:$0xff]  }
 0x146   : > { %5845 = vmatpush2.bf16.msra.mxu0 %v9863_v26  ;;  %v9917_v26 = vld [vmem:[%s14141_s1 + $0xa38] ss:$72 sps:$4 sm:$0xff]  }
 0x147   : > { %5886 = vmatpush2.bf16.msra.mxu1 %v9866_v27  ;;  %5846 = vmatprep.subr.bf16.mxu0 %v9871_v28  ;;  %v9920_v27 = vld [vmem:[%s14141_s1 + $0x1338] ss:$72 sps:$4 sm:$0xff]   ;;  %v9925_v28 = vld [vmem:[%s14141_s1 + $0x9ac] ss:$72 sps:$4 sm:$0xff]  }
 0x148   : > { %5887 = vmatprep.subr.bf16.mxu1 %v9874_v29  ;;  %v9928_v29 = vld [vmem:[%s14141_s1 + $0x12ac] ss:$72 sps:$4 sm:$0xff]  }
 0x14a   : > { %5847 = vmatpush2.bf16.msra.mxu0 %v9869_v33  ;;  %v9923_v33 = vld [vmem:[%s14141_s1 + $0x9a8] ss:$72 sps:$4 sm:$0xff]  }
 0x14b   : > { %5888 = vmatpush2.bf16.msra.mxu1 %v9872_v35  ;;  %5848 = vmatprep.subr.bf16.mxu0 %v9877_v39  ;;  %v9926_v35 = vld [vmem:[%s14141_s1 + $0x12a8] ss:$72 sps:$4 sm:$0xff]   ;;  %v9931_v39 = vld [vmem:[%s14141_s1 + $0x91c] ss:$72 sps:$4 sm:$0xff]  }
 0x14c   : > { %5889 = vmatprep.subr.bf16.mxu1 %v9880_v40  ;;  %v9934_v40 = vld [vmem:[%s14141_s1 + $0x121c] ss:$72 sps:$4 sm:$0xff]  }
 0x14e   : > { %5849 = vmatpush2.bf16.msra.mxu0 %v9875_v43  ;;  %v9929_v43 = vld [vmem:[%s14141_s1 + $0x918] ss:$72 sps:$4 sm:$0xff]  }
 0x14f   : > { %5890 = vmatpush2.bf16.msra.mxu1 %v9878_v44  ;;  %5850 = vmatprep.subr.bf16.mxu0 %v9883_v45  ;;  %v9932_v44 = vld [vmem:[%s14141_s1 + $0x1218] ss:$72 sps:$4 sm:$0xff]   ;;  %v9937_v45 = vld [vmem:[%s14141_s1 + $0x118c] ss:$72 sps:$4 sm:$0xff]  }
 0x150   : > { %5891 = vmatprep.subr.bf16.mxu1 %v9886_v46  ;;  %v9940_v46 = vld [vmem:[%s14141_s1 + $0x1a8c] ss:$72 sps:$4 sm:$0xff]  }
 0x152   : > { %5851 = vmatpush2.bf16.msra.mxu0 %v9881_v50  ;;  %v9943_v50 = vld [vmem:[%s14141_s1 + $0x10fc] ss:$72 sps:$4 sm:$0xff]  }
 0x153   : > { %5892 = vmatpush2.bf16.msra.mxu1 %v9884_v52  ;;  %5902 = vmatprep.subr.bf16.mxu0 %v9889_v53  ;;  %v9946_v52 = vld [vmem:[%s14141_s1 + $0x19fc] ss:$72 sps:$4 sm:$0xff]   ;;  %v9941_v53 = vld [vmem:[%s14141_s1 + $0x10f8] ss:$72 sps:$4 sm:$0xff]  }
 0x154   : > { %5943 = vmatprep.subr.bf16.mxu1 %v9892_v54  ;;  %v9944_v54 = vld [vmem:[%s14141_s1 + $0x19f8] ss:$72 sps:$4 sm:$0xff]  }
 0x155   : > { %v5608_v62 = vpop.f32.mrf.mxu0  ;;  %5853 = vmatmul.mubr.bf16.vlgmr.msra.gmra.mxu0 %v11332_v14 }
 0x156   : > { %v11968_v63 = vpop.f32.mrf.mxu1  ;;  %5894 = vmatmul.mubr.bf16.vlgmr.msra.gmra.mxu1 %v11123_v6  ;;  %v5609_v1 = vadd.f32 %v5608_v62, %v5568_v60  ;;  %5903 = vmatpush1.bf16.msra.mxu0 %v9887_v56  ;;  %v9952_v56 = vld [vmem:[%s14141_s1 + $0x196c] ss:$72 sps:$4 sm:$0xff]   ;;  %v9953_v60 = vld [vmem:[%s14141_s1 + $0xfd8] ss:$72 sps:$4 sm:$0xff]  }
 0x157   : > { %5944 = vmatpush1.bf16.msra.mxu1 %v9890_v57  ;;  %v5610_v32 = vpop.f32.mrf.mxu0  ;;  %5904 = vmatprep.subr.bf16.mxu0 %v9895_v59  ;;  %v9947_v57 = vld [vmem:[%s14141_s1 + $0x1068] ss:$72 sps:$4 sm:$0xff]   ;;  %v9955_v59 = vld [vmem:[%s14141_s1 + $0xfdc] ss:$72 sps:$4 sm:$0xff]   ;;  %v9964_v62 = vld [vmem:[%s14141_s1 + $0x184c] ss:$72 sps:$4 sm:$0xff]  }
 0x158   : > { %v11973_v2 = vpop.f32.mrf.mxu1  ;;  %5945 = vmatprep.subr.bf16.mxu1 %v9898_v31  ;;  %v11981_v5 = vpack.c.bf16 %v5609_v1, %v5609_v1  ;;  %v5611_v37 = vadd.f32 %v5610_v32, %v5570_v0  ;;  %5934 = vmatprep.mubr.bf16.mxu0 %v11065_v51  ;;  %v9958_v31 = vld [vmem:[%s14141_s1 + $0x18dc] ss:$72 sps:$4 sm:$0xff]   ;;  %v9959_v0 = vld [vmem:[%s14141_s1 + $0xf48] ss:$72 sps:$4 sm:$0xff]  }
 0x159   : > { %5975 = vmatprep.mubr.bf16.mxu1 %v11210_v34  ;;  %v5612_v11 = vpop.f32.mrf.mxu0  ;;  %v9962_v1 = vld [vmem:[%s14141_s1 + $0x1848] ss:$72 sps:$4 sm:$0xff]   ;;  %v9967_v32 = vld [vmem:[%s14141_s1 + $0xebc] ss:$72 sps:$4 sm:$0xff]  }
 0x15a   : > { %v5653_v10 = vpop.f32.mrf.mxu1  ;;  %6618 = vst.msk [vmem:[#allocation2] sm:$0xf] %vm6617_vm0, %v11981_v5  ;;  %v11993_v12 = vpack.c.bf16 %v5611_v37, %v5611_v37  ;;  %5905 = vmatpush1.bf16.msra.mxu0 %v9893_v61  ;;  %v9956_v61 = vld [vmem:[%s14141_s1 + $0x18d8] ss:$72 sps:$4 sm:$0xff]   ;;  %v9974_v11 = vld [vmem:[%s14141_s1 + $0x1728] ss:$72 sps:$4 sm:$0xff]  }
 0x15b   : > { %5946 = vmatpush1.bf16.msra.mxu1 %v9896_v36  ;;  %5906 = vmatprep.subr.bf16.mxu0 %v9901_v3  ;;  %v5613_v17 = vpop.f32.mrf.mxu0  ;;  %v9961_v36 = vld [vmem:[%s14141_s1 + $0xf4c] ss:$72 sps:$4 sm:$0xff]   ;;  %v9970_v3 = vld [vmem:[%s14141_s1 + $0x17bc] ss:$72 sps:$4 sm:$0xff]   ;;  %v9968_v37 = vld [vmem:[%s14141_s1 + $0x17b8] ss:$72 sps:$4 sm:$0xff]  }
 0x15c   : > { %v5654_v13 = vpop.f32.mrf.mxu1  ;;  %5947 = vmatprep.subr.bf16.mxu1 %v9904_v4  ;;  %6628 = vst.msk [vmem:[#allocation2 + $0x8] sm:$0xf] %vm6617_vm0, %v11993_v12  ;;  %v9965_v4 = vld [vmem:[%s14141_s1 + $0xeb8] ss:$72 sps:$4 sm:$0xff]   ;;  %v9971_v10 = vld [vmem:[%s14141_s1 + $0xe28] ss:$72 sps:$4 sm:$0xff]  }
 0x15d   : > { %v9979_v13 = vld [vmem:[%s14141_s1 + $0xd9c] ss:$72 sps:$4 sm:$0xff]   ;;  %v1075_v17 = vsub.s32 3, %v11894_v30 }
 0x15e   : > { %5907 = vmatpush1.bf16.msra.mxu0 %v9899_v8  ;;  %v9973_v8 = vld [vmem:[%s14141_s1 + $0xe2c] ss:$72 sps:$4 sm:$0xff]  }
 0x15f   : > { %5948 = vmatpush1.bf16.msra.mxu1 %v9902_v9  ;;  %5908 = vmatprep.subr.bf16.mxu0 %v9907_v15  ;;  %v9976_v9 = vld [vmem:[%s14141_s1 + $0x172c] ss:$72 sps:$4 sm:$0xff]   ;;  %v9982_v15 = vld [vmem:[%s14141_s1 + $0x169c] ss:$72 sps:$4 sm:$0xff]  }
 0x160   : > { %5949 = vmatprep.subr.bf16.mxu1 %v9910_v16  ;;  %v1071_v16 = vsub.s32 2, %v11894_v30 }
 0x162   : > { %5909 = vmatpush1.bf16.msra.mxu0 %v9905_v18  ;;  %v9977_v18 = vld [vmem:[%s14141_s1 + $0xd98] ss:$72 sps:$4 sm:$0xff]  }
 0x163   : > { %5950 = vmatpush1.bf16.msra.mxu1 %v9908_v19  ;;  %5910 = vmatprep.subr.bf16.mxu0 %v9913_v20  ;;  %v9980_v19 = vld [vmem:[%s14141_s1 + $0x1698] ss:$72 sps:$4 sm:$0xff]   ;;  %v9985_v20 = vld [vmem:[%s14141_s1 + $0x414] ss:$72 sps:$4 sm:$0xff]  }
 0x164   : > { %5951 = vmatprep.subr.bf16.mxu1 %v9916_v21  ;;  %v9988_v21 = vld [vmem:[%s14141_s1 + $0xd14] ss:$72 sps:$4 sm:$0xff]  }
 0x166   : > { %5911 = vmatpush1.bf16.msra.mxu0 %v9911_v22  ;;  %v1072_v22 = vrot.slane %v11905_v38, %v1071_v16 }
 0x167   : > { %5952 = vmatpush1.bf16.msra.mxu1 %v9914_v23  ;;  %5912 = vmatprep.subr.bf16.mxu0 %v9919_v24  ;;  %v9983_v23 = vld [vmem:[%s14141_s1 + $0x410] ss:$72 sps:$4 sm:$0xff]  }
 0x168   : > { %5953 = vmatprep.subr.bf16.mxu1 %v9922_v25  ;;  %v9986_v24 = vld [vmem:[%s14141_s1 + $0xd10] ss:$72 sps:$4 sm:$0xff]   ;;  %v1076_v25 = vrot.slane %v11905_v38, %v1075_v17  ;;  %v9992_v38 = vld [vmem:[%s14141_s1 + $0xc80] ss:$72 sps:$4 sm:$0xff]  }
 0x16a   : > { %5913 = vmatpush1.bf16.msra.mxu0 %v9917_v26  ;;  %v9991_v26 = vld [vmem:[%s14141_s1 + $0x384] ss:$72 sps:$4 sm:$0xff]  }
 0x16b   : > { %5954 = vmatpush1.bf16.msra.mxu1 %v9920_v27  ;;  %5914 = vmatprep.subr.bf16.mxu0 %v9925_v28  ;;  %v9994_v27 = vld [vmem:[%s14141_s1 + $0xc84] ss:$72 sps:$4 sm:$0xff]   ;;  %v5650_v28 = vadd.f32 %v11968_v63, %v1072_v22  ;;  %v10034_v22 = vld [vmem:[%s14141_s1 + $0x1190] ss:$72 sps:$4 sm:$0xff]  }
 0x16c   : > { %5955 = vmatprep.subr.bf16.mxu1 %v9928_v29  ;;  %v9989_v29 = vld [vmem:[%s14141_s1 + $0x380] ss:$72 sps:$4 sm:$0xff]  }
 0x16e   : > { %5915 = vmatpush1.bf16.msra.mxu0 %v9923_v33 }
 0x16f   : > { %5956 = vmatpush1.bf16.msra.mxu1 %v9926_v35  ;;  %5916 = vmatprep.subr.bf16.mxu0 %v9931_v39  ;;  %v5652_v39 = vadd.f32 %v11973_v2, %v1076_v25  ;;  %v9995_v2 = vld [vmem:[%s14141_s1 + $0x2f0] ss:$72 sps:$4 sm:$0xff]   ;;  %v10037_v25 = vld [vmem:[%s14141_s1 + $0x800] ss:$72 sps:$4 sm:$0xff]  }
 0x170   : > { %5957 = vmatprep.subr.bf16.mxu1 %v9934_v40 }
 0x172   : > { %5917 = vmatpush1.bf16.msra.mxu0 %v9929_v43 }
 0x173   : > { %5958 = vmatpush1.bf16.msra.mxu1 %v9932_v44  ;;  %5918 = vmatprep.subr.bf16.mxu0 %v9937_v45  ;;  %v9997_v44 = vld [vmem:[%s14141_s1 + $0x2f4] ss:$72 sps:$4 sm:$0xff]  }
 0x174   : > { %5959 = vmatprep.subr.bf16.mxu1 %v9940_v46  ;;  %v10000_v45 = vld [vmem:[%s14141_s1 + $0xbf4] ss:$72 sps:$4 sm:$0xff]  }
 0x176   : > { %5919 = vmatpush2.bf16.msra.mxu0 %v9935_v48 }
 0x177   : > { %5960 = vmatpush2.bf16.msra.mxu1 %v9938_v49  ;;  %5920 = vmatprep.subr.bf16.mxu0 %v9943_v50  ;;  %v9998_v49 = vld [vmem:[%s14141_s1 + $0xbf0] ss:$72 sps:$4 sm:$0xff]  }
 0x178   : > { %5961 = vmatprep.subr.bf16.mxu1 %v9946_v52 }
 0x17a   : > { %5921 = vmatpush2.bf16.msra.mxu0 %v9941_v53 }
 0x17b   : > { %5962 = vmatpush2.bf16.msra.mxu1 %v9944_v54  ;;  %5922 = vmatprep.subr.bf16.mxu0 %v9949_v55 }
 0x17c   : > { %5963 = vmatprep.subr.bf16.mxu1 %v9952_v56  ;;  %v10003_v56 = vld [vmem:[%s14141_s1 + $0x264] ss:$72 sps:$4 sm:$0xff]  }
 0x17e   : > { %5923 = vmatpush2.bf16.msra.mxu0 %v9947_v57  ;;  %v10006_v57 = vld [vmem:[%s14141_s1 + $0xb64] ss:$72 sps:$4 sm:$0xff]  }
 0x17f   : > { %5964 = vmatpush2.bf16.msra.mxu1 %v9950_v58  ;;  %5924 = vmatprep.subr.bf16.mxu0 %v9955_v59 }
 0x180   : > { %5965 = vmatprep.subr.bf16.mxu1 %v9958_v31  ;;  %v10001_v31 = vld [vmem:[%s14141_s1 + $0x260] ss:$72 sps:$4 sm:$0xff]  }
 0x182   : > { %5925 = vmatpush2.bf16.msra.mxu0 %v9953_v60  ;;  %v10004_v60 = vld [vmem:[%s14141_s1 + $0xb60] ss:$72 sps:$4 sm:$0xff]  }
 0x183   : > { %5966 = vmatpush2.bf16.msra.mxu1 %v9956_v61  ;;  %5926 = vmatprep.subr.bf16.mxu0 %v9961_v36  ;;  %v10009_v61 = vld [vmem:[%s14141_s1 + $0x1d4] ss:$72 sps:$4 sm:$0xff]  }
 0x184   : > { %5967 = vmatprep.subr.bf16.mxu1 %v9964_v62  ;;  %v10012_v36 = vld [vmem:[%s14141_s1 + $0xad4] ss:$72 sps:$4 sm:$0xff]   ;;  %v10007_v62 = vld [vmem:[%s14141_s1 + $0x1d0] ss:$72 sps:$4 sm:$0xff]  }
 0x186   : > { %5927 = vmatpush2.bf16.msra.mxu0 %v9959_v0  ;;  %v10010_v0 = vld [vmem:[%s14141_s1 + $0xad0] ss:$72 sps:$4 sm:$0xff]  }
 0x187   : > { %5968 = vmatpush2.bf16.msra.mxu1 %v9962_v1  ;;  %5928 = vmatprep.subr.bf16.mxu0 %v9967_v32  ;;  %v10015_v1 = vld [vmem:[%s14141_s1 + $0x144] ss:$72 sps:$4 sm:$0xff]  }
 0x188   : > { %5969 = vmatprep.subr.bf16.mxu1 %v9970_v3  ;;  %v10018_v32 = vld [vmem:[%s14141_s1 + $0xa44] ss:$72 sps:$4 sm:$0xff]   ;;  %v10013_v3 = vld [vmem:[%s14141_s1 + $0x140] ss:$72 sps:$4 sm:$0xff]  }
 0x18a   : > { %5929 = vmatpush2.bf16.msra.mxu0 %v9965_v4  ;;  %v10016_v4 = vld [vmem:[%s14141_s1 + $0xa40] ss:$72 sps:$4 sm:$0xff]  }
 0x18b   : > { %5970 = vmatpush2.bf16.msra.mxu1 %v9968_v37  ;;  %5930 = vmatprep.subr.bf16.mxu0 %v9973_v8  ;;  %v10021_v37 = vld [vmem:[%s14141_s1 + $0xb4] ss:$72 sps:$4 sm:$0xff]  }
 0x18c   : > { %5971 = vmatprep.subr.bf16.mxu1 %v9976_v9  ;;  %v10024_v8 = vld [vmem:[%s14141_s1 + $0x9b4] ss:$72 sps:$4 sm:$0xff]   ;;  %v10019_v9 = vld [vmem:[%s14141_s1 + $0xb0] ss:$72 sps:$4 sm:$0xff]  }
 0x18e   : > { %5931 = vmatpush2.bf16.msra.mxu0 %v9971_v10  ;;  %v10022_v10 = vld [vmem:[%s14141_s1 + $0x9b0] ss:$72 sps:$4 sm:$0xff]  }
 0x18f   : > { %5972 = vmatpush2.bf16.msra.mxu1 %v9974_v11  ;;  %5932 = vmatprep.subr.bf16.mxu0 %v9979_v13  ;;  %v10027_v11 = vld [vmem:[%s14141_s1 + $0x24] ss:$72 sps:$4 sm:$0xff]  }
 0x190   : > { %5973 = vmatprep.subr.bf16.mxu1 %v9982_v15  ;;  %v10030_v13 = vld [vmem:[%s14141_s1 + $0x924] ss:$72 sps:$4 sm:$0xff]   ;;  %v10025_v15 = vld [vmem:[%s14141_s1 + $0x20] ss:$72 sps:$4 sm:$0xff]  }
 0x192   : > { %5933 = vmatpush2.bf16.msra.mxu0 %v9977_v18  ;;  %v10028_v18 = vld [vmem:[%s14141_s1 + $0x920] ss:$72 sps:$4 sm:$0xff]  }
 0x193   : > { %5974 = vmatpush2.bf16.msra.mxu1 %v9980_v19  ;;  %5984 = vmatprep.subr.bf16.mxu0 %v9985_v20  ;;  %v10033_v19 = vld [vmem:[%s14141_s1 + $0x894] ss:$72 sps:$4 sm:$0xff]  }
 0x194   : > { %6025 = vmatprep.subr.bf16.mxu1 %v9988_v21  ;;  %v10036_v20 = vld [vmem:[%s14141_s1 + $0x1194] ss:$72 sps:$4 sm:$0xff]   ;;  %v10031_v21 = vld [vmem:[%s14141_s1 + $0x890] ss:$72 sps:$4 sm:$0xff]  }
 0x195   : > { %v5690_v33 = vpop.f32.mrf.mxu0  ;;  %5935 = vmatmul.mubr.bf16.vlgmr.msra.gmra.mxu0 %v11125_v7 }
 0x196   : > { %v5731_v35 = vpop.f32.mrf.mxu1  ;;  %5976 = vmatmul.mubr.bf16.vlgmr.msra.gmra.mxu1 %v11332_v14  ;;  %v5691_v40 = vadd.f32 %v5690_v33, %v5650_v28  ;;  %5985 = vmatpush1.bf16.msra.mxu0 %v9983_v23  ;;  %v10039_v23 = vld [vmem:[%s14141_s1 + $0x804] ss:$72 sps:$4 sm:$0xff]   ;;  %v10048_v28 = vld [vmem:[%s14141_s1 + $0x1074] ss:$72 sps:$4 sm:$0xff]  }
 0x197   : > { %6026 = vmatpush1.bf16.msra.mxu1 %v9986_v24  ;;  %v5692_v63 = vpop.f32.mrf.mxu0  ;;  %5986 = vmatprep.subr.bf16.mxu0 %v9991_v26  ;;  %v10042_v24 = vld [vmem:[%s14141_s1 + $0x1104] ss:$72 sps:$4 sm:$0xff]   ;;  %v10040_v26 = vld [vmem:[%s14141_s1 + $0x1100] ss:$72 sps:$4 sm:$0xff]  }
 0x198   : > { %v5733_v43 = vpop.f32.mrf.mxu1  ;;  %6027 = vmatprep.subr.bf16.mxu1 %v9994_v27  ;;  %v5732_v46 = vadd.f32 %v5731_v35, %v5691_v40  ;;  %v5693_v48 = vadd.f32 %v5692_v63, %v5652_v39  ;;  %6016 = vmatprep.mubr.bf16.mxu0 %v11056_v47  ;;  %v10045_v27 = vld [vmem:[%s14141_s1 + $0x774] ss:$72 sps:$4 sm:$0xff]   ;;  %v10051_v33 = vld [vmem:[%s14141_s1 + $0x6e4] ss:$72 sps:$4 sm:$0xff]   ;;  %v10049_v39 = vld [vmem:[%s14141_s1 + $0x6e0] ss:$72 sps:$4 sm:$0xff]  }
 0x199   : > { %6057 = vmatprep.mubr.bf16.mxu1 %v11065_v51  ;;  %v5694_v52 = vpop.f32.mrf.mxu0  ;;  %v10054_v35 = vld [vmem:[%s14141_s1 + $0xfe4] ss:$72 sps:$4 sm:$0xff]   ;;  %v10052_v40 = vld [vmem:[%s14141_s1 + $0xfe0] ss:$72 sps:$4 sm:$0xff]   ;;  %v10057_v63 = vld [vmem:[%s14141_s1 + $0x654] ss:$72 sps:$4 sm:$0xff]  }
 0x19a   : > { %v5735_v50 = vpop.f32.mrf.mxu1  ;;  %v12203_v53 = vpack.c.bf16 %v5732_v46, %v5732_v46  ;;  %v5734_v54 = vadd.f32 %v5733_v43, %v5693_v48  ;;  %5987 = vmatpush1.bf16.msra.mxu0 %v9989_v29  ;;  %v10043_v29 = vld [vmem:[%s14141_s1 + $0x770] ss:$72 sps:$4 sm:$0xff]   ;;  %v10060_v43 = vld [vmem:[%s14141_s1 + $0xf54] ss:$72 sps:$4 sm:$0xff]   ;;  %v10063_v46 = vld [vmem:[%s14141_s1 + $0x5c4] ss:$72 sps:$4 sm:$0xff]  }
 0x19b   : > { %6028 = vmatpush1.bf16.msra.mxu1 %v9992_v38  ;;  %5988 = vmatprep.subr.bf16.mxu0 %v9997_v44  ;;  %v5695_v58 = vpop.f32.mrf.mxu0  ;;  %v10046_v38 = vld [vmem:[%s14141_s1 + $0x1070] ss:$72 sps:$4 sm:$0xff]   ;;  %v10066_v48 = vld [vmem:[%s14141_s1 + $0xec4] ss:$72 sps:$4 sm:$0xff]   ;;  %v10069_v50 = vld [vmem:[%s14141_s1 + $0x534] ss:$72 sps:$4 sm:$0xff]  }
 0x19c   : > { %v5736_v55 = vpop.f32.mrf.mxu1  ;;  %6029 = vmatprep.subr.bf16.mxu1 %v10000_v45  ;;  %6638 = vst.msk [vmem:[#allocation2 + $0x10] sm:$0xf] %vm6617_vm0, %v12203_v53  ;;  %v12213_v59 = vpack.c.bf16 %v5734_v54, %v5734_v54  ;;  %v10055_v44 = vld [vmem:[%s14141_s1 + $0x650] ss:$72 sps:$4 sm:$0xff]   ;;  %v10072_v52 = vld [vmem:[%s14141_s1 + $0xe34] ss:$72 sps:$4 sm:$0xff]  }
 0x19d   : > { %v10058_v45 = vld [vmem:[%s14141_s1 + $0xf50] ss:$72 sps:$4 sm:$0xff]   ;;  %v10073_v58 = vld [vmem:[%s14141_s1 + $0x4a0] ss:$72 sps:$4 sm:$0xff]  }
 0x19e   : > { %6648 = vst.msk [vmem:[#allocation2 + $0x18] sm:$0xf] %vm6617_vm0, %v12213_v59  ;;  %5989 = vmatpush1.bf16.msra.mxu0 %v9995_v2  ;;  %v10061_v2 = vld [vmem:[%s14141_s1 + $0x5c0] ss:$72 sps:$4 sm:$0xff]   ;;  %v10067_v54 = vld [vmem:[%s14141_s1 + $0x530] ss:$72 sps:$4 sm:$0xff]  }
 0x19f   : > { %6030 = vmatpush1.bf16.msra.mxu1 %v9998_v49  ;;  %5990 = vmatprep.subr.bf16.mxu0 %v10003_v56  ;;  %v10064_v49 = vld [vmem:[%s14141_s1 + $0xec0] ss:$72 sps:$4 sm:$0xff]   ;;  %v10070_v55 = vld [vmem:[%s14141_s1 + $0xe30] ss:$72 sps:$4 sm:$0xff]   ;;  %v10075_v56 = vld [vmem:[%s14141_s1 + $0x4a4] ss:$72 sps:$4 sm:$0xff]  }
 0x1a0   : > { %6031 = vmatprep.subr.bf16.mxu1 %v10006_v57  ;;  %v10078_v57 = vld [vmem:[%s14141_s1 + $0xda4] ss:$72 sps:$4 sm:$0xff]  }
 0x1a2   : > { %5991 = vmatpush1.bf16.msra.mxu0 %v10001_v31  ;;  %v10076_v31 = vld [vmem:[%s14141_s1 + $0xda0] ss:$72 sps:$4 sm:$0xff]  }
 0x1a3   : > { %6032 = vmatpush1.bf16.msra.mxu1 %v10004_v60  ;;  %5992 = vmatprep.subr.bf16.mxu0 %v10009_v61  ;;  %v10081_v60 = vld [vmem:[%s14141_s1 + $0x1614] ss:$72 sps:$4 sm:$0xff]  }
 0x1a4   : > { %6033 = vmatprep.subr.bf16.mxu1 %v10012_v36  ;;  %v10084_v61 = vld [vmem:[%s14141_s1 + $0x41c] ss:$72 sps:$4 sm:$0xff]   ;;  %v10079_v36 = vld [vmem:[%s14141_s1 + $0x1610] ss:$72 sps:$4 sm:$0xff]  }
 0x1a6   : > { %5993 = vmatpush1.bf16.msra.mxu0 %v10007_v62  ;;  %v10082_v62 = vld [vmem:[%s14141_s1 + $0x418] ss:$72 sps:$4 sm:$0xff]  }
 0x1a7   : > { %6034 = vmatpush1.bf16.msra.mxu1 %v10010_v0  ;;  %5994 = vmatprep.subr.bf16.mxu0 %v10015_v1  ;;  %v10087_v0 = vld [vmem:[%s14141_s1 + $0x1584] ss:$72 sps:$4 sm:$0xff]  }
 0x1a8   : > { %6035 = vmatprep.subr.bf16.mxu1 %v10018_v32  ;;  %v10090_v1 = vld [vmem:[%s14141_s1 + $0x38c] ss:$72 sps:$4 sm:$0xff]   ;;  %v10085_v32 = vld [vmem:[%s14141_s1 + $0x1580] ss:$72 sps:$4 sm:$0xff]  }
 0x1aa   : > { %5995 = vmatpush1.bf16.msra.mxu0 %v10013_v3  ;;  %v10088_v3 = vld [vmem:[%s14141_s1 + $0x388] ss:$72 sps:$4 sm:$0xff]  }
 0x1ab   : > { %6036 = vmatpush1.bf16.msra.mxu1 %v10016_v4  ;;  %5996 = vmatprep.subr.bf16.mxu0 %v10021_v37 }
 0x1ac   : > { %6037 = vmatprep.subr.bf16.mxu1 %v10024_v8 }
 0x1ae   : > { %5997 = vmatpush1.bf16.msra.mxu0 %v10019_v9 }
 0x1af   : > { %6038 = vmatpush1.bf16.msra.mxu1 %v10022_v10  ;;  %5998 = vmatprep.subr.bf16.mxu0 %v10027_v11  ;;  %v10093_v10 = vld [vmem:[%s14141_s1 + $0x14f4] ss:$72 sps:$4 sm:$0xff]  }
 0x1b0   : > { %6039 = vmatprep.subr.bf16.mxu1 %v10030_v13  ;;  %v10096_v11 = vld [vmem:[%s14141_s1 + $0x2fc] ss:$72 sps:$4 sm:$0xff]   ;;  %v10091_v13 = vld [vmem:[%s14141_s1 + $0x14f0] ss:$72 sps:$4 sm:$0xff]  }
 0x1b2   : > { %5999 = vmatpush1.bf16.msra.mxu0 %v10025_v15  ;;  %v10094_v15 = vld [vmem:[%s14141_s1 + $0x2f8] ss:$72 sps:$4 sm:$0xff]  }
 0x1b3   : > { %6040 = vmatpush1.bf16.msra.mxu1 %v10028_v18  ;;  %6000 = vmatprep.subr.bf16.mxu0 %v10033_v19 }
 0x1b4   : > { %6041 = vmatprep.subr.bf16.mxu1 %v10036_v20 }
 0x1b6   : > { %6001 = vmatpush2.bf16.msra.mxu0 %v10031_v21  ;;  %v10099_v21 = vld [vmem:[%s14141_s1 + $0x1464] ss:$72 sps:$4 sm:$0xff]  }
 0x1b7   : > { %6042 = vmatpush2.bf16.msra.mxu1 %v10034_v22  ;;  %6002 = vmatprep.subr.bf16.mxu0 %v10039_v23  ;;  %v10102_v22 = vld [vmem:[%s14141_s1 + $0x26c] ss:$72 sps:$4 sm:$0xff]  }
 0x1b8   : > { %6043 = vmatprep.subr.bf16.mxu1 %v10042_v24  ;;  %v10097_v24 = vld [vmem:[%s14141_s1 + $0x1460] ss:$72 sps:$4 sm:$0xff]  }
 0x1ba   : > { %6003 = vmatpush2.bf16.msra.mxu0 %v10037_v25  ;;  %v10100_v25 = vld [vmem:[%s14141_s1 + $0x268] ss:$72 sps:$4 sm:$0xff]  }
 0x1bb   : > { %6044 = vmatpush2.bf16.msra.mxu1 %v10040_v26  ;;  %6004 = vmatprep.subr.bf16.mxu0 %v10045_v27  ;;  %v10105_v26 = vld [vmem:[%s14141_s1 + $0x13d4] ss:$72 sps:$4 sm:$0xff]  }
 0x1bc   : > { %6045 = vmatprep.subr.bf16.mxu1 %v10048_v28  ;;  %v10108_v27 = vld [vmem:[%s14141_s1 + $0x1dc] ss:$72 sps:$4 sm:$0xff]   ;;  %v10103_v28 = vld [vmem:[%s14141_s1 + $0x13d0] ss:$72 sps:$4 sm:$0xff]  }
 0x1be   : > { %6005 = vmatpush2.bf16.msra.mxu0 %v10043_v29  ;;  %v10106_v29 = vld [vmem:[%s14141_s1 + $0x1d8] ss:$72 sps:$4 sm:$0xff]  }
 0x1bf   : > { %6046 = vmatpush2.bf16.msra.mxu1 %v10046_v38  ;;  %6006 = vmatprep.subr.bf16.mxu0 %v10051_v33  ;;  %v10111_v38 = vld [vmem:[%s14141_s1 + $0x1344] ss:$72 sps:$4 sm:$0xff]  }
 0x1c0   : > { %6047 = vmatprep.subr.bf16.mxu1 %v10054_v35  ;;  %v10114_v33 = vld [vmem:[%s14141_s1 + $0x14c] ss:$72 sps:$4 sm:$0xff]   ;;  %v10109_v35 = vld [vmem:[%s14141_s1 + $0x1340] ss:$72 sps:$4 sm:$0xff]  }
 0x1c2   : > { %6007 = vmatpush2.bf16.msra.mxu0 %v10049_v39  ;;  %v10112_v39 = vld [vmem:[%s14141_s1 + $0x148] ss:$72 sps:$4 sm:$0xff]  }
 0x1c3   : > { %6048 = vmatpush2.bf16.msra.mxu1 %v10052_v40  ;;  %6008 = vmatprep.subr.bf16.mxu0 %v10057_v63  ;;  %v10117_v40 = vld [vmem:[%s14141_s1 + $0x12b4] ss:$72 sps:$4 sm:$0xff]  }
 0x1c4   : > { %6049 = vmatprep.subr.bf16.mxu1 %v10060_v43  ;;  %v10120_v63 = vld [vmem:[%s14141_s1 + $0xbc] ss:$72 sps:$4 sm:$0xff]   ;;  %v10115_v43 = vld [vmem:[%s14141_s1 + $0x12b0] ss:$72 sps:$4 sm:$0xff]  }
 0x1c6   : > { %6009 = vmatpush2.bf16.msra.mxu0 %v10055_v44  ;;  %v10118_v44 = vld [vmem:[%s14141_s1 + $0xb8] ss:$72 sps:$4 sm:$0xff]  }
 0x1c7   : > { %6050 = vmatpush2.bf16.msra.mxu1 %v10058_v45  ;;  %6010 = vmatprep.subr.bf16.mxu0 %v10063_v46  ;;  %v10123_v45 = vld [vmem:[%s14141_s1 + $0x1224] ss:$72 sps:$4 sm:$0xff]  }
 0x1c8   : > { %6051 = vmatprep.subr.bf16.mxu1 %v10066_v48  ;;  %v10126_v46 = vld [vmem:[%s14141_s1 + $0x2c] ss:$72 sps:$4 sm:$0xff]   ;;  %v10121_v48 = vld [vmem:[%s14141_s1 + $0x1220] ss:$72 sps:$4 sm:$0xff]  }
 0x1ca   : > { %6011 = vmatpush2.bf16.msra.mxu0 %v10061_v2  ;;  %v10124_v2 = vld [vmem:[%s14141_s1 + $0x28] ss:$72 sps:$4 sm:$0xff]  }
 0x1cb   : > { %6052 = vmatpush2.bf16.msra.mxu1 %v10064_v49  ;;  %6012 = vmatprep.subr.bf16.mxu0 %v10069_v50  ;;  %v10129_v49 = vld [vmem:[%s14141_s1 + $0x1a94] ss:$72 sps:$4 sm:$0xff]  }
 0x1cc   : > { %6053 = vmatprep.subr.bf16.mxu1 %v10072_v52  ;;  %v10132_v50 = vld [vmem:[%s14141_s1 + $0x89c] ss:$72 sps:$4 sm:$0xff]   ;;  %v10127_v52 = vld [vmem:[%s14141_s1 + $0x1a90] ss:$72 sps:$4 sm:$0xff]  }
 0x1ce   : > { %6013 = vmatpush2.bf16.msra.mxu0 %v10067_v54  ;;  %v10130_v54 = vld [vmem:[%s14141_s1 + $0x898] ss:$72 sps:$4 sm:$0xff]  }
 0x1cf   : > { %6054 = vmatpush2.bf16.msra.mxu1 %v10070_v55  ;;  %6014 = vmatprep.subr.bf16.mxu0 %v10075_v56  ;;  %v10135_v55 = vld [vmem:[%s14141_s1 + $0x1a04] ss:$72 sps:$4 sm:$0xff]  }
 0x1d0   : > { %6055 = vmatprep.subr.bf16.mxu1 %v10078_v57  ;;  %v10138_v56 = vld [vmem:[%s14141_s1 + $0x80c] ss:$72 sps:$4 sm:$0xff]   ;;  %v10133_v57 = vld [vmem:[%s14141_s1 + $0x1a00] ss:$72 sps:$4 sm:$0xff]  }
 0x1d2   : > { %6015 = vmatpush2.bf16.msra.mxu0 %v10073_v58  ;;  %v10136_v58 = vld [vmem:[%s14141_s1 + $0x808] ss:$72 sps:$4 sm:$0xff]  }
 0x1d3   : > { %6056 = vmatpush2.bf16.msra.mxu1 %v10076_v31  ;;  %6066 = vmatprep.subr.bf16.mxu0 %v10081_v60  ;;  %v10141_v31 = vld [vmem:[%s14141_s1 + $0x1974] ss:$72 sps:$4 sm:$0xff]  }
 0x1d4   : > { %6107 = vmatprep.subr.bf16.mxu1 %v10084_v61  ;;  %v10144_v60 = vld [vmem:[%s14141_s1 + $0x77c] ss:$72 sps:$4 sm:$0xff]   ;;  %v10139_v61 = vld [vmem:[%s14141_s1 + $0x1970] ss:$72 sps:$4 sm:$0xff]  }
 0x1d5   : > { %v12391_v4 = vpop.f32.mrf.mxu0  ;;  %6017 = vmatmul.mubr.bf16.vlgmr.msra.gmra.mxu0 %v11123_v6 }
 0x1d6   : > { %v12393_v37 = vpop.f32.mrf.mxu1  ;;  %6058 = vmatmul.mubr.bf16.vlgmr.msra.gmra.mxu1 %v11125_v7  ;;  %6067 = vmatpush1.bf16.msra.mxu0 %v10079_v36  ;;  %v10142_v36 = vld [vmem:[%s14141_s1 + $0x778] ss:$72 sps:$4 sm:$0xff]  }
 0x1d7   : > { %6108 = vmatpush1.bf16.msra.mxu1 %v10082_v62  ;;  %v12397_v8 = vpop.f32.mrf.mxu0  ;;  %6068 = vmatprep.subr.bf16.mxu0 %v10087_v0  ;;  %v10147_v62 = vld [vmem:[%s14141_s1 + $0x18e4] ss:$72 sps:$4 sm:$0xff]  }
 0x1d8   : > { %v12399_v9 = vpop.f32.mrf.mxu1  ;;  %6109 = vmatprep.subr.bf16.mxu1 %v10090_v1  ;;  %6098 = vmatprep.mubr.bf16.mxu0 %v11210_v34  ;;  %v10150_v0 = vld [vmem:[%s14141_s1 + $0x6ec] ss:$72 sps:$4 sm:$0xff]   ;;  %v10145_v1 = vld [vmem:[%s14141_s1 + $0x18e0] ss:$72 sps:$4 sm:$0xff]  }
 0x1d9   : > { %6139 = vmatprep.mubr.bf16.mxu1 %v11056_v47  ;;  %v5776_v19 = vpop.f32.mrf.mxu0 }
 0x1da   : > { %v5817_v18 = vpop.f32.mrf.mxu1  ;;  %6069 = vmatpush1.bf16.msra.mxu0 %v10085_v32  ;;  %v10148_v32 = vld [vmem:[%s14141_s1 + $0x6e8] ss:$72 sps:$4 sm:$0xff]  }
 0x1db   : > { %6110 = vmatpush1.bf16.msra.mxu1 %v10088_v3  ;;  %6070 = vmatprep.subr.bf16.mxu0 %v10093_v10  ;;  %v5777_v23 = vpop.f32.mrf.mxu0  ;;  %v10153_v3 = vld [vmem:[%s14141_s1 + $0x1854] ss:$72 sps:$4 sm:$0xff]   ;;  %v10157_v19 = vld [vmem:[%s14141_s1 + $0x17c0] ss:$72 sps:$4 sm:$0xff]  }
 0x1dc   : > { %v5818_v20 = vpop.f32.mrf.mxu1  ;;  %6111 = vmatprep.subr.bf16.mxu1 %v10096_v11  ;;  %v10156_v10 = vld [vmem:[%s14141_s1 + $0x65c] ss:$72 sps:$4 sm:$0xff]   ;;  %v10151_v11 = vld [vmem:[%s14141_s1 + $0x1850] ss:$72 sps:$4 sm:$0xff]   ;;  %v10162_v18 = vld [vmem:[%s14141_s1 + $0x5cc] ss:$72 sps:$4 sm:$0xff]  }
 0x1dd   : > { %v10160_v20 = vld [vmem:[%s14141_s1 + $0x5c8] ss:$72 sps:$4 sm:$0xff]   ;;  %v1079_v23 = vsub.s32 4, %v11894_v30 }
 0x1de   : > { %6071 = vmatpush1.bf16.msra.mxu0 %v10091_v13  ;;  %v10154_v13 = vld [vmem:[%s14141_s1 + $0x658] ss:$72 sps:$4 sm:$0xff]  }
 0x1df   : > { %6112 = vmatpush1.bf16.msra.mxu1 %v10094_v15  ;;  %6072 = vmatprep.subr.bf16.mxu0 %v10099_v21  ;;  %v10159_v15 = vld [vmem:[%s14141_s1 + $0x17c4] ss:$72 sps:$4 sm:$0xff]   ;;  %v10165_v21 = vld [vmem:[%s14141_s1 + $0x1734] ss:$72 sps:$4 sm:$0xff]  }
 0x1e0   : > { %6113 = vmatprep.subr.bf16.mxu1 %v10102_v22  ;;  %v10168_v22 = vld [vmem:[%s14141_s1 + $0x53c] ss:$72 sps:$4 sm:$0xff]  }
 0x1e2   : > { %6073 = vmatpush1.bf16.msra.mxu0 %v10097_v24  ;;  %v1083_v24 = vsub.s32 5, %v11894_v30 }
 0x1e3   : > { %6114 = vmatpush1.bf16.msra.mxu1 %v10100_v25  ;;  %6074 = vmatprep.subr.bf16.mxu0 %v10105_v26  ;;  %v10163_v25 = vld [vmem:[%s14141_s1 + $0x1730] ss:$72 sps:$4 sm:$0xff]  }
 0x1e4   : > { %6115 = vmatprep.subr.bf16.mxu1 %v10108_v27  ;;  %v10166_v26 = vld [vmem:[%s14141_s1 + $0x538] ss:$72 sps:$4 sm:$0xff]   ;;  %v10171_v27 = vld [vmem:[%s14141_s1 + $0x16a4] ss:$72 sps:$4 sm:$0xff]  }
 0x1e6   : > { %6075 = vmatpush1.bf16.msra.mxu0 %v10103_v28  ;;  %v10174_v28 = vld [vmem:[%s14141_s1 + $0x4ac] ss:$72 sps:$4 sm:$0xff]  }
 0x1e7   : > { %6116 = vmatpush1.bf16.msra.mxu1 %v10106_v29  ;;  %6076 = vmatprep.subr.bf16.mxu0 %v10111_v38  ;;  %v12570_v29 = vld [vmem:[%s14142_s2] sm:$0xff] }
 0x1e8   : > { %6117 = vmatprep.subr.bf16.mxu1 %v10114_v33  ;;  %v1080_v38 = vrot.slane %v12570_v29, %v1079_v23  ;;  %v1084_v33 = vrot.slane %v12570_v29, %v1083_v24 }
 0x1ea   : > { %6077 = vmatpush1.bf16.msra.mxu0 %v10109_v35  ;;  %v10169_v35 = vld [vmem:[%s14141_s1 + $0x16a0] ss:$72 sps:$4 sm:$0xff]  }
 0x1eb   : > { %6118 = vmatpush1.bf16.msra.mxu1 %v10112_v39  ;;  %6078 = vmatprep.subr.bf16.mxu0 %v10117_v40  ;;  %v10172_v39 = vld [vmem:[%s14141_s1 + $0x4a8] ss:$72 sps:$4 sm:$0xff]   ;;  %v10177_v40 = vld [vmem:[%s14141_s1 + $0xd1c] ss:$72 sps:$4 sm:$0xff]  }
 0x1ec   : > { %6119 = vmatprep.subr.bf16.mxu1 %v10120_v63  ;;  %v10180_v63 = vld [vmem:[%s14141_s1 + $0x161c] ss:$72 sps:$4 sm:$0xff]  }
 0x1ee   : > { %6079 = vmatpush1.bf16.msra.mxu0 %v10115_v43  ;;  %v5773_v43 = vadd.f32 %v12391_v4, %v1080_v38  ;;  %v10186_v4 = vld [vmem:[%s14141_s1 + $0x158c] ss:$72 sps:$4 sm:$0xff]   ;;  %v10211_v38 = vld [vmem:[%s14141_s1 + $0x9b8] ss:$72 sps:$4 sm:$0xff]  }
 0x1ef   : > { %6120 = vmatpush1.bf16.msra.mxu1 %v10118_v44  ;;  %6080 = vmatprep.subr.bf16.mxu0 %v10123_v45  ;;  %v5775_v44 = vadd.f32 %v12397_v8, %v1084_v33  ;;  %v10175_v45 = vld [vmem:[%s14141_s1 + $0xd18] ss:$72 sps:$4 sm:$0xff]  }
 0x1f0   : > { %6121 = vmatprep.subr.bf16.mxu1 %v10126_v46  ;;  %v10178_v46 = vld [vmem:[%s14141_s1 + $0x1618] ss:$72 sps:$4 sm:$0xff]   ;;  %v5814_v8 = vadd.f32 %v12393_v37, %v5773_v43  ;;  %v10184_v37 = vld [vmem:[%s14141_s1 + $0x1588] ss:$72 sps:$4 sm:$0xff]   ;;  %v10225_v43 = vld [vmem:[%s14141_s1 + $0x119c] ss:$72 sps:$4 sm:$0xff]  }
 0x1f1   : > { %v10214_v33 = vld [vmem:[%s14141_s1 + $0x12b8] ss:$72 sps:$4 sm:$0xff]  }
 0x1f2   : > { %6081 = vmatpush1.bf16.msra.mxu0 %v10121_v48  ;;  %v10183_v48 = vld [vmem:[%s14141_s1 + $0xc8c] ss:$72 sps:$4 sm:$0xff]  }
 0x1f3   : > { %6122 = vmatpush1.bf16.msra.mxu1 %v10124_v2  ;;  %6082 = vmatprep.subr.bf16.mxu0 %v10129_v49 }
 0x1f4   : > { %6123 = vmatprep.subr.bf16.mxu1 %v10132_v50  ;;  %v5816_v50 = vadd.f32 %v12399_v9, %v5775_v44  ;;  %v10189_v9 = vld [vmem:[%s14141_s1 + $0xbfc] ss:$72 sps:$4 sm:$0xff]  }
 0x1f5   : > { %v10228_v44 = vld [vmem:[%s14141_s1 + $0x1a9c] ss:$72 sps:$4 sm:$0xff]  }
 0x1f6   : > { %6083 = vmatpush2.bf16.msra.mxu0 %v10127_v52 }
 0x1f7   : > { %6124 = vmatpush2.bf16.msra.mxu1 %v10130_v54  ;;  %6084 = vmatprep.subr.bf16.mxu0 %v10135_v55  ;;  %v10181_v54 = vld [vmem:[%s14141_s1 + $0xc88] ss:$72 sps:$4 sm:$0xff]  }
 0x1f8   : > { %6125 = vmatprep.subr.bf16.mxu1 %v10138_v56 }
 0x1fa   : > { %6085 = vmatpush2.bf16.msra.mxu0 %v10133_v57  ;;  %v10192_v57 = vld [vmem:[%s14141_s1 + $0x14fc] ss:$72 sps:$4 sm:$0xff]  }
 0x1fb   : > { %6126 = vmatpush2.bf16.msra.mxu1 %v10136_v58  ;;  %6086 = vmatprep.subr.bf16.mxu0 %v10141_v31 }
 0x1fc   : > { %6127 = vmatprep.subr.bf16.mxu1 %v10144_v60 }
 0x1fe   : > { %6087 = vmatpush2.bf16.msra.mxu0 %v10139_v61 }
 0x1ff   : > { %6128 = vmatpush2.bf16.msra.mxu1 %v10142_v36  ;;  %6088 = vmatprep.subr.bf16.mxu0 %v10147_v62  ;;  %v10187_v62 = vld [vmem:[%s14141_s1 + $0xbf8] ss:$72 sps:$4 sm:$0xff]  }
 0x200   : > { %6129 = vmatprep.subr.bf16.mxu1 %v10150_v0  ;;  %v10190_v0 = vld [vmem:[%s14141_s1 + $0x14f8] ss:$72 sps:$4 sm:$0xff]  }
 0x202   : > { %6089 = vmatpush2.bf16.msra.mxu0 %v10145_v1 }
 0x203   : > { %6130 = vmatpush2.bf16.msra.mxu1 %v10148_v32  ;;  %6090 = vmatprep.subr.bf16.mxu0 %v10153_v3  ;;  %v10195_v32 = vld [vmem:[%s14141_s1 + $0xb6c] ss:$72 sps:$4 sm:$0xff]  }
 0x204   : > { %6131 = vmatprep.subr.bf16.mxu1 %v10156_v10  ;;  %v10198_v3 = vld [vmem:[%s14141_s1 + $0x146c] ss:$72 sps:$4 sm:$0xff]  }
 0x206   : > { %6091 = vmatpush2.bf16.msra.mxu0 %v10151_v11  ;;  %v10193_v11 = vld [vmem:[%s14141_s1 + $0xb68] ss:$72 sps:$4 sm:$0xff]  }
 0x207   : > { %6132 = vmatpush2.bf16.msra.mxu1 %v10154_v13  ;;  %6092 = vmatprep.subr.bf16.mxu0 %v10159_v15  ;;  %v10196_v13 = vld [vmem:[%s14141_s1 + $0x1468] ss:$72 sps:$4 sm:$0xff]   ;;  %v10201_v15 = vld [vmem:[%s14141_s1 + $0xadc] ss:$72 sps:$4 sm:$0xff]  }
 0x208   : > { %6133 = vmatprep.subr.bf16.mxu1 %v10162_v18  ;;  %v10204_v18 = vld [vmem:[%s14141_s1 + $0x13dc] ss:$72 sps:$4 sm:$0xff]  }
 0x20a   : > { %6093 = vmatpush2.bf16.msra.mxu0 %v10157_v19  ;;  %v10199_v19 = vld [vmem:[%s14141_s1 + $0xad8] ss:$72 sps:$4 sm:$0xff]  }
 0x20b   : > { %6134 = vmatpush2.bf16.msra.mxu1 %v10160_v20  ;;  %6094 = vmatprep.subr.bf16.mxu0 %v10165_v21  ;;  %v10202_v20 = vld [vmem:[%s14141_s1 + $0x13d8] ss:$72 sps:$4 sm:$0xff]   ;;  %v10207_v21 = vld [vmem:[%s14141_s1 + $0xa4c] ss:$72 sps:$4 sm:$0xff]  }
 0x20c   : > { %6135 = vmatprep.subr.bf16.mxu1 %v10168_v22  ;;  %v10210_v22 = vld [vmem:[%s14141_s1 + $0x134c] ss:$72 sps:$4 sm:$0xff]  }
 0x20e   : > { %6095 = vmatpush2.bf16.msra.mxu0 %v10163_v25  ;;  %v10205_v25 = vld [vmem:[%s14141_s1 + $0xa48] ss:$72 sps:$4 sm:$0xff]  }
 0x20f   : > { %6136 = vmatpush2.bf16.msra.mxu1 %v10166_v26  ;;  %6096 = vmatprep.subr.bf16.mxu0 %v10171_v27  ;;  %v10208_v26 = vld [vmem:[%s14141_s1 + $0x1348] ss:$72 sps:$4 sm:$0xff]   ;;  %v10213_v27 = vld [vmem:[%s14141_s1 + $0x9bc] ss:$72 sps:$4 sm:$0xff]  }
 0x210   : > { %6137 = vmatprep.subr.bf16.mxu1 %v10174_v28  ;;  %v10216_v28 = vld [vmem:[%s14141_s1 + $0x12bc] ss:$72 sps:$4 sm:$0xff]  }
 0x212   : > { %6097 = vmatpush2.bf16.msra.mxu0 %v10169_v35  ;;  %v10219_v35 = vld [vmem:[%s14141_s1 + $0x92c] ss:$72 sps:$4 sm:$0xff]  }
 0x213   : > { %6138 = vmatpush2.bf16.msra.mxu1 %v10172_v39  ;;  %6148 = vmatprep.subr.bf16.mxu0 %v10177_v40  ;;  %v10222_v39 = vld [vmem:[%s14141_s1 + $0x122c] ss:$72 sps:$4 sm:$0xff]   ;;  %v10217_v40 = vld [vmem:[%s14141_s1 + $0x928] ss:$72 sps:$4 sm:$0xff]  }
 0x214   : > { %6189 = vmatprep.subr.bf16.mxu1 %v10180_v63  ;;  %v10220_v63 = vld [vmem:[%s14141_s1 + $0x1228] ss:$72 sps:$4 sm:$0xff]  }
 0x215   : > { %v5854_v2 = vpop.f32.mrf.mxu0  ;;  %6099 = vmatmul.mubr.bf16.vlgmr.msra.gmra.mxu0 %v11332_v14 }
 0x216   : > { %v12605_v49 = vpop.f32.mrf.mxu1  ;;  %6140 = vmatmul.mubr.bf16.vlgmr.msra.gmra.mxu1 %v11123_v6  ;;  %v5855_v52 = vadd.f32 %v5854_v2, %v5814_v8  ;;  %6149 = vmatpush1.bf16.msra.mxu0 %v10175_v45  ;;  %v10223_v45 = vld [vmem:[%s14141_s1 + $0x1198] ss:$72 sps:$4 sm:$0xff]   ;;  %v10229_v8 = vld [vmem:[%s14141_s1 + $0x1108] ss:$72 sps:$4 sm:$0xff]  }
 0x217   : > { %6190 = vmatpush1.bf16.msra.mxu1 %v10178_v46  ;;  %v5856_v55 = vpop.f32.mrf.mxu0  ;;  %6150 = vmatprep.subr.bf16.mxu0 %v10183_v48  ;;  %v10226_v46 = vld [vmem:[%s14141_s1 + $0x1a98] ss:$72 sps:$4 sm:$0xff]   ;;  %v10231_v48 = vld [vmem:[%s14141_s1 + $0x110c] ss:$72 sps:$4 sm:$0xff]   ;;  %v10232_v2 = vld [vmem:[%s14141_s1 + $0x1a08] ss:$72 sps:$4 sm:$0xff]  }
 0x218   : > { %v12616_v56 = vpop.f32.mrf.mxu1  ;;  %6191 = vmatprep.subr.bf16.mxu1 %v10186_v4  ;;  %v12624_v58 = vpack.c.bf16 %v5855_v52, %v5855_v52  ;;  %v5857_v31 = vadd.f32 %v5856_v55, %v5816_v50  ;;  %6180 = vmatprep.mubr.bf16.mxu0 %v11065_v51  ;;  %v10234_v4 = vld [vmem:[%s14141_s1 + $0x1a0c] ss:$72 sps:$4 sm:$0xff]   ;;  %v10237_v50 = vld [vmem:[%s14141_s1 + $0x107c] ss:$72 sps:$4 sm:$0xff]  }
 0x219   : > { %6221 = vmatprep.mubr.bf16.mxu1 %v11210_v34  ;;  %v5858_v61 = vpop.f32.mrf.mxu0  ;;  %v10240_v52 = vld [vmem:[%s14141_s1 + $0x197c] ss:$72 sps:$4 sm:$0xff]   ;;  %v10243_v55 = vld [vmem:[%s14141_s1 + $0xfec] ss:$72 sps:$4 sm:$0xff]  }
 0x21a   : > { %v5899_v60 = vpop.f32.mrf.mxu1  ;;  %6658 = vst.msk [vmem:[#allocation2 + $0x20] sm:$0xf] %vm6617_vm0, %v12624_v58  ;;  %v12630_v36 = vpack.c.bf16 %v5857_v31, %v5857_v31  ;;  %6151 = vmatpush1.bf16.msra.mxu0 %v10181_v54  ;;  %v10235_v54 = vld [vmem:[%s14141_s1 + $0x1078] ss:$72 sps:$4 sm:$0xff]   ;;  %v10244_v31 = vld [vmem:[%s14141_s1 + $0x18e8] ss:$72 sps:$4 sm:$0xff]  }
 0x21b   : > { %6192 = vmatpush1.bf16.msra.mxu1 %v10184_v37  ;;  %6152 = vmatprep.subr.bf16.mxu0 %v10189_v9  ;;  %v5859_v10 = vpop.f32.mrf.mxu0  ;;  %v10238_v37 = vld [vmem:[%s14141_s1 + $0x1978] ss:$72 sps:$4 sm:$0xff]   ;;  %v10246_v9 = vld [vmem:[%s14141_s1 + $0x18ec] ss:$72 sps:$4 sm:$0xff]   ;;  %v10249_v60 = vld [vmem:[%s14141_s1 + $0xf5c] ss:$72 sps:$4 sm:$0xff]  }
 0x21c   : > { %v5900_v1 = vpop.f32.mrf.mxu1  ;;  %6193 = vmatprep.subr.bf16.mxu1 %v10192_v57  ;;  %6668 = vst.msk [vmem:[#allocation2 + $0x28] sm:$0xf] %vm6617_vm0, %v12630_v36  ;;  %v10241_v57 = vld [vmem:[%s14141_s1 + $0xfe8] ss:$72 sps:$4 sm:$0xff]   ;;  %v10252_v61 = vld [vmem:[%s14141_s1 + $0x185c] ss:$72 sps:$4 sm:$0xff]  }
 0x21d   : > { %v10255_v1 = vld [vmem:[%s14141_s1 + $0xecc] ss:$72 sps:$4 sm:$0xff]   ;;  %v10256_v10 = vld [vmem:[%s14141_s1 + $0x17c8] ss:$72 sps:$4 sm:$0xff]  }
 0x21e   : > { %6153 = vmatpush1.bf16.msra.mxu0 %v10187_v62  ;;  %v10247_v62 = vld [vmem:[%s14141_s1 + $0xf58] ss:$72 sps:$4 sm:$0xff]  }
 0x21f   : > { %6194 = vmatpush1.bf16.msra.mxu1 %v10190_v0  ;;  %6154 = vmatprep.subr.bf16.mxu0 %v10195_v32  ;;  %v10250_v0 = vld [vmem:[%s14141_s1 + $0x1858] ss:$72 sps:$4 sm:$0xff]   ;;  %v10258_v32 = vld [vmem:[%s14141_s1 + $0x17cc] ss:$72 sps:$4 sm:$0xff]  }
 0x220   : > { %6195 = vmatprep.subr.bf16.mxu1 %v10198_v3  ;;  %v10253_v3 = vld [vmem:[%s14141_s1 + $0xec8] ss:$72 sps:$4 sm:$0xff]  }
 0x222   : > { %6155 = vmatpush1.bf16.msra.mxu0 %v10193_v11  ;;  %v10261_v11 = vld [vmem:[%s14141_s1 + $0xe3c] ss:$72 sps:$4 sm:$0xff]  }
 0x223   : > { %6196 = vmatpush1.bf16.msra.mxu1 %v10196_v13  ;;  %6156 = vmatprep.subr.bf16.mxu0 %v10201_v15  ;;  %v10264_v13 = vld [vmem:[%s14141_s1 + $0x173c] ss:$72 sps:$4 sm:$0xff]   ;;  %v10259_v15 = vld [vmem:[%s14141_s1 + $0xe38] ss:$72 sps:$4 sm:$0xff]  }
 0x224   : > { %6197 = vmatprep.subr.bf16.mxu1 %v10204_v18  ;;  %v10262_v18 = vld [vmem:[%s14141_s1 + $0x1738] ss:$72 sps:$4 sm:$0xff]  }
 0x226   : > { %6157 = vmatpush1.bf16.msra.mxu0 %v10199_v19  ;;  %v10267_v19 = vld [vmem:[%s14141_s1 + $0xdac] ss:$72 sps:$4 sm:$0xff]  }
 0x227   : > { %6198 = vmatpush1.bf16.msra.mxu1 %v10202_v20  ;;  %6158 = vmatprep.subr.bf16.mxu0 %v10207_v21  ;;  %v10270_v20 = vld [vmem:[%s14141_s1 + $0x16ac] ss:$72 sps:$4 sm:$0xff]   ;;  %v1087_v21 = vsub.s32 6, %v11894_v30 }
 0x228   : > { %6199 = vmatprep.subr.bf16.mxu1 %v10210_v22  ;;  %v1091_v22 = vsub.s32 7, %v11894_v30 }
 0x22a   : > { %6159 = vmatpush1.bf16.msra.mxu0 %v10205_v25  ;;  %v10265_v25 = vld [vmem:[%s14141_s1 + $0xda8] ss:$72 sps:$4 sm:$0xff]  }
 0x22b   : > { %6200 = vmatpush1.bf16.msra.mxu1 %v10208_v26  ;;  %6160 = vmatprep.subr.bf16.mxu0 %v10213_v27  ;;  %v10268_v26 = vld [vmem:[%s14141_s1 + $0x16a8] ss:$72 sps:$4 sm:$0xff]   ;;  %v10273_v27 = vld [vmem:[%s14141_s1 + $0x424] ss:$72 sps:$4 sm:$0xff]  }
 0x22c   : > { %6201 = vmatprep.subr.bf16.mxu1 %v10216_v28  ;;  %v10276_v28 = vld [vmem:[%s14141_s1 + $0xd24] ss:$72 sps:$4 sm:$0xff]  }
 0x22e   : > { %6161 = vmatpush1.bf16.msra.mxu0 %v10211_v38  ;;  %v1088_v38 = vrot.slane %v12570_v29, %v1087_v21 }
 0x22f   : > { %6202 = vmatpush1.bf16.msra.mxu1 %v10214_v33  ;;  %6162 = vmatprep.subr.bf16.mxu0 %v10219_v35  ;;  %v1092_v33 = vrot.slane %v12570_v29, %v1091_v22  ;;  %v10271_v35 = vld [vmem:[%s14141_s1 + $0x420] ss:$72 sps:$4 sm:$0xff]   ;;  %v10282_v29 = vld [vmem:[%s14141_s1 + $0xc94] ss:$72 sps:$4 sm:$0xff]  }
 0x230   : > { %6203 = vmatprep.subr.bf16.mxu1 %v10222_v39  ;;  %v10274_v39 = vld [vmem:[%s14141_s1 + $0xd20] ss:$72 sps:$4 sm:$0xff]  }
 0x232   : > { %6163 = vmatpush1.bf16.msra.mxu0 %v10217_v40  ;;  %v10279_v40 = vld [vmem:[%s14141_s1 + $0x394] ss:$72 sps:$4 sm:$0xff]  }
 0x233   : > { %6204 = vmatpush1.bf16.msra.mxu1 %v10220_v63  ;;  %6164 = vmatprep.subr.bf16.mxu0 %v10225_v43  ;;  %v5896_v63 = vadd.f32 %v12605_v49, %v1088_v38  ;;  %v10313_v38 = vld [vmem:[%s14141_s1 + $0x30] ss:$72 sps:$4 sm:$0xff]  }
 0x234   : > { %6205 = vmatprep.subr.bf16.mxu1 %v10228_v44 }
 0x236   : > { %6165 = vmatpush2.bf16.msra.mxu0 %v10223_v45  ;;  %v5898_v45 = vadd.f32 %v12616_v56, %v1092_v33  ;;  %v10288_v56 = vld [vmem:[%s14141_s1 + $0xc04] ss:$72 sps:$4 sm:$0xff]  }
 0x237   : > { %6206 = vmatpush2.bf16.msra.mxu1 %v10226_v46  ;;  %6166 = vmatprep.subr.bf16.mxu0 %v10231_v48  ;;  %v10277_v48 = vld [vmem:[%s14141_s1 + $0x390] ss:$72 sps:$4 sm:$0xff]   ;;  %v10321_v33 = vld [vmem:[%s14141_s1 + $0x8a4] ss:$72 sps:$4 sm:$0xff]  }
 0x238   : > { %6207 = vmatprep.subr.bf16.mxu1 %v10234_v4  ;;  %v10280_v4 = vld [vmem:[%s14141_s1 + $0xc90] ss:$72 sps:$4 sm:$0xff]  }
 0x23a   : > { %6167 = vmatpush2.bf16.msra.mxu0 %v10229_v8 }
 0x23b   : > { %6208 = vmatpush2.bf16.msra.mxu1 %v10232_v2  ;;  %6168 = vmatprep.subr.bf16.mxu0 %v10237_v50  ;;  %v10285_v2 = vld [vmem:[%s14141_s1 + $0x304] ss:$72 sps:$4 sm:$0xff]  }
 0x23c   : > { %6209 = vmatprep.subr.bf16.mxu1 %v10240_v52 }
 0x23e   : > { %6169 = vmatpush2.bf16.msra.mxu0 %v10235_v54 }
 0x23f   : > { %6210 = vmatpush2.bf16.msra.mxu1 %v10238_v37  ;;  %6170 = vmatprep.subr.bf16.mxu0 %v10243_v55 }
 0x240   : > { %6211 = vmatprep.subr.bf16.mxu1 %v10246_v9 }
 0x242   : > { %6171 = vmatpush2.bf16.msra.mxu0 %v10241_v57  ;;  %v10283_v57 = vld [vmem:[%s14141_s1 + $0x300] ss:$72 sps:$4 sm:$0xff]  }
 0x243   : > { %6212 = vmatpush2.bf16.msra.mxu1 %v10244_v31  ;;  %6172 = vmatprep.subr.bf16.mxu0 %v10249_v60  ;;  %v10286_v31 = vld [vmem:[%s14141_s1 + $0xc00] ss:$72 sps:$4 sm:$0xff]  }
 0x244   : > { %6213 = vmatprep.subr.bf16.mxu1 %v10252_v61  ;;  %v10291_v61 = vld [vmem:[%s14141_s1 + $0x274] ss:$72 sps:$4 sm:$0xff]  }
 0x246   : > { %6173 = vmatpush2.bf16.msra.mxu0 %v10247_v62 }
 0x247   : > { %6214 = vmatpush2.bf16.msra.mxu1 %v10250_v0  ;;  %6174 = vmatprep.subr.bf16.mxu0 %v10255_v1  ;;  %v10294_v1 = vld [vmem:[%s14141_s1 + $0xb74] ss:$72 sps:$4 sm:$0xff]  }
 0x248   : > { %6215 = vmatprep.subr.bf16.mxu1 %v10258_v32  ;;  %v10289_v32 = vld [vmem:[%s14141_s1 + $0x270] ss:$72 sps:$4 sm:$0xff]  }
 0x24a   : > { %6175 = vmatpush2.bf16.msra.mxu0 %v10253_v3  ;;  %v10292_v3 = vld [vmem:[%s14141_s1 + $0xb70] ss:$72 sps:$4 sm:$0xff]  }
 0x24b   : > { %6216 = vmatpush2.bf16.msra.mxu1 %v10256_v10  ;;  %6176 = vmatprep.subr.bf16.mxu0 %v10261_v11  ;;  %v10297_v10 = vld [vmem:[%s14141_s1 + $0x1e4] ss:$72 sps:$4 sm:$0xff]  }
 0x24c   : > { %6217 = vmatprep.subr.bf16.mxu1 %v10264_v13  ;;  %v10300_v11 = vld [vmem:[%s14141_s1 + $0xae4] ss:$72 sps:$4 sm:$0xff]   ;;  %v10295_v13 = vld [vmem:[%s14141_s1 + $0x1e0] ss:$72 sps:$4 sm:$0xff]  }
 0x24e   : > { %6177 = vmatpush2.bf16.msra.mxu0 %v10259_v15  ;;  %v10298_v15 = vld [vmem:[%s14141_s1 + $0xae0] ss:$72 sps:$4 sm:$0xff]  }
 0x24f   : > { %6218 = vmatpush2.bf16.msra.mxu1 %v10262_v18  ;;  %6178 = vmatprep.subr.bf16.mxu0 %v10267_v19  ;;  %v10306_v18 = vld [vmem:[%s14141_s1 + $0xa54] ss:$72 sps:$4 sm:$0xff]   ;;  %v10301_v19 = vld [vmem:[%s14141_s1 + $0x150] ss:$72 sps:$4 sm:$0xff]  }
 0x250   : > { %6219 = vmatprep.subr.bf16.mxu1 %v10270_v20  ;;  %v10309_v20 = vld [vmem:[%s14141_s1 + $0xc4] ss:$72 sps:$4 sm:$0xff]  }
 0x252   : > { %6179 = vmatpush2.bf16.msra.mxu0 %v10265_v25  ;;  %v10312_v25 = vld [vmem:[%s14141_s1 + $0x9c4] ss:$72 sps:$4 sm:$0xff]  }
 0x253   : > { %6220 = vmatpush2.bf16.msra.mxu1 %v10268_v26  ;;  %6230 = vmatprep.subr.bf16.mxu0 %v10273_v27  ;;  %v10307_v26 = vld [vmem:[%s14141_s1 + $0xc0] ss:$72 sps:$4 sm:$0xff]   ;;  %v10315_v27 = vld [vmem:[%s14141_s1 + $0x34] ss:$72 sps:$4 sm:$0xff]  }
 0x254   : > { %6271 = vmatprep.subr.bf16.mxu1 %v10276_v28  ;;  %v10318_v28 = vld [vmem:[%s14141_s1 + $0x934] ss:$72 sps:$4 sm:$0xff]  }
 0x255   : > { %v5936_v43 = vpop.f32.mrf.mxu0  ;;  %6181 = vmatmul.mubr.bf16.vlgmr.msra.gmra.mxu0 %v11125_v7 }
 0x256   : > { %v5977_v44 = vpop.f32.mrf.mxu1  ;;  %6222 = vmatmul.mubr.bf16.vlgmr.msra.gmra.mxu1 %v11332_v14  ;;  %v5937_v46 = vadd.f32 %v5936_v43, %v5896_v63  ;;  %6231 = vmatpush1.bf16.msra.mxu0 %v10271_v35  ;;  %v10324_v35 = vld [vmem:[%s14141_s1 + $0x11a4] ss:$72 sps:$4 sm:$0xff]   ;;  %v10325_v63 = vld [vmem:[%s14141_s1 + $0x810] ss:$72 sps:$4 sm:$0xff]  }
 0x257   : > { %6272 = vmatpush1.bf16.msra.mxu1 %v10274_v39  ;;  %v5938_v49 = vpop.f32.mrf.mxu0  ;;  %6232 = vmatprep.subr.bf16.mxu0 %v10279_v40  ;;  %v10319_v39 = vld [vmem:[%s14141_s1 + $0x8a0] ss:$72 sps:$4 sm:$0xff]   ;;  %v10327_v40 = vld [vmem:[%s14141_s1 + $0x814] ss:$72 sps:$4 sm:$0xff]   ;;  %v10333_v43 = vld [vmem:[%s14141_s1 + $0x784] ss:$72 sps:$4 sm:$0xff]  }
 0x258   : > { %v5979_v8 = vpop.f32.mrf.mxu1  ;;  %6273 = vmatprep.subr.bf16.mxu1 %v10282_v29  ;;  %v5978_v50 = vadd.f32 %v5977_v44, %v5937_v46  ;;  %v5939_v52 = vadd.f32 %v5938_v49, %v5898_v45  ;;  %6262 = vmatprep.mubr.bf16.mxu0 %v11056_v47  ;;  %v10330_v29 = vld [vmem:[%s14141_s1 + $0x1114] ss:$72 sps:$4 sm:$0xff]   ;;  %v10336_v44 = vld [vmem:[%s14141_s1 + $0x1084] ss:$72 sps:$4 sm:$0xff]   ;;  %v10331_v45 = vld [vmem:[%s14141_s1 + $0x780] ss:$72 sps:$4 sm:$0xff]  }
 0x259   : > { %6303 = vmatprep.mubr.bf16.mxu1 %v11065_v51  ;;  %v5940_v37 = vpop.f32.mrf.mxu0  ;;  %v10334_v46 = vld [vmem:[%s14141_s1 + $0x1080] ss:$72 sps:$4 sm:$0xff]   ;;  %v10337_v49 = vld [vmem:[%s14141_s1 + $0x6f0] ss:$72 sps:$4 sm:$0xff]  }
 0x25a   : > { %v5981_v54 = vpop.f32.mrf.mxu1  ;;  %v6605_v55 = vpack.c.bf16 %v5978_v50, %v5978_v50  ;;  %v5980_v9 = vadd.f32 %v5979_v8, %v5939_v52  ;;  %6233 = vmatpush1.bf16.msra.mxu0 %v10277_v48  ;;  %v10339_v48 = vld [vmem:[%s14141_s1 + $0x6f4] ss:$72 sps:$4 sm:$0xff]   ;;  %v10340_v8 = vld [vmem:[%s14141_s1 + $0xff0] ss:$72 sps:$4 sm:$0xff]   ;;  %v10343_v50 = vld [vmem:[%s14141_s1 + $0x660] ss:$72 sps:$4 sm:$0xff]  }
 0x25b   : > { %6274 = vmatpush1.bf16.msra.mxu1 %v10280_v4  ;;  %6234 = vmatprep.subr.bf16.mxu0 %v10285_v2  ;;  %v5941_v62 = vpop.f32.mrf.mxu0  ;;  %v10342_v4 = vld [vmem:[%s14141_s1 + $0xff4] ss:$72 sps:$4 sm:$0xff]   ;;  %v10345_v2 = vld [vmem:[%s14141_s1 + $0x664] ss:$72 sps:$4 sm:$0xff]   ;;  %v10346_v52 = vld [vmem:[%s14141_s1 + $0xf60] ss:$72 sps:$4 sm:$0xff]  }
 0x25c   : > { %v5982_v60 = vpop.f32.mrf.mxu1  ;;  %6275 = vmatprep.subr.bf16.mxu1 %v10288_v56  ;;  %6678 = vst.msk [vmem:[#allocation2 + $0x30] sm:$0xf] %vm6617_vm0, %v6605_v55  ;;  %v6606_v0 = vpack.c.bf16 %v5980_v9, %v5980_v9  ;;  %6682 = vrot.lane.b32.xlu0 %v6605_v55, %s10831_s28  ;;  %v10348_v56 = vld [vmem:[%s14141_s1 + $0xf64] ss:$72 sps:$4 sm:$0xff]   ;;  %v10351_v54 = vld [vmem:[%s14141_s1 + $0x5d4] ss:$72 sps:$4 sm:$0xff]  }
 0x25d   : > { %v10354_v37 = vld [vmem:[%s14141_s1 + $0xed4] ss:$72 sps:$4 sm:$0xff]   ;;  %v10349_v55 = vld [vmem:[%s14141_s1 + $0x5d0] ss:$72 sps:$4 sm:$0xff]   ;;  %v10355_v60 = vld [vmem:[%s14141_s1 + $0x540] ss:$72 sps:$4 sm:$0xff]  }
 0x25e   : > { %6688 = vst.msk [vmem:[#allocation2 + $0x38] sm:$0xf] %vm6617_vm0, %v6606_v0  ;;  %6235 = vmatpush1.bf16.msra.mxu0 %v10283_v57  ;;  %6692 = vrot.lane.b32.xlu1 %v6606_v0, %s10831_s28  ;;  %v10352_v9 = vld [vmem:[%s14141_s1 + $0xed0] ss:$72 sps:$4 sm:$0xff]   ;;  %v10357_v57 = vld [vmem:[%s14141_s1 + $0x544] ss:$72 sps:$4 sm:$0xff]  }
 0x25f   : > { %6276 = vmatpush1.bf16.msra.mxu1 %v10286_v31  ;;  %6236 = vmatprep.subr.bf16.mxu0 %v10291_v61  ;;  %v10360_v31 = vld [vmem:[%s14141_s1 + $0xe44] ss:$72 sps:$4 sm:$0xff]   ;;  %v10358_v61 = vld [vmem:[%s14141_s1 + $0xe40] ss:$72 sps:$4 sm:$0xff]   ;;  %v10363_v62 = vld [vmem:[%s14141_s1 + $0x4b4] ss:$72 sps:$4 sm:$0xff]  }
 0x260   : > { %6622 = vrot.lane.b32.xlu0 %v11981_v5, %s10831_s28  ;;  %6277 = vmatprep.subr.bf16.mxu1 %v10294_v1  ;;  %v10303_v5 = vld [vmem:[%s14141_s1 + $0x154] ss:$72 sps:$4 sm:$0xff]   ;;  %v10361_v1 = vld [vmem:[%s14141_s1 + $0x4b0] ss:$72 sps:$4 sm:$0xff]  }
 0x261   : > { %v10366_v0 = vld [vmem:[%s14141_s1 + $0xdb4] ss:$72 sps:$4 sm:$0xff]  }
 0x262   : > { %6237 = vmatpush1.bf16.msra.mxu0 %v10289_v32  ;;  %6632 = vrot.lane.b32.xlu1 %v11993_v12, %s10831_s28  ;;  %v10304_v12 = vld [vmem:[%s14141_s1 + $0xa50] ss:$72 sps:$4 sm:$0xff]  }
 0x263   : > { %6278 = vmatpush1.bf16.msra.mxu1 %v10292_v3  ;;  %6238 = vmatprep.subr.bf16.mxu0 %v10297_v10  ;;  %v10364_v32 = vld [vmem:[%s14141_s1 + $0xdb0] ss:$72 sps:$4 sm:$0xff]   ;;  %v10369_v3 = vld [vmem:[%s14141_s1 + $0x1624] ss:$72 sps:$4 sm:$0xff]  }
 0x264   : > { %6279 = vmatprep.subr.bf16.mxu1 %v10300_v11  ;;  %v10372_v10 = vld [vmem:[%s14141_s1 + $0x42c] ss:$72 sps:$4 sm:$0xff]   ;;  %v10367_v11 = vld [vmem:[%s14141_s1 + $0x1620] ss:$72 sps:$4 sm:$0xff]  }
 0x266   : > { %6239 = vmatpush1.bf16.msra.mxu0 %v10295_v13  ;;  %6642 = vrot.lane.b32.xlu1 %v12203_v53, %s10831_s28  ;;  %v10310_v53 = vld [vmem:[%s14141_s1 + $0x9c0] ss:$72 sps:$4 sm:$0xff]  }
 0x267   : > { %6280 = vmatpush1.bf16.msra.mxu1 %v10298_v15  ;;  %6240 = vmatprep.subr.bf16.mxu0 %v10303_v5  ;;  %v10370_v13 = vld [vmem:[%s14141_s1 + $0x428] ss:$72 sps:$4 sm:$0xff]   ;;  %v10375_v15 = vld [vmem:[%s14141_s1 + $0x1594] ss:$72 sps:$4 sm:$0xff]  }
 0x268   : > { %6281 = vmatprep.subr.bf16.mxu1 %v10306_v18  ;;  %v10378_v5 = vld [vmem:[%s14141_s1 + $0x39c] ss:$72 sps:$4 sm:$0xff]  }
 0x26a   : > { %6241 = vmatpush1.bf16.msra.mxu0 %v10301_v19  ;;  %6652 = vrot.lane.b32.xlu1 %v12213_v59, %s10831_s28  ;;  %v10316_v59 = vld [vmem:[%s14141_s1 + $0x930] ss:$72 sps:$4 sm:$0xff]  }
 0x26b   : > { %6282 = vmatpush1.bf16.msra.mxu1 %v10304_v12  ;;  %6242 = vmatprep.subr.bf16.mxu0 %v10309_v20  ;;  %v10373_v12 = vld [vmem:[%s14141_s1 + $0x1590] ss:$72 sps:$4 sm:$0xff]  }
 0x26c   : > { %6283 = vmatprep.subr.bf16.mxu1 %v10312_v25  ;;  %v10376_v20 = vld [vmem:[%s14141_s1 + $0x398] ss:$72 sps:$4 sm:$0xff]  }
 0x26e   : > { %6243 = vmatpush1.bf16.msra.mxu0 %v10307_v26  ;;  %6662 = vrot.lane.b32.xlu1 %v12624_v58, %s10831_s28  ;;  %v10322_v58 = vld [vmem:[%s14141_s1 + $0x11a0] ss:$72 sps:$4 sm:$0xff]  }
 0x26f   : > { %6284 = vmatpush1.bf16.msra.mxu1 %v10310_v53  ;;  %6244 = vmatprep.subr.bf16.mxu0 %v10315_v27  ;;  %v10381_v53 = vld [vmem:[%s14141_s1 + $0x1504] ss:$72 sps:$4 sm:$0xff]  }
 0x270   : > { %6285 = vmatprep.subr.bf16.mxu1 %v10318_v28  ;;  %v10384_v27 = vld [vmem:[%s14141_s1 + $0x30c] ss:$72 sps:$4 sm:$0xff]  }
 0x272   : > { %6245 = vmatpush1.bf16.msra.mxu0 %v10313_v38  ;;  %6672 = vrot.lane.b32.xlu1 %v12630_v36, %s10831_s28  ;;  %v10328_v36 = vld [vmem:[%s14141_s1 + $0x1110] ss:$72 sps:$4 sm:$0xff]  }
 0x273   : > { %6286 = vmatpush1.bf16.msra.mxu1 %v10316_v59  ;;  %6246 = vmatprep.subr.bf16.mxu0 %v10321_v33  ;;  %v10379_v59 = vld [vmem:[%s14141_s1 + $0x1500] ss:$72 sps:$4 sm:$0xff]  }
 0x274   : > { %6287 = vmatprep.subr.bf16.mxu1 %v10324_v35  ;;  %v10382_v33 = vld [vmem:[%s14141_s1 + $0x308] ss:$72 sps:$4 sm:$0xff]  }
 0x276   : > { %6247 = vmatpush2.bf16.msra.mxu0 %v10319_v39  ;;  %v10387_v39 = vld [vmem:[%s14141_s1 + $0x1474] ss:$72 sps:$4 sm:$0xff]  }
 0x277   : > { %6288 = vmatpush2.bf16.msra.mxu1 %v10322_v58  ;;  %6248 = vmatprep.subr.bf16.mxu0 %v10327_v40  ;;  %v10390_v58 = vld [vmem:[%s14141_s1 + $0x27c] ss:$72 sps:$4 sm:$0xff]  }
 0x278   : > { %6289 = vmatprep.subr.bf16.mxu1 %v10330_v29  ;;  %v10385_v29 = vld [vmem:[%s14141_s1 + $0x1470] ss:$72 sps:$4 sm:$0xff]  }
 0x27a   : > { %6249 = vmatpush2.bf16.msra.mxu0 %v10325_v63  ;;  %v10388_v63 = vld [vmem:[%s14141_s1 + $0x278] ss:$72 sps:$4 sm:$0xff]  }
 0x27b   : > { %6290 = vmatpush2.bf16.msra.mxu1 %v10328_v36  ;;  %6250 = vmatprep.subr.bf16.mxu0 %v10333_v43  ;;  %v10393_v36 = vld [vmem:[%s14141_s1 + $0x13e4] ss:$72 sps:$4 sm:$0xff]  }
 0x27c   : > { %6291 = vmatprep.subr.bf16.mxu1 %v10336_v44  ;;  %v10396_v43 = vld [vmem:[%s14141_s1 + $0x1ec] ss:$72 sps:$4 sm:$0xff]   ;;  %v10391_v44 = vld [vmem:[%s14141_s1 + $0x13e0] ss:$72 sps:$4 sm:$0xff]  }
 0x27e   : > { %6251 = vmatpush2.bf16.msra.mxu0 %v10331_v45  ;;  %v10394_v45 = vld [vmem:[%s14141_s1 + $0x1e8] ss:$72 sps:$4 sm:$0xff]  }
 0x27f   : > { %6292 = vmatpush2.bf16.msra.mxu1 %v10334_v46  ;;  %6252 = vmatprep.subr.bf16.mxu0 %v10339_v48  ;;  %v10399_v46 = vld [vmem:[%s14141_s1 + $0x1354] ss:$72 sps:$4 sm:$0xff]  }
 0x280   : > { %6293 = vmatprep.subr.bf16.mxu1 %v10342_v4  ;;  %v10402_v48 = vld [vmem:[%s14141_s1 + $0x15c] ss:$72 sps:$4 sm:$0xff]   ;;  %v10397_v4 = vld [vmem:[%s14141_s1 + $0x1350] ss:$72 sps:$4 sm:$0xff]  }
 0x282   : > { %6253 = vmatpush2.bf16.msra.mxu0 %v10337_v49  ;;  %v10400_v49 = vld [vmem:[%s14141_s1 + $0x158] ss:$72 sps:$4 sm:$0xff]  }
 0x283   : > { %6294 = vmatpush2.bf16.msra.mxu1 %v10340_v8  ;;  %6254 = vmatprep.subr.bf16.mxu0 %v10345_v2  ;;  %v10405_v8 = vld [vmem:[%s14141_s1 + $0x12c4] ss:$72 sps:$4 sm:$0xff]  }
 0x284   : > { %6295 = vmatprep.subr.bf16.mxu1 %v10348_v56  ;;  %v10408_v2 = vld [vmem:[%s14141_s1 + $0xcc] ss:$72 sps:$4 sm:$0xff]   ;;  %v10403_v56 = vld [vmem:[%s14141_s1 + $0x12c0] ss:$72 sps:$4 sm:$0xff]  }
 0x286   : > { %6255 = vmatpush2.bf16.msra.mxu0 %v10343_v50  ;;  %v10406_v50 = vld [vmem:[%s14141_s1 + $0xc8] ss:$72 sps:$4 sm:$0xff]  }
 0x287   : > { %6296 = vmatpush2.bf16.msra.mxu1 %v10346_v52  ;;  %6256 = vmatprep.subr.bf16.mxu0 %v10351_v54  ;;  %v10411_v52 = vld [vmem:[%s14141_s1 + $0x1234] ss:$72 sps:$4 sm:$0xff]  }
 0x288   : > { %6297 = vmatprep.subr.bf16.mxu1 %v10354_v37  ;;  %v10414_v54 = vld [vmem:[%s14141_s1 + $0x3c] ss:$72 sps:$4 sm:$0xff]   ;;  %v10409_v37 = vld [vmem:[%s14141_s1 + $0x1230] ss:$72 sps:$4 sm:$0xff]  }
 0x28a   : > { %6257 = vmatpush2.bf16.msra.mxu0 %v10349_v55  ;;  %v10412_v55 = vld [vmem:[%s14141_s1 + $0x38] ss:$72 sps:$4 sm:$0xff]  }
 0x28b   : > { %6298 = vmatpush2.bf16.msra.mxu1 %v10352_v9  ;;  %6258 = vmatprep.subr.bf16.mxu0 %v10357_v57  ;;  %v10417_v9 = vld [vmem:[%s14141_s1 + $0x1aa4] ss:$72 sps:$4 sm:$0xff]  }
 0x28c   : > { %6299 = vmatprep.subr.bf16.mxu1 %v10360_v31  ;;  %v10420_v57 = vld [vmem:[%s14141_s1 + $0x8ac] ss:$72 sps:$4 sm:$0xff]   ;;  %v10415_v31 = vld [vmem:[%s14141_s1 + $0x1aa0] ss:$72 sps:$4 sm:$0xff]  }
 0x28e   : > { %6259 = vmatpush2.bf16.msra.mxu0 %v10355_v60  ;;  %v10418_v60 = vld [vmem:[%s14141_s1 + $0x8a8] ss:$72 sps:$4 sm:$0xff]  }
 0x28f   : > { %6300 = vmatpush2.bf16.msra.mxu1 %v10358_v61  ;;  %6260 = vmatprep.subr.bf16.mxu0 %v10363_v62  ;;  %v10423_v61 = vld [vmem:[%s14141_s1 + $0x1a14] ss:$72 sps:$4 sm:$0xff]  }
 0x290   : > { %6301 = vmatprep.subr.bf16.mxu1 %v10366_v0  ;;  %v10426_v62 = vld [vmem:[%s14141_s1 + $0x81c] ss:$72 sps:$4 sm:$0xff]   ;;  %v10421_v0 = vld [vmem:[%s14141_s1 + $0x1a10] ss:$72 sps:$4 sm:$0xff]  }
 0x292   : > { %6261 = vmatpush2.bf16.msra.mxu0 %v10361_v1  ;;  %v10424_v1 = vld [vmem:[%s14141_s1 + $0x818] ss:$72 sps:$4 sm:$0xff]  }
 0x293   : > { %6302 = vmatpush2.bf16.msra.mxu1 %v10364_v32  ;;  %6312 = vmatprep.subr.bf16.mxu0 %v10369_v3  ;;  %v10429_v32 = vld [vmem:[%s14141_s1 + $0x1984] ss:$72 sps:$4 sm:$0xff]  }
 0x294   : > { %6353 = vmatprep.subr.bf16.mxu1 %v10372_v10  ;;  %v10432_v3 = vld [vmem:[%s14141_s1 + $0x78c] ss:$72 sps:$4 sm:$0xff]   ;;  %v10427_v10 = vld [vmem:[%s14141_s1 + $0x1980] ss:$72 sps:$4 sm:$0xff]  }
 0x295   : > { %v13036_v18 = vpop.f32.mrf.mxu0  ;;  %6263 = vmatmul.mubr.bf16.vlgmr.msra.gmra.mxu0 %v11123_v6 }
 0x296   : > { %v13038_v19 = vpop.f32.mrf.mxu1  ;;  %6304 = vmatmul.mubr.bf16.vlgmr.msra.gmra.mxu1 %v11125_v7  ;;  %6313 = vmatpush1.bf16.msra.mxu0 %v10367_v11  ;;  %v10430_v11 = vld [vmem:[%s14141_s1 + $0x788] ss:$72 sps:$4 sm:$0xff]  }
 0x297   : > { %6354 = vmatpush1.bf16.msra.mxu1 %v10370_v13  ;;  %v13048_v25 = vpop.f32.mrf.mxu0  ;;  %6314 = vmatprep.subr.bf16.mxu0 %v10375_v15  ;;  %v10435_v13 = vld [vmem:[%s14141_s1 + $0x18f4] ss:$72 sps:$4 sm:$0xff]  }
 0x298   : > { %v13050_v26 = vpop.f32.mrf.mxu1  ;;  %6355 = vmatprep.subr.bf16.mxu1 %v10378_v5  ;;  %6344 = vmatprep.mubr.bf16.mxu0 %v11210_v34  ;;  %v10438_v15 = vld [vmem:[%s14141_s1 + $0x6fc] ss:$72 sps:$4 sm:$0xff]   ;;  %v10433_v5 = vld [vmem:[%s14141_s1 + $0x18f0] ss:$72 sps:$4 sm:$0xff]  }
 0x299   : > { %6385 = vmatprep.mubr.bf16.mxu1 %v11056_v47  ;;  %v6022_v38 = vpop.f32.mrf.mxu0 }
 0x29a   : > { %v6063_v28 = vpop.f32.mrf.mxu1  ;;  %6315 = vmatpush1.bf16.msra.mxu0 %v10373_v12  ;;  %v10436_v12 = vld [vmem:[%s14141_s1 + $0x6f8] ss:$72 sps:$4 sm:$0xff]   ;;  %v10447_v38 = vld [vmem:[%s14141_s1 + $0x17d4] ss:$72 sps:$4 sm:$0xff]  }
 0x29b   : > { %6356 = vmatpush1.bf16.msra.mxu1 %v10376_v20  ;;  %6316 = vmatprep.subr.bf16.mxu0 %v10381_v53  ;;  %v6023_v40 = vpop.f32.mrf.mxu0  ;;  %v10441_v20 = vld [vmem:[%s14141_s1 + $0x1864] ss:$72 sps:$4 sm:$0xff]   ;;  %v10442_v28 = vld [vmem:[%s14141_s1 + $0x668] ss:$72 sps:$4 sm:$0xff]  }
 0x29c   : > { %v6064_v35 = vpop.f32.mrf.mxu1  ;;  %6357 = vmatprep.subr.bf16.mxu1 %v10384_v27  ;;  %v10444_v53 = vld [vmem:[%s14141_s1 + $0x66c] ss:$72 sps:$4 sm:$0xff]   ;;  %v10439_v27 = vld [vmem:[%s14141_s1 + $0x1860] ss:$72 sps:$4 sm:$0xff]  }
 0x29d   : > { %v10448_v35 = vld [vmem:[%s14141_s1 + $0x5d8] ss:$72 sps:$4 sm:$0xff]   ;;  %v13207_v40 = vld [vmem:[%s14142_s2 + $0x8] sm:$0xff] }
 0x29e   : > { %6317 = vmatpush1.bf16.msra.mxu0 %v10379_v59  ;;  %v10450_v59 = vld [vmem:[%s14141_s1 + $0x5dc] ss:$72 sps:$4 sm:$0xff]  }
 0x29f   : > { %6358 = vmatpush1.bf16.msra.mxu1 %v10382_v33  ;;  %6318 = vmatprep.subr.bf16.mxu0 %v10387_v39  ;;  %v10445_v33 = vld [vmem:[%s14141_s1 + $0x17d0] ss:$72 sps:$4 sm:$0xff]   ;;  %v10453_v39 = vld [vmem:[%s14141_s1 + $0x1744] ss:$72 sps:$4 sm:$0xff]  }
 0x2a0   : > { %6359 = vmatprep.subr.bf16.mxu1 %v10390_v58  ;;  %v10456_v58 = vld [vmem:[%s14141_s1 + $0x54c] ss:$72 sps:$4 sm:$0xff]  }
 0x2a2   : > { %6319 = vmatpush1.bf16.msra.mxu0 %v10385_v29  ;;  %v10451_v29 = vld [vmem:[%s14141_s1 + $0x1740] ss:$72 sps:$4 sm:$0xff]  }
 0x2a3   : > { %6360 = vmatpush1.bf16.msra.mxu1 %v10388_v63  ;;  %6320 = vmatprep.subr.bf16.mxu0 %v10393_v36  ;;  %v10454_v63 = vld [vmem:[%s14141_s1 + $0x548] ss:$72 sps:$4 sm:$0xff]   ;;  %v10459_v36 = vld [vmem:[%s14141_s1 + $0x16b4] ss:$72 sps:$4 sm:$0xff]  }
 0x2a4   : > { %6361 = vmatprep.subr.bf16.mxu1 %v10396_v43  ;;  %v10462_v43 = vld [vmem:[%s14141_s1 + $0x4bc] ss:$72 sps:$4 sm:$0xff]  }
 0x2a6   : > { %6321 = vmatpush1.bf16.msra.mxu0 %v10391_v44  ;;  %v1096_v44 = vrot.slane %v13207_v40, %v11914_v41 }
 0x2a7   : > { %6362 = vmatpush1.bf16.msra.mxu1 %v10394_v45  ;;  %6322 = vmatprep.subr.bf16.mxu0 %v10399_v46  ;;  %v1100_v45 = vrot.slane %v13207_v40, %v11917_v42 }
 0x2a8   : > { %6363 = vmatprep.subr.bf16.mxu1 %v10402_v48  ;;  %v10457_v48 = vld [vmem:[%s14141_s1 + $0x16b0] ss:$72 sps:$4 sm:$0xff]  }
 0x2aa   : > { %6323 = vmatpush1.bf16.msra.mxu0 %v10397_v4  ;;  %v10460_v4 = vld [vmem:[%s14141_s1 + $0x4b8] ss:$72 sps:$4 sm:$0xff]  }
 0x2ab   : > { %6364 = vmatpush1.bf16.msra.mxu1 %v10400_v49  ;;  %6324 = vmatprep.subr.bf16.mxu0 %v10405_v8  ;;  %v10465_v49 = vld [vmem:[%s14141_s1 + $0xd2c] ss:$72 sps:$4 sm:$0xff]  }
 0x2ac   : > { %6365 = vmatprep.subr.bf16.mxu1 %v10408_v2  ;;  %v10468_v8 = vld [vmem:[%s14141_s1 + $0x162c] ss:$72 sps:$4 sm:$0xff]   ;;  %v6019_v2 = vadd.f32 %v13036_v18, %v1096_v44  ;;  %v10471_v18 = vld [vmem:[%s14141_s1 + $0xc9c] ss:$72 sps:$4 sm:$0xff]  }
 0x2ad   : > { %v10498_v44 = vld [vmem:[%s14141_s1 + $0x135c] ss:$72 sps:$4 sm:$0xff]  }
 0x2ae   : > { %6325 = vmatpush1.bf16.msra.mxu0 %v10403_v56 }
 0x2af   : > { %6366 = vmatpush1.bf16.msra.mxu1 %v10406_v50  ;;  %6326 = vmatprep.subr.bf16.mxu0 %v10411_v52  ;;  %v6021_v50 = vadd.f32 %v13048_v25, %v1100_v45  ;;  %v10474_v25 = vld [vmem:[%s14141_s1 + $0x159c] ss:$72 sps:$4 sm:$0xff]  }
 0x2b0   : > { %6367 = vmatprep.subr.bf16.mxu1 %v10414_v54  ;;  %v10463_v54 = vld [vmem:[%s14141_s1 + $0xd28] ss:$72 sps:$4 sm:$0xff]  }
 0x2b2   : > { %6327 = vmatpush1.bf16.msra.mxu0 %v10409_v37  ;;  %v10466_v37 = vld [vmem:[%s14141_s1 + $0x1628] ss:$72 sps:$4 sm:$0xff]  }
 0x2b3   : > { %6368 = vmatpush1.bf16.msra.mxu1 %v10412_v55  ;;  %6328 = vmatprep.subr.bf16.mxu0 %v10417_v9  ;;  %v6060_v55 = vadd.f32 %v13038_v19, %v6019_v2  ;;  %v10472_v19 = vld [vmem:[%s14141_s1 + $0x1598] ss:$72 sps:$4 sm:$0xff]   ;;  %v10502_v2 = vld [vmem:[%s14141_s1 + $0x12c8] ss:$72 sps:$4 sm:$0xff]  }
 0x2b4   : > { %6369 = vmatprep.subr.bf16.mxu1 %v10420_v57 }
 0x2b6   : > { %6329 = vmatpush2.bf16.msra.mxu0 %v10415_v31  ;;  %v6062_v31 = vadd.f32 %v13050_v26, %v6021_v50  ;;  %v10477_v26 = vld [vmem:[%s14141_s1 + $0xc0c] ss:$72 sps:$4 sm:$0xff]   ;;  %v10510_v50 = vld [vmem:[%s14141_s1 + $0x123c] ss:$72 sps:$4 sm:$0xff]  }
 0x2b7   : > { %6370 = vmatpush2.bf16.msra.mxu1 %v10418_v60  ;;  %6330 = vmatprep.subr.bf16.mxu0 %v10423_v61 }
 0x2b8   : > { %6371 = vmatprep.subr.bf16.mxu1 %v10426_v62  ;;  %v10469_v62 = vld [vmem:[%s14141_s1 + $0xc98] ss:$72 sps:$4 sm:$0xff]  }
 0x2ba   : > { %6331 = vmatpush2.bf16.msra.mxu0 %v10421_v0 }
 0x2bb   : > { %6372 = vmatpush2.bf16.msra.mxu1 %v10424_v1  ;;  %6332 = vmatprep.subr.bf16.mxu0 %v10429_v32 }
 0x2bc   : > { %6373 = vmatprep.subr.bf16.mxu1 %v10432_v3 }
 0x2be   : > { %6333 = vmatpush2.bf16.msra.mxu0 %v10427_v10  ;;  %v10480_v10 = vld [vmem:[%s14141_s1 + $0x150c] ss:$72 sps:$4 sm:$0xff]  }
 0x2bf   : > { %6374 = vmatpush2.bf16.msra.mxu1 %v10430_v11  ;;  %6334 = vmatprep.subr.bf16.mxu0 %v10435_v13 }
 0x2c0   : > { %6375 = vmatprep.subr.bf16.mxu1 %v10438_v15 }
 0x2c2   : > { %6335 = vmatpush2.bf16.msra.mxu0 %v10433_v5 }
 0x2c3   : > { %6376 = vmatpush2.bf16.msra.mxu1 %v10436_v12  ;;  %6336 = vmatprep.subr.bf16.mxu0 %v10441_v20  ;;  %v10475_v12 = vld [vmem:[%s14141_s1 + $0xc08] ss:$72 sps:$4 sm:$0xff]  }
 0x2c4   : > { %6377 = vmatprep.subr.bf16.mxu1 %v10444_v53  ;;  %v10478_v20 = vld [vmem:[%s14141_s1 + $0x1508] ss:$72 sps:$4 sm:$0xff]   ;;  %v10483_v53 = vld [vmem:[%s14141_s1 + $0xb7c] ss:$72 sps:$4 sm:$0xff]  }
 0x2c6   : > { %6337 = vmatpush2.bf16.msra.mxu0 %v10439_v27 }
 0x2c7   : > { %6378 = vmatpush2.bf16.msra.mxu1 %v10442_v28  ;;  %6338 = vmatprep.subr.bf16.mxu0 %v10447_v38  ;;  %v10486_v38 = vld [vmem:[%s14141_s1 + $0x147c] ss:$72 sps:$4 sm:$0xff]  }
 0x2c8   : > { %6379 = vmatprep.subr.bf16.mxu1 %v10450_v59 }
 0x2ca   : > { %6339 = vmatpush2.bf16.msra.mxu0 %v10445_v33  ;;  %v10481_v33 = vld [vmem:[%s14141_s1 + $0xb78] ss:$72 sps:$4 sm:$0xff]  }
 0x2cb   : > { %6380 = vmatpush2.bf16.msra.mxu1 %v10448_v35  ;;  %6340 = vmatprep.subr.bf16.mxu0 %v10453_v39  ;;  %v10484_v35 = vld [vmem:[%s14141_s1 + $0x1478] ss:$72 sps:$4 sm:$0xff]   ;;  %v10489_v39 = vld [vmem:[%s14141_s1 + $0xaec] ss:$72 sps:$4 sm:$0xff]  }
 0x2cc   : > { %6381 = vmatprep.subr.bf16.mxu1 %v10456_v58  ;;  %v10492_v58 = vld [vmem:[%s14141_s1 + $0x13ec] ss:$72 sps:$4 sm:$0xff]  }
 0x2ce   : > { %6341 = vmatpush2.bf16.msra.mxu0 %v10451_v29  ;;  %v6683_v46 = vpop.permute.xlu0 %6682 }
 0x2cf   : > { %6382 = vmatpush2.bf16.msra.mxu1 %v10454_v63  ;;  %6686 = vst.msk [vmem:[#allocation2 + $0x34] sm:$0xf] %vm6617_vm0, %v6683_v46  ;;  %6342 = vmatprep.subr.bf16.mxu0 %v10459_v36  ;;  %v10487_v63 = vld [vmem:[%s14141_s1 + $0xae8] ss:$72 sps:$4 sm:$0xff]   ;;  %v10493_v46 = vld [vmem:[%s14141_s1 + $0xa58] ss:$72 sps:$4 sm:$0xff]  }
 0x2d0   : > { %6383 = vmatprep.subr.bf16.mxu1 %v10462_v43  ;;  %v6693_v56 = vpop.permute.xlu1 %6692  ;;  %v10490_v36 = vld [vmem:[%s14141_s1 + $0x13e8] ss:$72 sps:$4 sm:$0xff]   ;;  %v10495_v43 = vld [vmem:[%s14141_s1 + $0xa5c] ss:$72 sps:$4 sm:$0xff]  }
 0x2d1   : > { %6696 = vst.msk [vmem:[#allocation2 + $0x3c] sm:$0xf] %vm6617_vm0, %v6693_v56  ;;  %v10507_v56 = vld [vmem:[%s14141_s1 + $0x93c] ss:$72 sps:$4 sm:$0xff]  }
 0x2d2   : > { %6343 = vmatpush2.bf16.msra.mxu0 %v10457_v48  ;;  %v6623_v52 = vpop.permute.xlu0 %6622  ;;  %v10496_v48 = vld [vmem:[%s14141_s1 + $0x1358] ss:$72 sps:$4 sm:$0xff]  }
 0x2d3   : > { %6384 = vmatpush2.bf16.msra.mxu1 %v10460_v4  ;;  %6626 = vst.msk [vmem:[#allocation2 + $0x4] sm:$0xf] %vm6617_vm0, %v6623_v52  ;;  %6394 = vmatprep.subr.bf16.mxu0 %v10465_v49  ;;  %v10501_v4 = vld [vmem:[%s14141_s1 + $0x9cc] ss:$72 sps:$4 sm:$0xff]   ;;  %v10505_v52 = vld [vmem:[%s14141_s1 + $0x938] ss:$72 sps:$4 sm:$0xff]  }
 0x2d4   : > { %6435 = vmatprep.subr.bf16.mxu1 %v10468_v8  ;;  %v6633_v9 = vpop.permute.xlu1 %6632  ;;  %v10504_v49 = vld [vmem:[%s14141_s1 + $0x12cc] ss:$72 sps:$4 sm:$0xff]   ;;  %v10499_v8 = vld [vmem:[%s14141_s1 + $0x9c8] ss:$72 sps:$4 sm:$0xff]  }
 0x2d5   : > { %v6100_v57 = vpop.f32.mrf.mxu0  ;;  %6345 = vmatmul.mubr.bf16.vlgmr.msra.gmra.mxu0 %v11332_v14  ;;  %6636 = vst.msk [vmem:[#allocation2 + $0xc] sm:$0xf] %vm6617_vm0, %v6633_v9  ;;  %v10519_v9 = vld [vmem:[%s14141_s1 + $0x111c] ss:$72 sps:$4 sm:$0xff]  }
 0x2d6   : > { %6386 = vmatmul.mubr.bf16.vlgmr.msra.gmra.mxu1 %v11123_v6  ;;  %v6101_v60 = vadd.f32 %v6100_v57, %v6060_v55  ;;  %v13259_v61 = vpop.f32.mrf.mxu1  ;;  %6395 = vmatpush1.bf16.msra.mxu0 %v10463_v54  ;;  %v10508_v54 = vld [vmem:[%s14141_s1 + $0x1238] ss:$72 sps:$4 sm:$0xff]   ;;  %v10514_v55 = vld [vmem:[%s14141_s1 + $0x1aa8] ss:$72 sps:$4 sm:$0xff]   ;;  %v10522_v57 = vld [vmem:[%s14141_s1 + $0x1a1c] ss:$72 sps:$4 sm:$0xff]  }
 0x2d7   : > { %6436 = vmatpush1.bf16.msra.mxu1 %v10466_v37  ;;  %v6102_v0 = vpop.f32.mrf.mxu0  ;;  %6396 = vmatprep.subr.bf16.mxu0 %v10471_v18  ;;  %v10513_v37 = vld [vmem:[%s14141_s1 + $0x11ac] ss:$72 sps:$4 sm:$0xff]  }
 0x2d8   : > { %6437 = vmatprep.subr.bf16.mxu1 %v10474_v25  ;;  %v6607_v1 = vpack.c.bf16 %v6101_v60, %v6101_v60  ;;  %v6103_v32 = vadd.f32 %v6102_v0, %v6062_v31  ;;  %v13270_v3 = vpop.f32.mrf.mxu1  ;;  %6426 = vmatprep.mubr.bf16.mxu0 %v11065_v51  ;;  %v6643_v11 = vpop.permute.xlu1 %6642  ;;  %v10516_v18 = vld [vmem:[%s14141_s1 + $0x1aac] ss:$72 sps:$4 sm:$0xff]   ;;  %v10511_v25 = vld [vmem:[%s14141_s1 + $0x11a8] ss:$72 sps:$4 sm:$0xff]   ;;  %v10517_v31 = vld [vmem:[%s14141_s1 + $0x1118] ss:$72 sps:$4 sm:$0xff]  }
 0x2d9   : > { %6467 = vmatprep.mubr.bf16.mxu1 %v11210_v34  ;;  %v6104_v13 = vpop.f32.mrf.mxu0  ;;  %6646 = vst.msk [vmem:[#allocation2 + $0x14] sm:$0xf] %vm6617_vm0, %v6643_v11  ;;  %v10520_v60 = vld [vmem:[%s14141_s1 + $0x1a18] ss:$72 sps:$4 sm:$0xff]   ;;  %v10523_v0 = vld [vmem:[%s14141_s1 + $0x1088] ss:$72 sps:$4 sm:$0xff]  }
 0x2da   : > { %6698 = vst.msk [vmem:[#allocation2 + $0x40] sm:$0xf] %vm6617_vm0, %v6607_v1  ;;  %v6608_v15 = vpack.c.bf16 %v6103_v32, %v6103_v32  ;;  %v6145_v5 = vpop.f32.mrf.mxu1  ;;  %6397 = vmatpush1.bf16.msra.mxu0 %v10469_v62  ;;  %6702 = vrot.lane.b32.xlu0 %v6607_v1, %s10831_s28  ;;  %v10525_v62 = vld [vmem:[%s14141_s1 + $0x108c] ss:$72 sps:$4 sm:$0xff]   ;;  %v10531_v1 = vld [vmem:[%s14141_s1 + $0xffc] ss:$72 sps:$4 sm:$0xff]  }
 0x2db   : > { %6438 = vmatpush1.bf16.msra.mxu1 %v10472_v19  ;;  %6398 = vmatprep.subr.bf16.mxu0 %v10477_v26  ;;  %v6105_v27 = vpop.f32.mrf.mxu0  ;;  %v10528_v19 = vld [vmem:[%s14141_s1 + $0x198c] ss:$72 sps:$4 sm:$0xff]   ;;  %v10526_v26 = vld [vmem:[%s14141_s1 + $0x1988] ss:$72 sps:$4 sm:$0xff]   ;;  %v10534_v32 = vld [vmem:[%s14141_s1 + $0x18fc] ss:$72 sps:$4 sm:$0xff]  }
 0x2dc   : > { %6708 = vst.msk [vmem:[#allocation2 + $0x48] sm:$0xf] %vm6617_vm0, %v6608_v15  ;;  %v6146_v28 = vpop.f32.mrf.mxu1  ;;  %6439 = vmatprep.subr.bf16.mxu1 %v10480_v10  ;;  %v6653_v59 = vpop.permute.xlu1 %6652  ;;  %v10529_v10 = vld [vmem:[%s14141_s1 + $0xff8] ss:$72 sps:$4 sm:$0xff]   ;;  %v10537_v13 = vld [vmem:[%s14141_s1 + $0xf6c] ss:$72 sps:$4 sm:$0xff]  }
 0x2dd   : > { %6656 = vst.msk [vmem:[#allocation2 + $0x1c] sm:$0xf] %vm6617_vm0, %v6653_v59  ;;  %v10532_v11 = vld [vmem:[%s14141_s1 + $0x18f8] ss:$72 sps:$4 sm:$0xff]   ;;  %v10535_v5 = vld [vmem:[%s14141_s1 + $0xf68] ss:$72 sps:$4 sm:$0xff]  }
 0x2de   : > { %6399 = vmatpush1.bf16.msra.mxu0 %v10475_v12  ;;  %6712 = vrot.lane.b32.xlu0 %v6608_v15, %s10831_s28  ;;  %v10540_v15 = vld [vmem:[%s14141_s1 + $0x186c] ss:$72 sps:$4 sm:$0xff]   ;;  %v10538_v12 = vld [vmem:[%s14141_s1 + $0x1868] ss:$72 sps:$4 sm:$0xff]   ;;  %v10541_v27 = vld [vmem:[%s14141_s1 + $0xed8] ss:$72 sps:$4 sm:$0xff]  }
 0x2df   : > { %6440 = vmatpush1.bf16.msra.mxu1 %v10478_v20  ;;  %6400 = vmatprep.subr.bf16.mxu0 %v10483_v53  ;;  %v10543_v20 = vld [vmem:[%s14141_s1 + $0xedc] ss:$72 sps:$4 sm:$0xff]   ;;  %v10544_v28 = vld [vmem:[%s14141_s1 + $0x17d8] ss:$72 sps:$4 sm:$0xff]   ;;  %v10552_v59 = vld [vmem:[%s14141_s1 + $0x174c] ss:$72 sps:$4 sm:$0xff]  }
 0x2e0   : > { %6441 = vmatprep.subr.bf16.mxu1 %v10486_v38  ;;  %v6663_v29 = vpop.permute.xlu1 %6662  ;;  %v10546_v53 = vld [vmem:[%s14141_s1 + $0x17dc] ss:$72 sps:$4 sm:$0xff]   ;;  %v10549_v38 = vld [vmem:[%s14141_s1 + $0xe4c] ss:$72 sps:$4 sm:$0xff]  }
 0x2e1   : > { %6666 = vst.msk [vmem:[#allocation2 + $0x24] sm:$0xf] %vm6617_vm0, %v6663_v29  ;;  %v10553_v29 = vld [vmem:[%s14141_s1 + $0xdb8] ss:$72 sps:$4 sm:$0xff]  }
 0x2e2   : > { %6401 = vmatpush1.bf16.msra.mxu0 %v10481_v33  ;;  %v10547_v33 = vld [vmem:[%s14141_s1 + $0xe48] ss:$72 sps:$4 sm:$0xff]  }
 0x2e3   : > { %6442 = vmatpush1.bf16.msra.mxu1 %v10484_v35  ;;  %6402 = vmatprep.subr.bf16.mxu0 %v10489_v39  ;;  %v10550_v35 = vld [vmem:[%s14141_s1 + $0x1748] ss:$72 sps:$4 sm:$0xff]   ;;  %v10555_v39 = vld [vmem:[%s14141_s1 + $0xdbc] ss:$72 sps:$4 sm:$0xff]  }
 0x2e4   : > { %6443 = vmatprep.subr.bf16.mxu1 %v10492_v58  ;;  %v6673_v45 = vpop.permute.xlu1 %6672  ;;  %v10558_v58 = vld [vmem:[%s14141_s1 + $0x16bc] ss:$72 sps:$4 sm:$0xff]  }
 0x2e5   : > { %6676 = vst.msk [vmem:[#allocation2 + $0x2c] sm:$0xf] %vm6617_vm0, %v6673_v45  ;;  %v1108_v45 = vrot.slane %v13207_v40, %v1075_v17  ;;  %v10570_v17 = vld [vmem:[%s14141_s1 + $0xca4] ss:$72 sps:$4 sm:$0xff]  }
 0x2e6   : > { %6403 = vmatpush1.bf16.msra.mxu0 %v10487_v63  ;;  %v10556_v63 = vld [vmem:[%s14141_s1 + $0x16b8] ss:$72 sps:$4 sm:$0xff]  }
 0x2e7   : > { %6444 = vmatpush1.bf16.msra.mxu1 %v10490_v36  ;;  %6404 = vmatprep.subr.bf16.mxu0 %v10495_v43  ;;  %v10561_v36 = vld [vmem:[%s14141_s1 + $0x434] ss:$72 sps:$4 sm:$0xff]  }
 0x2e8   : > { %6445 = vmatprep.subr.bf16.mxu1 %v10498_v44  ;;  %v10564_v43 = vld [vmem:[%s14141_s1 + $0xd34] ss:$72 sps:$4 sm:$0xff]   ;;  %v1104_v44 = vrot.slane %v13207_v40, %v1071_v16  ;;  %v10567_v16 = vld [vmem:[%s14141_s1 + $0x3a4] ss:$72 sps:$4 sm:$0xff]  }
 0x2ea   : > { %6405 = vmatpush1.bf16.msra.mxu0 %v10493_v46  ;;  %v10559_v46 = vld [vmem:[%s14141_s1 + $0x430] ss:$72 sps:$4 sm:$0xff]  }
 0x2eb   : > { %6446 = vmatpush1.bf16.msra.mxu1 %v10496_v48  ;;  %6406 = vmatprep.subr.bf16.mxu0 %v10501_v4  ;;  %v10562_v48 = vld [vmem:[%s14141_s1 + $0xd30] ss:$72 sps:$4 sm:$0xff]   ;;  %v6142_v4 = vadd.f32 %v13259_v61, %v1104_v44  ;;  %v10615_v44 = vld [vmem:[%s14141_s1 + $0x824] ss:$72 sps:$4 sm:$0xff]  }
 0x2ec   : > { %6447 = vmatprep.subr.bf16.mxu1 %v10504_v49 }
 0x2ee   : > { %6407 = vmatpush1.bf16.msra.mxu0 %v10499_v8 }
 0x2ef   : > { %6448 = vmatpush1.bf16.msra.mxu1 %v10502_v2  ;;  %6408 = vmatprep.subr.bf16.mxu0 %v10507_v56  ;;  %v6144_v2 = vadd.f32 %v13270_v3, %v1108_v45  ;;  %v10576_v3 = vld [vmem:[%s14141_s1 + $0xc14] ss:$72 sps:$4 sm:$0xff]   ;;  %v10618_v45 = vld [vmem:[%s14141_s1 + $0x1124] ss:$72 sps:$4 sm:$0xff]  }
 0x2f0   : > { %6449 = vmatprep.subr.bf16.mxu1 %v10510_v50  ;;  %v10565_v50 = vld [vmem:[%s14141_s1 + $0x3a0] ss:$72 sps:$4 sm:$0xff]  }
 0x2f2   : > { %6409 = vmatpush1.bf16.msra.mxu0 %v10505_v52  ;;  %v10568_v52 = vld [vmem:[%s14141_s1 + $0xca0] ss:$72 sps:$4 sm:$0xff]  }
 0x2f3   : > { %6450 = vmatpush1.bf16.msra.mxu1 %v10508_v54  ;;  %6410 = vmatprep.subr.bf16.mxu0 %v10513_v37  ;;  %v10573_v37 = vld [vmem:[%s14141_s1 + $0x314] ss:$72 sps:$4 sm:$0xff]  }
 0x2f4   : > { %6451 = vmatprep.subr.bf16.mxu1 %v10516_v18 }
 0x2f6   : > { %6411 = vmatpush2.bf16.msra.mxu0 %v10511_v25 }
 0x2f7   : > { %6452 = vmatpush2.bf16.msra.mxu1 %v10514_v55  ;;  %6412 = vmatprep.subr.bf16.mxu0 %v10519_v9 }
 0x2f8   : > { %6453 = vmatprep.subr.bf16.mxu1 %v10522_v57 }
 0x2fa   : > { %6413 = vmatpush2.bf16.msra.mxu0 %v10517_v31 }
 0x2fb   : > { %6454 = vmatpush2.bf16.msra.mxu1 %v10520_v60  ;;  %6414 = vmatprep.subr.bf16.mxu0 %v10525_v62  ;;  %v10571_v60 = vld [vmem:[%s14141_s1 + $0x310] ss:$72 sps:$4 sm:$0xff]  }
 0x2fc   : > { %6455 = vmatprep.subr.bf16.mxu1 %v10528_v19  ;;  %v10574_v62 = vld [vmem:[%s14141_s1 + $0xc10] ss:$72 sps:$4 sm:$0xff]  }
 0x2fe   : > { %6415 = vmatpush2.bf16.msra.mxu0 %v10523_v0 }
 0x2ff   : > { %6456 = vmatpush2.bf16.msra.mxu1 %v10526_v26  ;;  %6416 = vmatprep.subr.bf16.mxu0 %v10531_v1  ;;  %v10577_v1 = vld [vmem:[%s14141_s1 + $0x280] ss:$72 sps:$4 sm:$0xff]  }
 0x300   : > { %6457 = vmatprep.subr.bf16.mxu1 %v10534_v32  ;;  %v10580_v32 = vld [vmem:[%s14141_s1 + $0xb80] ss:$72 sps:$4 sm:$0xff]  }
 0x302   : > { %6417 = vmatpush2.bf16.msra.mxu0 %v10529_v10  ;;  %v10585_v10 = vld [vmem:[%s14141_s1 + $0x1f4] ss:$72 sps:$4 sm:$0xff]  }
 0x303   : > { %6458 = vmatpush2.bf16.msra.mxu1 %v10532_v11  ;;  %6418 = vmatprep.subr.bf16.mxu0 %v10537_v13  ;;  %v10588_v11 = vld [vmem:[%s14141_s1 + $0xaf4] ss:$72 sps:$4 sm:$0xff]   ;;  %v10583_v13 = vld [vmem:[%s14141_s1 + $0x1f0] ss:$72 sps:$4 sm:$0xff]  }
 0x304   : > { %6459 = vmatprep.subr.bf16.mxu1 %v10540_v15  ;;  %v10586_v15 = vld [vmem:[%s14141_s1 + $0xaf0] ss:$72 sps:$4 sm:$0xff]  }
 0x306   : > { %6419 = vmatpush2.bf16.msra.mxu0 %v10535_v5  ;;  %v10591_v5 = vld [vmem:[%s14141_s1 + $0x164] ss:$72 sps:$4 sm:$0xff]  }
 0x307   : > { %6460 = vmatpush2.bf16.msra.mxu1 %v10538_v12  ;;  %6420 = vmatprep.subr.bf16.mxu0 %v10543_v20  ;;  %v10594_v12 = vld [vmem:[%s14141_s1 + $0xa64] ss:$72 sps:$4 sm:$0xff]   ;;  %v10589_v20 = vld [vmem:[%s14141_s1 + $0x160] ss:$72 sps:$4 sm:$0xff]  }
 0x308   : > { %6461 = vmatprep.subr.bf16.mxu1 %v10546_v53  ;;  %v10592_v53 = vld [vmem:[%s14141_s1 + $0xa60] ss:$72 sps:$4 sm:$0xff]  }
 0x30a   : > { %6421 = vmatpush2.bf16.msra.mxu0 %v10541_v27  ;;  %v10597_v27 = vld [vmem:[%s14141_s1 + $0xd4] ss:$72 sps:$4 sm:$0xff]  }
 0x30b   : > { %6462 = vmatpush2.bf16.msra.mxu1 %v10544_v28  ;;  %6422 = vmatprep.subr.bf16.mxu0 %v10549_v38  ;;  %v10600_v28 = vld [vmem:[%s14141_s1 + $0x9d4] ss:$72 sps:$4 sm:$0xff]   ;;  %v10595_v38 = vld [vmem:[%s14141_s1 + $0xd0] ss:$72 sps:$4 sm:$0xff]  }
 0x30c   : > { %6463 = vmatprep.subr.bf16.mxu1 %v10552_v59  ;;  %v10598_v59 = vld [vmem:[%s14141_s1 + $0x9d0] ss:$72 sps:$4 sm:$0xff]  }
 0x30e   : > { %6423 = vmatpush2.bf16.msra.mxu0 %v10547_v33  ;;  %v10603_v33 = vld [vmem:[%s14141_s1 + $0x44] ss:$72 sps:$4 sm:$0xff]  }
 0x30f   : > { %6464 = vmatpush2.bf16.msra.mxu1 %v10550_v35  ;;  %6424 = vmatprep.subr.bf16.mxu0 %v10555_v39  ;;  %v10606_v35 = vld [vmem:[%s14141_s1 + $0x944] ss:$72 sps:$4 sm:$0xff]   ;;  %v10601_v39 = vld [vmem:[%s14141_s1 + $0x40] ss:$72 sps:$4 sm:$0xff]  }
 0x310   : > { %6465 = vmatprep.subr.bf16.mxu1 %v10558_v58  ;;  %v10604_v58 = vld [vmem:[%s14141_s1 + $0x940] ss:$72 sps:$4 sm:$0xff]  }
 0x312   : > { %6425 = vmatpush2.bf16.msra.mxu0 %v10553_v29  ;;  %v10609_v29 = vld [vmem:[%s14141_s1 + $0x8b4] ss:$72 sps:$4 sm:$0xff]  }
 0x313   : > { %6466 = vmatpush2.bf16.msra.mxu1 %v10556_v63  ;;  %6476 = vmatprep.subr.bf16.mxu0 %v10561_v36  ;;  %v10612_v63 = vld [vmem:[%s14141_s1 + $0x11b4] ss:$72 sps:$4 sm:$0xff]   ;;  %v10607_v36 = vld [vmem:[%s14141_s1 + $0x8b0] ss:$72 sps:$4 sm:$0xff]  }
 0x314   : > { %6517 = vmatprep.subr.bf16.mxu1 %v10564_v43  ;;  %v10610_v43 = vld [vmem:[%s14141_s1 + $0x11b0] ss:$72 sps:$4 sm:$0xff]  }
 0x315   : > { %v6182_v49 = vpop.f32.mrf.mxu0  ;;  %6427 = vmatmul.mubr.bf16.vlgmr.msra.gmra.mxu0 %v11125_v7 }
 0x316   : > { %v6223_v8 = vpop.f32.mrf.mxu1  ;;  %6468 = vmatmul.mubr.bf16.vlgmr.msra.gmra.mxu1 %v11332_v14  ;;  %v6183_v56 = vadd.f32 %v6182_v49, %v6142_v4  ;;  %6477 = vmatpush1.bf16.msra.mxu0 %v10559_v46  ;;  %v10613_v46 = vld [vmem:[%s14141_s1 + $0x820] ss:$72 sps:$4 sm:$0xff]   ;;  %v10619_v4 = vld [vmem:[%s14141_s1 + $0x790] ss:$72 sps:$4 sm:$0xff]  }
 0x317   : > { %6518 = vmatpush1.bf16.msra.mxu1 %v10562_v48  ;;  %v6184_v61 = vpop.f32.mrf.mxu0  ;;  %6478 = vmatprep.subr.bf16.mxu0 %v10567_v16  ;;  %v10616_v48 = vld [vmem:[%s14141_s1 + $0x1120] ss:$72 sps:$4 sm:$0xff]   ;;  %v10621_v16 = vld [vmem:[%s14141_s1 + $0x794] ss:$72 sps:$4 sm:$0xff]   ;;  %v10622_v49 = vld [vmem:[%s14141_s1 + $0x1090] ss:$72 sps:$4 sm:$0xff]  }
 0x318   : > { %v6225_v54 = vpop.f32.mrf.mxu1  ;;  %6519 = vmatprep.subr.bf16.mxu1 %v10570_v17  ;;  %v6224_v18 = vadd.f32 %v6223_v8, %v6183_v56  ;;  %v6185_v25 = vadd.f32 %v6184_v61, %v6144_v2  ;;  %6508 = vmatprep.mubr.bf16.mxu0 %v11056_v47  ;;  %v10579_v47 = vld [vmem:[%s14141_s1 + $0x284] ss:$72 sps:$4 sm:$0xff]   ;;  %v10624_v17 = vld [vmem:[%s14141_s1 + $0x1094] ss:$72 sps:$4 sm:$0xff]   ;;  %v10625_v56 = vld [vmem:[%s14141_s1 + $0x700] ss:$72 sps:$4 sm:$0xff]  }
 0x319   : > { %6549 = vmatprep.mubr.bf16.mxu1 %v11065_v51  ;;  %v6186_v9 = vpop.f32.mrf.mxu0  ;;  %v10582_v51 = vld [vmem:[%s14141_s1 + $0xb84] ss:$72 sps:$4 sm:$0xff]   ;;  %v10636_v61 = vld [vmem:[%s14141_s1 + $0xf74] ss:$72 sps:$4 sm:$0xff]  }
 0x31a   : > { %v6227_v55 = vpop.f32.mrf.mxu1  ;;  %v6609_v57 = vpack.c.bf16 %v6224_v18, %v6224_v18  ;;  %v6226_v31 = vadd.f32 %v6225_v54, %v6185_v25  ;;  %6479 = vmatpush1.bf16.msra.mxu0 %v10565_v50  ;;  %v10627_v8 = vld [vmem:[%s14141_s1 + $0x704] ss:$72 sps:$4 sm:$0xff]   ;;  %v10628_v50 = vld [vmem:[%s14141_s1 + $0x1000] ss:$72 sps:$4 sm:$0xff]   ;;  %v10631_v54 = vld [vmem:[%s14141_s1 + $0x670] ss:$72 sps:$4 sm:$0xff]  }
 0x31b   : > { %6520 = vmatpush1.bf16.msra.mxu1 %v10568_v52  ;;  %6480 = vmatprep.subr.bf16.mxu0 %v10573_v37  ;;  %v6187_v0 = vpop.f32.mrf.mxu0  ;;  %v10630_v2 = vld [vmem:[%s14141_s1 + $0x1004] ss:$72 sps:$4 sm:$0xff]   ;;  %v10633_v52 = vld [vmem:[%s14141_s1 + $0x674] ss:$72 sps:$4 sm:$0xff]   ;;  %v10634_v37 = vld [vmem:[%s14141_s1 + $0xf70] ss:$72 sps:$4 sm:$0xff]  }
 0x31c   : > { %v6228_v19 = vpop.f32.mrf.mxu1  ;;  %6521 = vmatprep.subr.bf16.mxu1 %v10576_v3  ;;  %6718 = vst.msk [vmem:[#allocation2 + $0x50] sm:$0xf] %vm6617_vm0, %v6609_v57  ;;  %v6610_v26 = vpack.c.bf16 %v6226_v31, %v6226_v31  ;;  %6722 = vrot.lane.b32.xlu0 %v6609_v57, %s10831_s28  ;;  %v10639_v3 = vld [vmem:[%s14141_s1 + $0x5e4] ss:$72 sps:$4 sm:$0xff]   ;;  %v10637_v25 = vld [vmem:[%s14141_s1 + $0x5e0] ss:$72 sps:$4 sm:$0xff]  }
 0x31d   : > { %v10642_v18 = vld [vmem:[%s14141_s1 + $0xee4] ss:$72 sps:$4 sm:$0xff]   ;;  %v10640_v55 = vld [vmem:[%s14141_s1 + $0xee0] ss:$72 sps:$4 sm:$0xff]   ;;  %v10645_v9 = vld [vmem:[%s14141_s1 + $0x554] ss:$72 sps:$4 sm:$0xff]  }
 0x31e   : > { %6728 = vst.msk [vmem:[#allocation2 + $0x58] sm:$0xf] %vm6617_vm0, %v6610_v26  ;;  %6481 = vmatpush1.bf16.msra.mxu0 %v10571_v60  ;;  %v10648_v57 = vld [vmem:[%s14141_s1 + $0xe54] ss:$72 sps:$4 sm:$0xff]   ;;  %v10643_v31 = vld [vmem:[%s14141_s1 + $0x550] ss:$72 sps:$4 sm:$0xff]  }
 0x31f   : > { %6522 = vmatpush1.bf16.msra.mxu1 %v10574_v62  ;;  %6482 = vmatprep.subr.bf16.mxu0 %v10579_v47  ;;  %v10646_v60 = vld [vmem:[%s14141_s1 + $0xe50] ss:$72 sps:$4 sm:$0xff]   ;;  %v10651_v62 = vld [vmem:[%s14141_s1 + $0x4c4] ss:$72 sps:$4 sm:$0xff]   ;;  %v10652_v0 = vld [vmem:[%s14141_s1 + $0xdc0] ss:$72 sps:$4 sm:$0xff]  }
 0x320   : > { %6523 = vmatprep.subr.bf16.mxu1 %v10582_v51  ;;  %6732 = vrot.lane.b32.xlu0 %v6610_v26, %s10831_s28  ;;  %v10654_v19 = vld [vmem:[%s14141_s1 + $0xdc4] ss:$72 sps:$4 sm:$0xff]   ;;  %v10649_v51 = vld [vmem:[%s14141_s1 + $0x4c0] ss:$72 sps:$4 sm:$0xff]   ;;  %v10657_v26 = vld [vmem:[%s14141_s1 + $0x1634] ss:$72 sps:$4 sm:$0xff]  }
 0x322   : > { %6483 = vmatpush1.bf16.msra.mxu0 %v10577_v1 }
 0x323   : > { %6524 = vmatpush1.bf16.msra.mxu1 %v10580_v32  ;;  %6484 = vmatprep.subr.bf16.mxu0 %v10585_v10  ;;  %v10655_v32 = vld [vmem:[%s14141_s1 + $0x1630] ss:$72 sps:$4 sm:$0xff]  }
 0x324   : > { %6525 = vmatprep.subr.bf16.mxu1 %v10588_v11  ;;  %v6810_v10 = vld [vmem:[#allocation2 + $0x30] sm:$0xf]  ;;  %v10832_v11 = vmov 0.0  }
 0x326   : > { %6485 = vmatpush1.bf16.msra.mxu0 %v10583_v13  ;;  %v10660_v13 = vld [vmem:[%s14141_s1 + $0x15a4] ss:$72 sps:$4 sm:$0xff]  }
 0x327   : > { %6526 = vmatpush1.bf16.msra.mxu1 %v10586_v15  ;;  %6486 = vmatprep.subr.bf16.mxu0 %v10591_v5 }
 0x328   : > { %6527 = vmatprep.subr.bf16.mxu1 %v10594_v12  ;;  %v6840_v12 = vsel %vm6835_vm1, %v6810_v10, 0  ;;  %v10699_v10 = vld [vmem:[%s14141_s1 + $0x1754] ss:$72 sps:$4 sm:$0xff]  }
 0x32a   : > { %6487 = vmatpush1.bf16.msra.mxu0 %v10589_v20  ;;  %v10658_v20 = vld [vmem:[%s14141_s1 + $0x15a0] ss:$72 sps:$4 sm:$0xff]  }
 0x32b   : > { %6528 = vmatpush1.bf16.msra.mxu1 %v10592_v53  ;;  %6488 = vmatprep.subr.bf16.mxu0 %v10597_v27 }
 0x32c   : > { %6529 = vmatprep.subr.bf16.mxu1 %v10600_v28 }
 0x32e   : > { %6489 = vmatpush1.bf16.msra.mxu0 %v10595_v38  ;;  %v10661_v38 = vld [vmem:[%s14141_s1 + $0x1510] ss:$72 sps:$4 sm:$0xff]  }
 0x32f   : > { %6530 = vmatpush1.bf16.msra.mxu1 %v10598_v59  ;;  %6490 = vmatprep.subr.bf16.mxu0 %v10603_v33  ;;  %v6811_v59 = vld [vmem:[#allocation2 + $0x34] sm:$0xf] }
 0x330   : > { %6531 = vmatprep.subr.bf16.mxu1 %v10606_v35  ;;  %v10666_v35 = vld [vmem:[%s14141_s1 + $0x1484] ss:$72 sps:$4 sm:$0xff]  }
 0x332   : > { %6491 = vmatpush1.bf16.msra.mxu0 %v10601_v39 }
 0x333   : > { %6532 = vmatpush1.bf16.msra.mxu1 %v10604_v58  ;;  %6492 = vmatprep.subr.bf16.mxu0 %v10609_v29  ;;  %v6797_v58 = vld [vmem:[#allocation2] sm:$0xf] }
 0x334   : > { %6533 = vmatprep.subr.bf16.mxu1 %v10612_v63  ;;  %v10664_v29 = vld [vmem:[%s14141_s1 + $0x1480] ss:$72 sps:$4 sm:$0xff]   ;;  %v10669_v63 = vld [vmem:[%s14141_s1 + $0x13f4] ss:$72 sps:$4 sm:$0xff]  }
 0x336   : > { %6493 = vmatpush2.bf16.msra.mxu0 %v10607_v36  ;;  %v10667_v36 = vld [vmem:[%s14141_s1 + $0x13f0] ss:$72 sps:$4 sm:$0xff]  }
 0x337   : > { %6534 = vmatpush2.bf16.msra.mxu1 %v10610_v43  ;;  %6494 = vmatprep.subr.bf16.mxu0 %v10615_v44  ;;  %v6812_v43 = vld [vmem:[#allocation2 + $0x38] sm:$0xf]  ;;  %v10672_v44 = vld [vmem:[%s14141_s1 + $0x1364] ss:$72 sps:$4 sm:$0xff]  }
 0x338   : > { %6535 = vmatprep.subr.bf16.mxu1 %v10618_v45  ;;  %v6798_v45 = vld [vmem:[#allocation2 + $0x4] sm:$0xf] }
 0x33a   : > { %6495 = vmatpush2.bf16.msra.mxu0 %v10613_v46  ;;  %v6932_v46 = vsel %vm6835_vm1, %v6812_v43, 0 }
 0x33b   : > { %6536 = vmatpush2.bf16.msra.mxu1 %v10616_v48  ;;  %6496 = vmatprep.subr.bf16.mxu0 %v10621_v16  ;;  %v10670_v48 = vld [vmem:[%s14141_s1 + $0x1360] ss:$72 sps:$4 sm:$0xff]   ;;  %v10675_v16 = vld [vmem:[%s14141_s1 + $0x12d4] ss:$72 sps:$4 sm:$0xff]  }
 0x33c   : > { %6537 = vmatprep.subr.bf16.mxu1 %v10624_v17  ;;  %v10673_v17 = vld [vmem:[%s14141_s1 + $0x12d0] ss:$72 sps:$4 sm:$0xff]  }
 0x33e   : > { %6497 = vmatpush2.bf16.msra.mxu0 %v10619_v4  ;;  %v6813_v4 = vld [vmem:[#allocation2 + $0x3c] sm:$0xf] }
 0x33f   : > { %6538 = vmatpush2.bf16.msra.mxu1 %v10622_v49  ;;  %6498 = vmatprep.subr.bf16.mxu0 %v10627_v8  ;;  %v10678_v49 = vld [vmem:[%s14141_s1 + $0x1244] ss:$72 sps:$4 sm:$0xff]   ;;  %v6799_v8 = vld [vmem:[#allocation2 + $0x8] sm:$0xf] }
 0x340   : > { %6539 = vmatprep.subr.bf16.mxu1 %v10630_v2  ;;  %v6978_v2 = vsel %vm6835_vm1, %v6813_v4, 0 }
 0x342   : > { %6499 = vmatpush2.bf16.msra.mxu0 %v10625_v56  ;;  %v10676_v56 = vld [vmem:[%s14141_s1 + $0x1240] ss:$72 sps:$4 sm:$0xff]  }
 0x343   : > { %6540 = vmatpush2.bf16.msra.mxu1 %v10628_v50  ;;  %6500 = vmatprep.subr.bf16.mxu0 %v10633_v52  ;;  %v10681_v50 = vld [vmem:[%s14141_s1 + $0x1ab4] ss:$72 sps:$4 sm:$0xff]   ;;  %v10679_v52 = vld [vmem:[%s14141_s1 + $0x1ab0] ss:$72 sps:$4 sm:$0xff]  }
 0x344   : > { %6541 = vmatprep.subr.bf16.mxu1 %v10636_v61  ;;  %v6814_v61 = vld [vmem:[#allocation2 + $0x40] sm:$0xf] }
 0x346   : > { %6501 = vmatpush2.bf16.msra.mxu0 %v10631_v54  ;;  %v10684_v54 = vld [vmem:[%s14141_s1 + $0x1a24] ss:$72 sps:$4 sm:$0xff]  }
 0x347   : > { %6542 = vmatpush2.bf16.msra.mxu1 %v10634_v37  ;;  %6502 = vmatprep.subr.bf16.mxu0 %v10639_v3  ;;  %v6800_v37 = vld [vmem:[#allocation2 + $0xc] sm:$0xf]  ;;  %v7024_v3 = vsel %vm6835_vm1, %v6814_v61, 0  ;;  %v6807_v61 = vld [vmem:[#allocation2 + $0x28] sm:$0xf] }
 0x348   : > { %6543 = vmatprep.subr.bf16.mxu1 %v10642_v18  ;;  %v10682_v18 = vld [vmem:[%s14141_s1 + $0x1a20] ss:$72 sps:$4 sm:$0xff]  }
 0x34a   : > { %6503 = vmatpush2.bf16.msra.mxu0 %v10637_v25  ;;  %v10687_v25 = vld [vmem:[%s14141_s1 + $0x1994] ss:$72 sps:$4 sm:$0xff]  }
 0x34b   : > { %6544 = vmatpush2.bf16.msra.mxu1 %v10640_v55  ;;  %6504 = vmatprep.subr.bf16.mxu0 %v10645_v9  ;;  %v10685_v55 = vld [vmem:[%s14141_s1 + $0x1990] ss:$72 sps:$4 sm:$0xff]  }
 0x34c   : > { %6545 = vmatprep.subr.bf16.mxu1 %v10648_v57  ;;  %v6703_v47 = vpop.permute.xlu0 %6702  ;;  %v10690_v57 = vld [vmem:[%s14141_s1 + $0x1904] ss:$72 sps:$4 sm:$0xff]  }
 0x34d   : > { %6706 = vst.msk [vmem:[#allocation2 + $0x44] sm:$0xf] %vm6617_vm0, %v6703_v47  ;;  %v10691_v47 = vld [vmem:[%s14141_s1 + $0x1870] ss:$72 sps:$4 sm:$0xff]  }
 0x34e   : > { %6505 = vmatpush2.bf16.msra.mxu0 %v10643_v31  ;;  %v6801_v31 = vld [vmem:[#allocation2 + $0x10] sm:$0xf] }
 0x34f   : > { %6546 = vmatpush2.bf16.msra.mxu1 %v10646_v60  ;;  %6506 = vmatprep.subr.bf16.mxu0 %v10651_v62  ;;  %v10688_v62 = vld [vmem:[%s14141_s1 + $0x1900] ss:$72 sps:$4 sm:$0xff]  }
 0x350   : > { %6547 = vmatprep.subr.bf16.mxu1 %v10654_v19  ;;  %v6713_v1 = vpop.permute.xlu0 %6712  ;;  %v10693_v19 = vld [vmem:[%s14141_s1 + $0x1874] ss:$72 sps:$4 sm:$0xff]  }
 0x351   : > { %6716 = vst.msk [vmem:[#allocation2 + $0x4c] sm:$0xf] %vm6617_vm0, %v6713_v1 }
 0x352   : > { %6507 = vmatpush2.bf16.msra.mxu0 %v10649_v51  ;;  %v6816_v51 = vld [vmem:[#allocation2 + $0x48] sm:$0xf] }
 0x353   : > { %6548 = vmatpush2.bf16.msra.mxu1 %v10652_v0  ;;  %6558 = vmatprep.subr.bf16.mxu0 %v10657_v26  ;;  %v10696_v0 = vld [vmem:[%s14141_s1 + $0x17e4] ss:$72 sps:$4 sm:$0xff]   ;;  %v6802_v26 = vld [vmem:[#allocation2 + $0x14] sm:$0xf]  ;;  %v7116_v1 = vsel %vm6835_vm1, %v6816_v51, 0 }
 0x354   : > { %9196 = vmatprep.subr.bf16.mxu1 %v10832_v11  ;;  %v6815_v9 = vld [vmem:[#allocation2 + $0x44] sm:$0xf] }
 0x355   : > { %v13667_v15 = vpop.f32.mrf.mxu0  ;;  %6509 = vmatmul.mubr.bf16.vlgmr.msra.gmra.mxu0 %v11123_v6  ;;  %v10663_v6 = vld [vmem:[%s14141_s1 + $0x1514] ss:$72 sps:$4 sm:$0xff]   ;;  %v7070_v60 = vsel %vm6835_vm1, %v6815_v9, 0 }
 0x356   : > { %v13669_v5 = vpop.f32.mrf.mxu1  ;;  %6550 = vmatmul.mubr.bf16.vlgmr.msra.gmra.mxu1 %v11125_v7  ;;  %6559 = vmatpush1.bf16.msra.mxu0 %v10655_v32  ;;  %v10694_v32 = vld [vmem:[%s14141_s1 + $0x17e0] ss:$72 sps:$4 sm:$0xff]  }
 0x357   : > { %9197 = vmatpush3.bf16.xpose.msra.mxu1 %v6840_v12  ;;  %v13677_v53 = vpop.f32.mrf.mxu0  ;;  %6560 = vmatprep.subr.bf16.mxu0 %v10660_v13  ;;  %v10697_v13 = vld [vmem:[%s14141_s1 + $0x1750] ss:$72 sps:$4 sm:$0xff]  }
 0x358   : > { %v13679_v27 = vpop.f32.mrf.mxu1  ;;  %9198 = vmatprep.mubr.msk.bf16.mxu1 %vm10833_vm2, %v10832_v11  ;;  %9202 = vmatprep.subr.bf16.mxu1 %v10832_v11  ;;  %v6817_v12 = vld [vmem:[#allocation2 + $0x4c] sm:$0xf] }
 0x359   : > { %6590 = vmatprep.mubr.bf16.mxu0 %v11210_v34  ;;  %v6268_v28 = vpop.f32.mrf.mxu0  ;;  %v6886_v34 = vsel %vm6835_vm1, %v6811_v59, 0 }
 0x35a   : > { %v6309_v7 = vpop.f32.mrf.mxu1  ;;  %6561 = vmatpush1.bf16.msra.mxu0 %v10658_v20  ;;  %v10702_v20 = vld [vmem:[%s14141_s1 + $0x16c4] ss:$72 sps:$4 sm:$0xff]   ;;  %v7162_v28 = vsel %vm6835_vm1, %v6817_v12, 0 }
 0x35b   : > { %6562 = vmatprep.subr.bf16.mxu0 %v10663_v6  ;;  %v6269_v39 = vpop.f32.mrf.mxu0  ;;  %v1112_v6 = vrot.slane %v13207_v40, %v1079_v23  ;;  %v6803_v7 = vld [vmem:[#allocation2 + $0x18] sm:$0xf] }
 0x35c   : > { %v6310_v33 = vpop.f32.mrf.mxu1 }
 0x35d   : > { %v10700_v33 = vld [vmem:[%s14141_s1 + $0x16c0] ss:$72 sps:$4 sm:$0xff]   ;;  %v6265_v23 = vadd.f32 %v13667_v15, %v1112_v6 }
 0x35e   : > { %9199 = vmatmul.mubr.msk.bf16.vlgmr.msra.gmra.mxu1 %vm6835_vm1, %v6797_v58  ;;  %6563 = vmatpush1.bf16.msra.mxu0 %v10661_v38  ;;  %v1116_v38 = vrot.slane %v13207_v40, %v1083_v24  ;;  %v6818_v40 = vld [vmem:[#allocation2 + $0x50] sm:$0xf]  ;;  %v6804_v58 = vld [vmem:[#allocation2 + $0x1c] sm:$0xf] }
 0x35f   : > { %9203 = vmatpush3.bf16.xpose.msra.mxu1 %v6886_v34  ;;  %6564 = vmatprep.subr.bf16.mxu0 %v10666_v35  ;;  %v6306_v39 = vadd.f32 %v13669_v5, %v6265_v23  ;;  %v7208_v15 = vsel %vm6835_vm1, %v6818_v40, 0 }
 0x360   : > { %9204 = vmatprep.mubr.msk.bf16.mxu1 %vm10833_vm2, %v10832_v11  ;;  %9208 = vmatprep.subr.bf16.mxu1 %v10832_v11  ;;  %v6267_v35 = vadd.f32 %v13677_v53, %v1116_v38 }
 0x362   : > { %6565 = vmatpush1.bf16.msra.mxu0 %v10664_v29  ;;  %v6308_v53 = vadd.f32 %v13679_v27, %v6267_v35 }
 0x363   : > { %6566 = vmatprep.subr.bf16.mxu0 %v10669_v63 }
 0x366   : > { %9205 = vmatmul.mubr.msk.bf16.vlgmr.msra.gmra.mxu1 %vm6835_vm1, %v6798_v45  ;;  %6567 = vmatpush1.bf16.msra.mxu0 %v10667_v36 }
 0x367   : > { %9209 = vmatpush3.bf16.xpose.msra.mxu1 %v6932_v46  ;;  %6568 = vmatprep.subr.bf16.mxu0 %v10672_v44 }
 0x368   : > { %9210 = vmatprep.mubr.msk.bf16.mxu1 %vm10833_vm2, %v10832_v11  ;;  %9214 = vmatprep.subr.bf16.mxu1 %v10832_v11 }
 0x36a   : > { %6569 = vmatpush1.bf16.msra.mxu0 %v10670_v48 }
 0x36b   : > { %6570 = vmatprep.subr.bf16.mxu0 %v10675_v16  ;;  %v6820_v16 = vld [vmem:[#allocation2 + $0x58] sm:$0xf] }
 0x36e   : > { %9211 = vmatmul.mubr.msk.bf16.vlgmr.msra.gmra.mxu1 %vm6835_vm1, %v6799_v8  ;;  %6571 = vmatpush1.bf16.msra.mxu0 %v10673_v17 }
 0x36f   : > { %9215 = vmatpush3.bf16.xpose.msra.mxu1 %v6978_v2  ;;  %6572 = vmatprep.subr.bf16.mxu0 %v10678_v49  ;;  %v6805_v49 = vld [vmem:[#allocation2 + $0x20] sm:$0xf]  ;;  %v7300_v2 = vsel %vm6835_vm1, %v6820_v16, 0 }
 0x370   : > { %9216 = vmatprep.mubr.msk.bf16.mxu1 %vm10833_vm2, %v10832_v11  ;;  %9220 = vmatprep.subr.bf16.mxu1 %v10832_v11 }
 0x372   : > { %6573 = vmatpush1.bf16.msra.mxu0 %v10676_v56  ;;  %v6806_v56 = vld [vmem:[#allocation2 + $0x24] sm:$0xf] }
 0x373   : > { %6574 = vmatprep.subr.bf16.mxu0 %v10681_v50 }
 0x376   : > { %9217 = vmatmul.mubr.msk.bf16.vlgmr.msra.gmra.mxu1 %vm6835_vm1, %v6800_v37  ;;  %6575 = vmatpush2.bf16.msra.mxu0 %v10679_v52  ;;  %v6808_v37 = vld [vmem:[#allocation2 + $0x2c] sm:$0xf] }
 0x377   : > { %9221 = vmatpush3.bf16.xpose.msra.mxu1 %v7024_v3  ;;  %6576 = vmatprep.subr.bf16.mxu0 %v10684_v54  ;;  %v10752_v3 = vld [vmem:[%s14142_s2 + $0x8] sm:$0xff] }
 0x378   : > { %9222 = vmatprep.mubr.msk.bf16.mxu1 %vm10833_vm2, %v10832_v11  ;;  %9226 = vmatprep.subr.bf16.mxu1 %v10832_v11 }
 0x37a   : > { %6577 = vmatpush2.bf16.msra.mxu0 %v10682_v18  ;;  %v1120_v18 = vrot.slane %v10752_v3, %v1087_v21 }
 0x37b   : > { %6578 = vmatprep.subr.bf16.mxu0 %v10687_v25  ;;  %v1124_v25 = vrot.slane %v10752_v3, %v1091_v22 }
 0x37e   : > { %9223 = vmatmul.mubr.msk.bf16.vlgmr.msra.gmra.mxu1 %vm6835_vm1, %v6801_v31  ;;  %6579 = vmatpush2.bf16.msra.mxu0 %v10685_v55 }
 0x37f   : > { %9227 = vmatpush3.bf16.xpose.msra.mxu1 %v7070_v60  ;;  %6580 = vmatprep.subr.bf16.mxu0 %v10690_v57 }
 0x380   : > { %9228 = vmatprep.mubr.msk.bf16.mxu1 %vm10833_vm2, %v10832_v11  ;;  %9232 = vmatprep.subr.bf16.mxu1 %v10832_v11 }
 0x382   : > { %6581 = vmatpush2.bf16.msra.mxu0 %v10688_v62 }
 0x383   : > { %6582 = vmatprep.subr.bf16.mxu0 %v10693_v19 }
 0x386   : > { %9229 = vmatmul.mubr.msk.bf16.vlgmr.msra.gmra.mxu1 %vm6835_vm1, %v6802_v26  ;;  %6583 = vmatpush2.bf16.msra.mxu0 %v10691_v47 }
 0x387   : > { %9233 = vmatpush3.bf16.xpose.msra.mxu1 %v7116_v1  ;;  %6584 = vmatprep.subr.bf16.mxu0 %v10696_v0 }
 0x388   : > { %9234 = vmatprep.mubr.msk.bf16.mxu1 %vm10833_vm2, %v10832_v11  ;;  %9238 = vmatprep.subr.bf16.mxu1 %v10832_v11 }
 0x38a   : > { %6585 = vmatpush2.bf16.msra.mxu0 %v10694_v32 }
 0x38b   : > { %6586 = vmatprep.subr.bf16.mxu0 %v10699_v10 }
 0x38e   : > { %9235 = vmatmul.mubr.msk.bf16.vlgmr.msra.gmra.mxu1 %vm6835_vm1, %v6803_v7  ;;  %6587 = vmatpush2.bf16.msra.mxu0 %v10697_v13  ;;  %v6723_v59 = vpop.permute.xlu0 %6722 }
 0x38f   : > { %9239 = vmatpush3.bf16.xpose.msra.mxu1 %v7162_v28  ;;  %6726 = vst.msk [vmem:[#allocation2 + $0x54] sm:$0xf] %vm6617_vm0, %v6723_v59  ;;  %6588 = vmatprep.subr.bf16.mxu0 %v10702_v20 }
 0x390   : > { %9240 = vmatprep.mubr.msk.bf16.mxu1 %vm10833_vm2, %v10832_v11  ;;  %9250 = vmatprep.subr.bf16.mxu1 %v10832_v11 }
 0x392   : > { %6589 = vmatpush2.bf16.msra.mxu0 %v10700_v33  ;;  %v6733_v24 = vpop.permute.xlu0 %6732 }
 0x393   : > { %6736 = vst.msk [vmem:[#allocation2 + $0x5c] sm:$0xf] %vm6617_vm0, %v6733_v24  ;;  %9244 = vmatprep.subr.bf16.mxu0 %v10832_v11 }
 0x395   : > { %v6346_v34 = vpop.f32.mrf.mxu0  ;;  %6591 = vmatmul.mubr.bf16.vlgmr.msra.gmra.mxu0 %v11332_v14 }
 0x396   : > { %v6387_v29 = vpop.f32.mrf.mxu1  ;;  %9241 = vmatmul.mubr.msk.bf16.vlgmr.msra.gmra.mxu1 %vm6835_vm1, %v6804_v58  ;;  %v6347_v63 = vadd.f32 %v6346_v34, %v6306_v39  ;;  %9245 = vmatpush3.bf16.xpose.msra.mxu0 %v7208_v15  ;;  %v6819_v36 = vld [vmem:[#allocation2 + $0x54] sm:$0xf] }
 0x397   : > { %9246 = vmatprep.mubr.msk.bf16.mxu0 %vm10833_vm2, %v10832_v11  ;;  %v6348_v43 = vpop.f32.mrf.mxu0  ;;  %v7254_v5 = vsel %vm6835_vm1, %v6819_v36, 0  ;;  %9256 = vmatprep.subr.bf16.mxu0 %v10832_v11  ;;  %v6388_v55 = vadd.f32 %v6387_v29, %v1120_v18 }
 0x398   : > { %v6389_v44 = vpop.f32.mrf.mxu1  ;;  %9252 = vmatprep.mubr.msk.bf16.mxu1 %vm10833_vm2, %v10832_v11  ;;  %v13826_v14 = vpack.c.bf16 %v6347_v63, %v6347_v63  ;;  %v6349_v45 = vadd.f32 %v6348_v43, %v6308_v53  ;;  %9251 = vmatpush3.bf16.xpose.msra.mxu1 %v7254_v5 }
 0x399   : > { %9262 = vmatprep.subr.bf16.mxu1 %v10832_v11  ;;  %v6350_v46 = vpop.f32.mrf.mxu0  ;;  %v6390_v31 = vadd.f32 %v6389_v44, %v1124_v25 }
 0x39a   : > { %v6391_v27 = vpop.f32.mrf.mxu1  ;;  %6738 = vst.msk [vmem:[#allocation2 + $0x60] sm:$0xf] %vm6617_vm0, %v13826_v14  ;;  %v13831_v48 = vpack.c.bf16 %v6349_v45, %v6349_v45  ;;  %v6821_v8 = vld [vmem:[#allocation2 + $0x5c] sm:$0xf] }
 0x39b   : > { %v6351_v4 = vpop.f32.mrf.mxu0  ;;  %v7346_v50 = vsel %vm6835_vm1, %v6821_v8, 0 }
 0x39c   : > { %v6392_v17 = vpop.f32.mrf.mxu1  ;;  %6748 = vst.msk [vmem:[#allocation2 + $0x68] sm:$0xf] %vm6617_vm0, %v13831_v48 }
 0x39d   : > { %9247 = vmatmul.mubr.msk.bf16.vlgmr.msra.gmra.mxu0 %vm6835_vm1, %v6805_v49 }
 0x39e   : > { %9257 = vmatpush3.bf16.xpose.msra.mxu0 %v7300_v2  ;;  %9258 = vmatprep.mubr.msk.bf16.mxu0 %vm10833_vm2, %v10832_v11 }
 0x39f   : > { %9253 = vmatmul.mubr.msk.bf16.vlgmr.msra.gmra.mxu1 %vm6835_vm1, %v6806_v56  ;;  %9268 = vmatprep.subr.bf16.mxu0 %v10832_v11 }
 0x3a0   : > { %9263 = vmatpush3.bf16.xpose.msra.mxu1 %v7346_v50  ;;  %9264 = vmatprep.mubr.msk.bf16.mxu1 %vm10833_vm2, %v10832_v11  ;;  %v1057_v50 = vld [vmem:[%s14142_s2 + $0x10] sm:$0x3] }
 0x3a1   : > { %9274 = vmatprep.subr.bf16.mxu1 %v10832_v11  ;;  %v6823_v52 = vld [vmem:[#allocation2 + $0x60] sm:$0xf]  ;;  %v1132_v18 = vrot.slane %v1057_v50, %v11917_v42 }
 0x3a2   : > { %v7538_v54 = vsel %vm7536_vm3, %v6823_v52, 0 }
 0x3a5   : > { %9259 = vmatmul.mubr.msk.bf16.vlgmr.msra.gmra.mxu0 %vm6835_vm1, %v6807_v61 }
 0x3a6   : > { %9269 = vmatpush3.bf16.msra.mxu0 %v7538_v54  ;;  %9270 = vmatprep.mubr.msk.bf16.mxu0 %vm10833_vm2, %v10832_v11 }
 0x3a7   : > { %9265 = vmatmul.mubr.msk.bf16.vlgmr.msra.gmra.mxu1 %vm6835_vm1, %v6808_v37  ;;  %9280 = vmatprep.subr.bf16.mxu0 %v10832_v11  ;;  %v1128_v37 = vrot.slane %v1057_v50, %v11914_v41 }
 0x3a8   : > { %9276 = vmatprep.mubr.msk.bf16.mxu1 %vm10833_vm2, %v10832_v11 }
 0x3d5   : > { %v6428_v9 = vpop.f32.mrf.mxu0 }
 0x3d6   : > { %v6469_v57 = vpop.f32.mrf.mxu1  ;;  %v6429_v60 = vadd.f32 %v6428_v9, %v6388_v55 }
 0x3d7   : > { %v6430_v62 = vpop.f32.mrf.mxu0 }
 0x3d8   : > { %v6471_v19 = vpop.f32.mrf.mxu1  ;;  %v6470_v47 = vadd.f32 %v6469_v57, %v6429_v60  ;;  %v6431_v51 = vadd.f32 %v6430_v62, %v6390_v31 }
 0x3d9   : > { %v6432_v26 = vpop.f32.mrf.mxu0 }
 0x3da   : > { %v6473_v0 = vpop.f32.mrf.mxu1  ;;  %v13860_v1 = vpack.c.bf16 %v6470_v47, %v6470_v47  ;;  %v6472_v32 = vadd.f32 %v6471_v19, %v6431_v51 }
 0x3db   : > { %v6433_v13 = vpop.f32.mrf.mxu0 }
 0x3dc   : > { %v6474_v10 = vpop.f32.mrf.mxu1  ;;  %6758 = vst.msk [vmem:[#allocation2 + $0x70] sm:$0xf] %vm6617_vm0, %v13860_v1  ;;  %v13864_v30 = vpack.c.bf16 %v6472_v32, %v6472_v32 }
 0x3de   : > { %6768 = vst.msk [vmem:[#allocation2 + $0x78] sm:$0xf] %vm6617_vm0, %v13864_v30 }
 0x415   : > { %v6510_v21 = vpop.f32.mrf.mxu0 }
 0x416   : > { %v6551_v22 = vpop.f32.mrf.mxu1  ;;  %v6511_v55 = vadd.f32 %v6510_v21, %v1128_v37 }
 0x417   : > { %v6512_v12 = vpop.f32.mrf.mxu0 }
 0x418   : > { %v6553_v20 = vpop.f32.mrf.mxu1  ;;  %v6513_v57 = vadd.f32 %v6512_v12, %v1132_v18  ;;  %v6552_v60 = vadd.f32 %v6551_v22, %v6511_v55 }
 0x419   : > { %v6514_v7 = vpop.f32.mrf.mxu0 }
 0x41a   : > { %v6555_v6 = vpop.f32.mrf.mxu1  ;;  %v6554_v47 = vadd.f32 %v6553_v20, %v6513_v57 }
 0x41b   : > { %v6515_v38 = vpop.f32.mrf.mxu0 }
 0x41c   : > { %v6556_v28 = vpop.f32.mrf.mxu1 }
 0x41e   : > { %v13868_v59 = vpop.f32.mrf.mxu1 }
 0x41f   : > { %v7389_v33 = vsel %vm7388_vm4, %v13868_v59, -inf }
 0x420   : > { %7390 = vmax.xlane.f32.xlu1 %v7389_v33  ;;  %v9200_v23 = vpop.f32.mrf.mxu1 }
 0x422   : > { %v6879_v35 = vpop.f32.mrf.mxu1 }
 0x424   : > { %v9201_v24 = vpop.f32.mrf.mxu1 }
 0x426   : > { %v13872_v40 = vpop.f32.mrf.mxu1 }
 0x427   : > { %v7392_v39 = vsel %vm7388_vm4, %v13872_v40, -inf }
 0x428   : > { %7393 = vmax.xlane.f32.xlu0 %v7392_v39  ;;  %v9206_v58 = vpop.f32.mrf.mxu1 }
 0x42a   : > { %v6925_v34 = vpop.f32.mrf.mxu1 }
 0x42c   : > { %v9207_v29 = vpop.f32.mrf.mxu1 }
 0x42e   : > { %v13876_v15 = vpop.f32.mrf.mxu1 }
 0x42f   : > { %v7395_v61 = vsel %vm7388_vm4, %v13876_v15, -inf }
 0x430   : > { %v9212_v53 = vpop.f32.mrf.mxu1 }
 0x432   : > { %v6971_v63 = vpop.f32.mrf.mxu1 }
 0x434   : > { %v9213_v36 = vpop.f32.mrf.mxu1 }
 0x436   : > { %v13878_v43 = vpop.f32.mrf.mxu1 }
 0x437   : > { %v7398_v44 = vsel %vm7388_vm4, %v13878_v43, -inf }
 0x438   : > { %7399 = vmax.xlane.f32.xlu1 %v7398_v44  ;;  %v9218_v5 = vpop.f32.mrf.mxu1 }
 0x43a   : > { %v7017_v45 = vpop.f32.mrf.mxu1 }
 0x43c   : > { %v9219_v27 = vpop.f32.mrf.mxu1 }
 0x43e   : > { %v13882_v46 = vpop.f32.mrf.mxu1 }
 0x43f   : > { %v7401_v16 = vsel %vm7388_vm4, %v13882_v46, -inf }
 0x440   : > { %7402 = vmax.xlane.f32.xlu1 %v7401_v16  ;;  %v9224_v17 = vpop.f32.mrf.mxu1 }
 0x442   : > { %v7063_v4 = vpop.f32.mrf.mxu1 }
 0x444   : > { %v9225_v49 = vpop.f32.mrf.mxu1 }
 0x446   : > { %v13886_v8 = vpop.f32.mrf.mxu1 }
 0x447   : > { %v7404_v2 = vsel %vm7388_vm4, %v13886_v8, -inf }
 0x448   : > { %7405 = vmax.xlane.f32.xlu0 %v7404_v2  ;;  %v9230_v56 = vpop.f32.mrf.mxu1 }
 0x44a   : > { %v7109_v52 = vpop.f32.mrf.mxu1 }
 0x44c   : > { %7396 = vmax.xlane.f32.xlu0 %v7395_v61  ;;  %v9231_v54 = vpop.f32.mrf.mxu1 }
 0x44e   : > { %v13896_v3 = vpop.f32.mrf.mxu1 }
 0x44f   : > { %v7407_v22 = vsel %vm7388_vm4, %v13896_v3, -inf }
 0x450   : > { %v9236_v25 = vpop.f32.mrf.mxu1 }
 0x452   : > { %v7155_v9 = vpop.f32.mrf.mxu1 }
 0x454   : > { %v9237_v31 = vpop.f32.mrf.mxu1 }
 0x455   : > { %v6592_v62 = vpop.f32.mrf.mxu0 }
 0x456   : > { %v13899_v19 = vpop.f32.mrf.mxu1  ;;  %v6593_v51 = vadd.f32 %v6592_v62, %v6552_v60 }
 0x457   : > { %v7410_v0 = vsel %vm7388_vm4, %v13899_v19, -inf  ;;  %v6594_v26 = vpop.f32.mrf.mxu0 }
 0x458   : > { %7411 = vmax.xlane.f32.xlu0 %v7410_v0  ;;  %v9242_v41 = vpop.f32.mrf.mxu1  ;;  %v13903_v32 = vpack.c.bf16 %v6593_v51, %v6593_v51  ;;  %v6595_v42 = vadd.f32 %v6594_v26, %v6554_v47 }
 0x459   : > { %v6596_v10 = vpop.f32.mrf.mxu0 }
 0x45a   : > { %v7201_v13 = vpop.f32.mrf.mxu1  ;;  %6778 = vst.msk [vmem:[#allocation2 + $0x80] sm:$0xf] %vm6617_vm0, %v13903_v32  ;;  %v13907_v21 = vpack.c.bf16 %v6595_v42, %v6595_v42 }
 0x45b   : > { %v6597_v12 = vpop.f32.mrf.mxu0 }
 0x45c   : > { %7408 = vmax.xlane.f32.xlu0 %v7407_v22  ;;  %v9243_v20 = vpop.f32.mrf.mxu1  ;;  %6788 = vst.msk [vmem:[#allocation2 + $0x88] sm:$0xf] %vm6617_vm0, %v13907_v21 }
 0x45d   : > { %v13913_v6 = vpop.f32.mrf.mxu0 }
 0x45e   : > { %v7413_v7 = vsel %vm7388_vm4, %v13913_v6, -inf }
 0x45f   : > { %v9248_v28 = vpop.f32.mrf.mxu0  ;;  %7414 = vmax.xlane.f32.xlu1 %v7413_v7  ;;  %v7290_v38 = vpop.f32.mrf.mxu1 }
 0x460   : > { %v7416_v35 = vsel %vm7388_vm4, %v7290_v38, -inf }
 0x461   : > { %v7247_v33 = vpop.f32.mrf.mxu0  ;;  %v9254_v23 = vpop.f32.mrf.mxu1 }
 0x463   : > { %v9249_v24 = vpop.f32.mrf.mxu0  ;;  %7417 = vmax.xlane.f32.xlu1 %v7416_v35  ;;  %v7293_v39 = vpop.f32.mrf.mxu1 }
 0x465   : > { %v9255_v58 = vpop.f32.mrf.mxu1  ;;  %v13918_v34 = vpop.f32.mrf.mxu0 }
 0x466   : > { %v7419_v29 = vsel %vm7388_vm4, %v13918_v34, -inf }
 0x467   : > { %v9260_v53 = vpop.f32.mrf.mxu0  ;;  %7420 = vmax.xlane.f32.xlu1 %v7419_v29  ;;  %v13922_v63 = vpop.f32.mrf.mxu1 }
 0x468   : > { %v7422_v36 = vsel %vm7388_vm4, %v13922_v63, -inf }
 0x469   : > { %v7339_v44 = vpop.f32.mrf.mxu0  ;;  %7423 = vmax.xlane.f32.xlu0 %v7422_v36  ;;  %v9266_v5 = vpop.f32.mrf.mxu1 }
 0x46b   : > { %v9261_v45 = vpop.f32.mrf.mxu0  ;;  %v7385_v27 = vpop.f32.mrf.mxu1 }
 0x46d   : > { %v9267_v16 = vpop.f32.mrf.mxu1 }
 0x478   : > { %6752 = vrot.lane.b32.xlu1 %v13831_v48, %s10831_s28 }
 0x47c   : > { %6762 = vrot.lane.b32.xlu1 %v13860_v1, %s10831_s28 }
 0x47f   : > { %6742 = vrot.lane.b32.xlu0 %v13826_v14, %s10831_s28 }
 0x4a9   : > { %v7391_v2 = vpop.xlane.xlu1 %7390 }
 0x4aa   : > { %v7425_v33 = vsub.f32 %v13868_v59, %v7391_v2 }
 0x4ac   : > { %v7437_v23 = vmul.f32 1.442695, %v7425_v33 }
 0x4b1   : > { %v7394_v17 = vpop.xlane.xlu0 %7393 }
 0x4b2   : > { %v7426_v4 = vsub.f32 %v13872_v40, %v7394_v17 }
 0x4b4   : > { %v7439_v49 = vmul.f32 1.442695, %v7426_v4 }
 0x4b6   : > { %10703 = vpow2.f32 %v7439_v49 }
 0x4c1   : > { %v7400_v56 = vpop.xlane.xlu1 %7399 }
 0x4c2   : > { %v7428_v50 = vsub.f32 %v13878_v43, %v7400_v56 }
 0x4c3   : > { %v13934_v52 = vpop.eup %10703 }
 0x4c4   : > { %v7443_v61 = vmul.f32 1.442695, %v7428_v50  ;;  %v7464_v48 = vsel %vm7388_vm4, %v13934_v52, 0.0 }
 0x4c5   : > { %7465 = vadd.xlane.f32.xlu0 %v7464_v48 }
 0x4c6   : > { %10705 = vpow2.f32 %v7443_v61 }
 0x4d1   : > { %v7406_v1 = vpop.xlane.xlu0 %7405 }
 0x4d2   : > { %v7430_v14 = vsub.f32 %v13886_v8, %v7406_v1  ;;  %v7403_v8 = vpop.xlane.xlu1 %7402 }
 0x4d3   : > { %v13939_v54 = vpop.eup %10705  ;;  %v7429_v35 = vsub.f32 %v13882_v46, %v7403_v8 }
 0x4d4   : > { %v7447_v40 = vmul.f32 1.442695, %v7430_v14  ;;  %v7470_v37 = vsel %vm7388_vm4, %v13939_v54, 0.0 }
 0x4d5   : > { %7471 = vadd.xlane.f32.xlu0 %v7470_v37  ;;  %v13943_v43 = vpop.xlane.xlu0 %7396  ;;  %v7445_v24 = vmul.f32 1.442695, %v7429_v35 }
 0x4d6   : > { %10707 = vpow2.f32 %v7447_v40  ;;  %v7427_v17 = vsub.f32 %v13876_v15, %v13943_v43 }
 0x4e1   : > { %v7412_v18 = vpop.xlane.xlu0 %7411 }
 0x4e2   : > { %v7432_v25 = vsub.f32 %v13899_v19, %v7412_v18 }
 0x4e3   : > { %v13946_v55 = vpop.eup %10707 }
 0x4e4   : > { %v7451_v9 = vmul.f32 1.442695, %v7432_v25  ;;  %v7476_v57 = vsel %vm7388_vm4, %v13946_v55, 0.0 }
 0x4e5   : > { %7477 = vadd.xlane.f32.xlu1 %v7476_v57  ;;  %v7409_v47 = vpop.xlane.xlu0 %7408 }
 0x4e6   : > { %10709 = vpow2.f32 %v7451_v9  ;;  %v7431_v39 = vsub.f32 %v13896_v3, %v7409_v47 }
 0x4e8   : > { %v7415_v31 = vpop.xlane.xlu1 %7414 }
 0x4e9   : > { %v7433_v29 = vsub.f32 %v13913_v6, %v7415_v31 }
 0x4ec   : > { %v7418_v60 = vpop.xlane.xlu1 %7417 }
 0x4ed   : > { %v7434_v62 = vsub.f32 %v7290_v38, %v7418_v60 }
 0x4ef   : > { %v7455_v51 = vmul.f32 1.442695, %v7434_v62 }
 0x4f0   : > { %v7421_v0 = vpop.xlane.xlu1 %7420 }
 0x4f1   : > { %10711 = vpow2.f32 %v7455_v51  ;;  %v7435_v59 = vsub.f32 %v13918_v34, %v7421_v0 }
 0x4f2   : > { %v7424_v41 = vpop.xlane.xlu0 %7423 }
 0x4f3   : > { %v13950_v26 = vpop.eup %10709  ;;  %v7436_v28 = vsub.f32 %v13922_v63, %v7424_v41  ;;  %v7457_v46 = vmul.f32 1.442695, %v7435_v59 }
 0x4f4   : > { %v7482_v19 = vsel %vm7388_vm4, %v13950_v26, 0.0  ;;  %v6753_v42 = vpop.permute.xlu1 %6752 }
 0x4f5   : > { %7483 = vadd.xlane.f32.xlu1 %v7482_v19  ;;  %6756 = vst.msk [vmem:[#allocation2 + $0x6c] sm:$0xf] %vm6617_vm0, %v6753_v42  ;;  %v7459_v38 = vmul.f32 1.442695, %v7436_v28 }
 0x4f6   : > { %v6743_v10 = vpop.permute.xlu0 %6742 }
 0x4f7   : > { %6746 = vst.msk [vmem:[#allocation2 + $0x64] sm:$0xf] %vm6617_vm0, %v6743_v10  ;;  %10713 = vpow2.f32 %v7459_v38 }
 0x4f8   : > { %v6763_v13 = vpop.permute.xlu1 %6762  ;;  %10715 = vpow2.f32 %v7437_v23 }
 0x4f9   : > { %6766 = vst.msk [vmem:[#allocation2 + $0x74] sm:$0xf] %vm6617_vm0, %v6763_v13  ;;  %10717 = vpow2.f32 %v7445_v24  ;;  %v6825_v24 = vld [vmem:[#allocation2 + $0x68] sm:$0xf] }
 0x4fc   : > { %v6826_v48 = vld [vmem:[#allocation2 + $0x6c] sm:$0xf] }
 0x4fd   : > { %v7676_v15 = vsel %vm7536_vm3, %v6826_v48, 0 }
 0x4fe   : > { %v13957_v22 = vpop.eup %10711  ;;  %v6824_v12 = vld [vmem:[#allocation2 + $0x64] sm:$0xf] }
 0x4ff   : > { %v7488_v20 = vsel %vm7388_vm4, %v13957_v22, 0.0  ;;  %v7584_v7 = vsel %vm7536_vm3, %v6824_v12, 0 }
 0x500   : > { %7489 = vadd.xlane.f32.xlu0 %v7488_v20  ;;  %9275 = vmatpush3.bf16.msra.mxu1 %v7584_v7  ;;  %v6828_v37 = vld [vmem:[#allocation2 + $0x74] sm:$0xf] }
 0x501   : > { %9286 = vmatprep.subr.bf16.mxu1 %v10832_v11  ;;  %v7768_v18 = vsel %vm7536_vm3, %v6828_v37, 0 }
 0x504   : > { %v13971_v58 = vpop.eup %10713 }
 0x505   : > { %v7494_v53 = vsel %vm7388_vm4, %v13971_v58, 0.0  ;;  %v13977_v63 = vpop.eup %10715 }
 0x506   : > { %6782 = vrot.lane.b32.xlu1 %v13903_v32, %s10831_s28  ;;  %v7449_v32 = vmul.f32 1.442695, %v7431_v39  ;;  %v7461_v3 = vsel %vm7388_vm4, %v13977_v63, 0.0  ;;  %v13981_v36 = vpop.eup %10717 }
 0x507   : > { %v7473_v6 = vsel %vm7388_vm4, %v13981_v36, 0.0 }
 0x508   : > { %10719 = vpow2.f32 %v7449_v32  ;;  %v7630_v32 = vsel %vm7536_vm3, %v6825_v24, 0 }
 0x515   : > { %v13985_v44 = vpop.eup %10719 }
 0x516   : > { %6772 = vrot.lane.b32.xlu0 %v13864_v30, %s10831_s28  ;;  %v7453_v30 = vmul.f32 1.442695, %v7433_v29  ;;  %v7479_v34 = vsel %vm7388_vm4, %v13985_v44, 0.0 }
 0x518   : > { %10721 = vpow2.f32 %v7453_v30 }
 0x519   : > { %10723 = vpow2.f32 %v7457_v46  ;;  %v6827_v46 = vld [vmem:[#allocation2 + $0x70] sm:$0xf] }
 0x525   : > { %v13991_v5 = vpop.eup %10721 }
 0x526   : > { %v7485_v45 = vsel %vm7388_vm4, %v13991_v5, 0.0  ;;  %v13995_v27 = vpop.eup %10723 }
 0x527   : > { %v7491_v16 = vsel %vm7388_vm4, %v13995_v27, 0.0 }
 0x52a   : > { %7495 = vadd.xlane.f32.xlu1 %v7494_v53 }
 0x535   : > { %7462 = vadd.xlane.f32.xlu0 %v7461_v3 }
 0x539   : > { %7474 = vadd.xlane.f32.xlu0 %v7473_v6 }
 0x53b   : > { %6792 = vrot.lane.b32.xlu1 %v13907_v21, %s10831_s28  ;;  %v7441_v21 = vmul.f32 1.442695, %v7427_v17 }
 0x53d   : > { %7480 = vadd.xlane.f32.xlu0 %v7479_v34  ;;  %10725 = vpow2.f32 %v7441_v21  ;;  %v7722_v34 = vsel %vm7536_vm3, %v6827_v46, 0 }
 0x541   : > { %7486 = vadd.xlane.f32.xlu0 %v7485_v45 }
 0x545   : > { %7492 = vadd.xlane.f32.xlu0 %v7491_v16  ;;  %v6829_v16 = vld [vmem:[#allocation2 + $0x78] sm:$0xf] }
 0x54a   : > { %v14001_v49 = vpop.eup %10725 }
 0x54b   : > { %v7467_v61 = vsel %vm7388_vm4, %v14001_v49, 0.0 }
 0x54e   : > { %v7466_v4 = vpop.xlane.xlu0 %7465 }
 0x54f   : > { %10727 = vrcp.f32 %v7466_v4 }
 0x55c   : > { %v10728_v2 = vpop.eup %10727 }
 0x55d   : > { %v7510_v56 = vmul.f32 %v10728_v2, %v13934_v52 }
 0x55e   : > { %v7472_v50 = vpop.xlane.xlu0 %7471 }
 0x55f   : > { %10729 = vrcp.f32 %v7472_v50  ;;  %7468 = vadd.xlane.f32.xlu1 %v7467_v61  ;;  %v7522_v1 = vpack.c.bf16 %v7510_v56, %v7510_v56  ;;  %v6831_v56 = vld [vmem:[#allocation2 + $0x80] sm:$0xf] }
 0x560   : > { %v7906_v61 = vsel %vm7536_vm3, %v6831_v56, 0 }
 0x561   : > { %9277 = vmatmul.mubr.msk.bf16.vlgmr.msra.gmra.mxu1 %vm7388_vm4, %v7522_v1  ;;  %v6833_v1 = vld [vmem:[#allocation2 + $0x88] sm:$0xf] }
 0x562   : > { %9287 = vmatpush3.bf16.msra.mxu1 %v7676_v15  ;;  %9288 = vmatprep.mubr.msk.bf16.mxu1 %vm10833_vm2, %v10832_v11 }
 0x563   : > { %9298 = vmatprep.subr.bf16.mxu1 %v10832_v11 }
 0x56c   : > { %v10730_v14 = vpop.eup %10729 }
 0x56d   : > { %v7512_v52 = vmul.f32 %v10730_v14, %v13939_v54 }
 0x56e   : > { %v7478_v40 = vpop.xlane.xlu1 %7477 }
 0x56f   : > { %10731 = vrcp.f32 %v7478_v40  ;;  %v7524_v43 = vpack.c.bf16 %v7512_v52, %v7512_v52 }
 0x571   : > { %9289 = vmatmul.mubr.msk.bf16.vlgmr.msra.gmra.mxu1 %vm7388_vm4, %v7524_v43 }
 0x572   : > { %9299 = vmatpush3.bf16.msra.mxu1 %v7768_v18  ;;  %9300 = vmatprep.mubr.msk.bf16.mxu1 %vm10833_vm2, %v10832_v11 }
 0x573   : > { %9310 = vmatprep.subr.bf16.mxu1 %v10832_v11 }
 0x57c   : > { %v10732_v25 = vpop.eup %10731 }
 0x57d   : > { %v7514_v9 = vmul.f32 %v10732_v25, %v13946_v55 }
 0x57e   : > { %v7484_v57 = vpop.xlane.xlu1 %7483 }
 0x57f   : > { %v7526_v8 = vpack.c.bf16 %v7514_v9, %v7514_v9  ;;  %10733 = vrcp.f32 %v7484_v57 }
 0x581   : > { %9301 = vmatmul.mubr.msk.bf16.vlgmr.msra.gmra.mxu1 %vm7388_vm4, %v7526_v8 }
 0x582   : > { %v6783_v54 = vpop.permute.xlu1 %6782  ;;  %9312 = vmatprep.mubr.msk.bf16.mxu1 %vm10833_vm2, %v10832_v11 }
 0x583   : > { %6786 = vst.msk [vmem:[#allocation2 + $0x84] sm:$0xf] %vm6617_vm0, %v6783_v54 }
 0x589   : > { %v7490_v31 = vpop.xlane.xlu0 %7489 }
 0x58a   : > { %10735 = vrcp.f32 %v7490_v31  ;;  %v6832_v0 = vld [vmem:[#allocation2 + $0x84] sm:$0xf] }
 0x58b   : > { %v7952_v42 = vsel %vm7536_vm3, %v6832_v0, 0 }
 0x58c   : > { %v10734_v62 = vpop.eup %10733 }
 0x58d   : > { %v6773_v60 = vpop.permute.xlu0 %6772  ;;  %v7516_v47 = vmul.f32 %v10734_v62, %v13950_v26 }
 0x58e   : > { %6776 = vst.msk [vmem:[#allocation2 + $0x7c] sm:$0xf] %vm6617_vm0, %v6773_v60 }
 0x58f   : > { %v7528_v41 = vpack.c.bf16 %v7516_v47, %v7516_v47 }
 0x595   : > { %v6830_v55 = vld [vmem:[#allocation2 + $0x7c] sm:$0xf] }
 0x596   : > { %v7860_v51 = vsel %vm7536_vm3, %v6830_v55, 0 }
 0x597   : > { %9311 = vmatpush3.bf16.msra.mxu1 %v7860_v51  ;;  %v10736_v19 = vpop.eup %10735 }
 0x598   : > { %9322 = vmatprep.subr.bf16.mxu1 %v10832_v11  ;;  %v7518_v10 = vmul.f32 %v10736_v19, %v13957_v22 }
 0x59a   : > { %9313 = vmatmul.mubr.msk.bf16.vlgmr.msra.gmra.mxu1 %vm7388_vm4, %v7528_v41  ;;  %v7530_v26 = vpack.c.bf16 %v7518_v10, %v7518_v10 }
 0x59b   : > { %9323 = vmatpush3.bf16.msra.mxu1 %v7952_v42  ;;  %9324 = vmatprep.mubr.msk.bf16.mxu1 %vm10833_vm2, %v10832_v11 }
 0x59c   : > { %9334 = vmatprep.subr.bf16.mxu1 %v10832_v11 }
 0x5a2   : > { %9325 = vmatmul.mubr.msk.bf16.vlgmr.msra.gmra.mxu1 %vm7388_vm4, %v7530_v26 }
 0x5a3   : > { %9336 = vmatprep.mubr.msk.bf16.mxu1 %vm10833_vm2, %v10832_v11 }
 0x5b3   : > { %v7496_v13 = vpop.xlane.xlu1 %7495 }
 0x5b4   : > { %10737 = vrcp.f32 %v7496_v13 }
 0x5b7   : > { %v6793_v12 = vpop.permute.xlu1 %6792 }
 0x5b8   : > { %6796 = vst.msk [vmem:[#allocation2 + $0x8c] sm:$0xf] %vm6617_vm0, %v6793_v12 }
 0x5be   : > { %v7463_v20 = vpop.xlane.xlu0 %7462 }
 0x5bf   : > { %v6834_v7 = vld [vmem:[#allocation2 + $0x8c] sm:$0xf]  ;;  %10739 = vrcp.f32 %v7463_v20 }
 0x5c0   : > { %v8044_v28 = vsel %vm7536_vm3, %v6834_v7, 0 }
 0x5c1   : > { %v10738_v38 = vpop.eup %10737  ;;  %9335 = vmatpush3.bf16.msra.mxu1 %v8044_v28 }
 0x5c2   : > { %v7520_v22 = vmul.f32 %v10738_v38, %v13971_v58  ;;  %v7475_v58 = vpop.xlane.xlu0 %7474 }
 0x5c4   : > { %v7532_v33 = vpack.c.bf16 %v7520_v22, %v7520_v22 }
 0x5c6   : > { %9337 = vmatmul.mubr.msk.bf16.vlgmr.msra.gmra.mxu1 %vm7388_vm4, %v7532_v33  ;;  %v7481_v53 = vpop.xlane.xlu0 %7480 }
 0x5ca   : > { %v7487_v6 = vpop.xlane.xlu0 %7486 }
 0x5cc   : > { %v10740_v23 = vpop.eup %10739 }
 0x5cd   : > { %v7509_v35 = vmul.f32 %v10740_v23, %v13977_v63 }
 0x5ce   : > { %v7493_v4 = vpop.xlane.xlu0 %7492 }
 0x5cf   : > { %v7521_v39 = vpack.c.bf16 %v7509_v35, %v7509_v35 }
 0x5d1   : > { %9271 = vmatmul.mubr.msk.bf16.vlgmr.msra.gmra.mxu0 %vm7388_vm4, %v7521_v39 }
 0x5d2   : > { %9281 = vmatpush3.bf16.msra.mxu0 %v7630_v32  ;;  %9282 = vmatprep.mubr.msk.bf16.mxu0 %vm10833_vm2, %v10832_v11 }
 0x5d3   : > { %9292 = vmatprep.subr.bf16.mxu0 %v10832_v11 }
 0x5e8   : > { %v7469_v29 = vpop.xlane.xlu1 %7468 }
 0x5e9   : > { %10741 = vrcp.f32 %v7469_v29 }
 0x5ea   : > { %10743 = vrcp.f32 %v7475_v58 }
 0x5eb   : > { %10745 = vrcp.f32 %v7481_v53 }
 0x5ec   : > { %10747 = vrcp.f32 %v7487_v6 }
 0x5ed   : > { %10749 = vrcp.f32 %v7493_v4 }
 0x5f6   : > { %v10742_v30 = vpop.eup %10741 }
 0x5f7   : > { %v7511_v59 = vmul.f32 %v10742_v30, %v14001_v49  ;;  %v10744_v3 = vpop.eup %10743  ;;  %v7814_v49 = vsel %vm7536_vm3, %v6829_v16, 0 }
 0x5f8   : > { %v7513_v45 = vmul.f32 %v10744_v3, %v13981_v36  ;;  %v10746_v21 = vpop.eup %10745 }
 0x5f9   : > { %v7523_v63 = vpack.c.bf16 %v7511_v59, %v7511_v59  ;;  %v7515_v2 = vmul.f32 %v10746_v21, %v13985_v44  ;;  %v10748_v36 = vpop.eup %10747  ;;  %v7998_v44 = vsel %vm7536_vm3, %v6833_v1, 0 }
 0x5fa   : > { %v7525_v17 = vpack.c.bf16 %v7513_v45, %v7513_v45  ;;  %v7517_v48 = vmul.f32 %v10748_v36, %v13991_v5  ;;  %v10750_v14 = vpop.eup %10749 }
 0x5fb   : > { %9283 = vmatmul.mubr.msk.bf16.vlgmr.msra.gmra.mxu0 %vm7388_vm4, %v7523_v63  ;;  %v7527_v50 = vpack.c.bf16 %v7515_v2, %v7515_v2  ;;  %v7519_v52 = vmul.f32 %v10750_v14, %v13995_v27 }
 0x5fc   : > { %9293 = vmatpush3.bf16.msra.mxu0 %v7722_v34  ;;  %9294 = vmatprep.mubr.msk.bf16.mxu0 %vm10833_vm2, %v10832_v11  ;;  %v7529_v15 = vpack.c.bf16 %v7517_v48, %v7517_v48 }
 0x5fd   : > { %9304 = vmatprep.subr.bf16.mxu0 %v10832_v11  ;;  %v7531_v40 = vpack.c.bf16 %v7519_v52, %v7519_v52 }
 0x603   : > { %9295 = vmatmul.mubr.msk.bf16.vlgmr.msra.gmra.mxu0 %vm7388_vm4, %v7525_v17 }
 0x604   : > { %9305 = vmatpush3.bf16.msra.mxu0 %v7814_v49  ;;  %9306 = vmatprep.mubr.msk.bf16.mxu0 %vm10833_vm2, %v10832_v11 }
 0x605   : > { %9316 = vmatprep.subr.bf16.mxu0 %v10832_v11 }
 0x60b   : > { %9307 = vmatmul.mubr.msk.bf16.vlgmr.msra.gmra.mxu0 %vm7388_vm4, %v7527_v50 }
 0x60c   : > { %9317 = vmatpush3.bf16.msra.mxu0 %v7906_v61  ;;  %9318 = vmatprep.mubr.msk.bf16.mxu0 %vm10833_vm2, %v10832_v11 }
 0x60d   : > { %9328 = vmatprep.subr.bf16.mxu0 %v10832_v11 }
 0x613   : > { %9319 = vmatmul.mubr.msk.bf16.vlgmr.msra.gmra.mxu0 %vm7388_vm4, %v7529_v15 }
 0x614   : > { %9329 = vmatpush3.bf16.msra.mxu0 %v7998_v44  ;;  %9330 = vmatprep.mubr.msk.bf16.mxu0 %vm10833_vm2, %v10832_v11 }
 0x61b   : > { %9331 = vmatmul.mubr.msk.bf16.vlgmr.msra.gmra.mxu0 %vm7388_vm4, %v7531_v40 }
 0x621   : > { %v7620_v37 = vpop.f32.mrf.mxu1 }
 0x622   : > { %8087 = vrot.lane.b32.xlu1 %v7620_v37, %s10831_s28 }
 0x623   : > { %v9278_v5 = vpop.f32.mrf.mxu1 }
 0x625   : > { %v7623_v43 = vpop.f32.mrf.mxu1 }
 0x627   : > { %v9279_v18 = vpop.f32.mrf.mxu1 }
 0x631   : > { %v7712_v25 = vpop.f32.mrf.mxu1 }
 0x632   : > { %8091 = vrot.lane.b32.xlu0 %v7712_v25, %s10831_s28 }
 0x633   : > { %v9290_v9 = vpop.f32.mrf.mxu1 }
 0x635   : > { %v7715_v57 = vpop.f32.mrf.mxu1 }
 0x637   : > { %v9291_v8 = vpop.f32.mrf.mxu1 }
 0x641   : > { %v7804_v54 = vpop.f32.mrf.mxu1 }
 0x642   : > { %8095 = vrot.lane.b32.xlu1 %v7804_v54, %s10831_s28 }
 0x643   : > { %v9302_v11 = vpop.f32.mrf.mxu1 }
 0x645   : > { %v7807_v27 = vpop.f32.mrf.mxu1 }
 0x647   : > { %v9303_v31 = vpop.f32.mrf.mxu1 }
 0x65a   : > { %v7896_v60 = vpop.f32.mrf.mxu1 }
 0x65b   : > { %8099 = vrot.lane.b32.xlu1 %v7896_v60, %s10831_s28 }
 0x65c   : > { %v9314_v62 = vpop.f32.mrf.mxu1 }
 0x65e   : > { %v7899_v47 = vpop.f32.mrf.mxu1 }
 0x660   : > { %v9315_v55 = vpop.f32.mrf.mxu1 }
 0x662   : > { %v7988_v51 = vpop.f32.mrf.mxu1 }
 0x663   : > { %8103 = vrot.lane.b32.xlu0 %v7988_v51, %s10831_s28 }
 0x664   : > { %v9326_v0 = vpop.f32.mrf.mxu1 }
 0x666   : > { %v7991_v41 = vpop.f32.mrf.mxu1 }
 0x668   : > { %v9327_v19 = vpop.f32.mrf.mxu1 }
 0x686   : > { %v8080_v42 = vpop.f32.mrf.mxu1 }
 0x687   : > { %8107 = vrot.lane.b32.xlu1 %v8080_v42, %s10831_s28  ;;  %s9342_s28 = smul.u32 768, %s10821_s15  ;;  %s10757_s15 = sshll.u32 %s10834_s8, 4  ;;  %s10758_s15 = int_to_ptr.vmem [resolvable:$false] %s10757_s15 }
 0x688   : > { %v9338_v10 = vpop.f32.mrf.mxu1  ;;  %s10759_s6 = scalar_lea.vmem %s10758_s15, 1536  ;;  %p10760_p1 = scmp.lt.s32.totalorder %s8140_s27, %s10758_s15 }
 0x689   : > { %s14096_s4 = scalar_lea.hbm %s14143_s3, %s9342_s28  ;;  %p10761_p2 = scmp.lt.s32.totalorder %s10759_s6, %s10753_s7 }
 0x68a   : > { %v8083_v26 = vpop.f32.mrf.mxu1 }
 0x68b   : > { %p10762_p3 = por %p10761_p2, %p10760_p1 }
 0x68c   : > { %v9339_v13 = vpop.f32.mrf.mxu1 }
 0x68d   : > { %p10763_p5 = pnand %p10762_p3, %p10756_p0 }
 0x691   : > { %v7574_v12 = vpop.f32.mrf.mxu0 }
 0x693   : > { %v9272_v20 = vpop.f32.mrf.mxu0 }
 0x694   : > { %v8088_v7 = vpop.permute.xlu1 %8087 }
 0x695   : > { %v8110_v28 = vsel %vm6835_vm1, %v7574_v12, %v8088_v7  ;;  %v7577_v38 = vpop.f32.mrf.mxu0 }
 0x696   : > { %8116 = vst [vmem:[%s14080_s26] sm:$0xff] %v8110_v28 }
 0x697   : > { %v9273_v22 = vpop.f32.mrf.mxu0 }
 0x6a4   : > { %v8092_v33 = vpop.permute.xlu0 %8091 }
 0x6b4   : > { %v8096_v29 = vpop.permute.xlu1 %8095 }
 0x6bb   : > { %v7666_v23 = vpop.f32.mrf.mxu0 }
 0x6bc   : > { %v8111_v35 = vsel %vm6835_vm1, %v7666_v23, %v8092_v33 }
 0x6bd   : > { %8117 = vst [vmem:[%s14080_s26 + $0x8] sm:$0xff] %v8111_v35  ;;  %v9284_v24 = vpop.f32.mrf.mxu0 }
 0x6bf   : > { %v7669_v39 = vpop.f32.mrf.mxu0 }
 0x6c1   : > { %v9285_v32 = vpop.f32.mrf.mxu0 }
 0x6c3   : > { %v7758_v58 = vpop.f32.mrf.mxu0 }
 0x6c4   : > { %v8112_v53 = vsel %vm6835_vm1, %v7758_v58, %v8096_v29 }
 0x6c5   : > { %8118 = vst [vmem:[%s14080_s26 + $0x10] sm:$0xff] %v8112_v53  ;;  %v9296_v30 = vpop.f32.mrf.mxu0 }
 0x6c7   : > { %v7761_v59 = vpop.f32.mrf.mxu0 }
 0x6c9   : > { %v9297_v46 = vpop.f32.mrf.mxu0 }
 0x6cb   : > { %v7850_v63 = vpop.f32.mrf.mxu0 }
 0x6cd   : > { %v9308_v3 = vpop.f32.mrf.mxu0  ;;  %v8100_v6 = vpop.permute.xlu1 %8099 }
 0x6ce   : > { %v8113_v34 = vsel %vm6835_vm1, %v7850_v63, %v8100_v6 }
 0x6cf   : > { %v7853_v45 = vpop.f32.mrf.mxu0  ;;  %8119 = vst [vmem:[%s14080_s26 + $0x18] sm:$0xff] %v8113_v34 }
 0x6d1   : > { %v9309_v16 = vpop.f32.mrf.mxu0 }
 0x6d3   : > { %v7942_v17 = vpop.f32.mrf.mxu0 }
 0x6d5   : > { %v9320_v21 = vpop.f32.mrf.mxu0  ;;  %v8104_v4 = vpop.permute.xlu0 %8103 }
 0x6d6   : > { %v8114_v49 = vsel %vm6835_vm1, %v7942_v17, %v8104_v4 }
 0x6d7   : > { %v7945_v2 = vpop.f32.mrf.mxu0  ;;  %8120 = vst [vmem:[%s14080_s26 + $0x20] sm:$0xff] %v8114_v49 }
 0x6d9   : > { %v9321_v56 = vpop.f32.mrf.mxu0 }
 0x6db   : > { %v8034_v50 = vpop.f32.mrf.mxu0 }
 0x6dd   : > { %v9332_v36 = vpop.f32.mrf.mxu0 }
 0x6df   : > { %v8037_v61 = vpop.f32.mrf.mxu0 }
 0x6e1   : > { %v9333_v48 = vpop.f32.mrf.mxu0 }
 0x6f9   : > { %v8108_v1 = vpop.permute.xlu1 %8107 }
 0x6fa   : > { %v8115_v15 = vsel %vm6835_vm1, %v8034_v50, %v8108_v1 }
 0x6fb   : > { %8121 = vst [vmem:[%s14080_s26 + $0x28] sm:$0xff] %v8115_v15 }
 0x6fc   : > { %10766 = shalt.err (!%p10763_p5)
}
 0x6fd   : > { %s10767_s9 = scalar_lea.hbm %s14096_s4, 768  ;;  %s10771_s18 = scalar_lea.hbm %s14143_s3, 1536 }
 0x6fe   : > { %p10768_p6 = scmp.ne.s32.totalorder %s14096_s4, %s10767_s9  ;;  %p10772_p10 = scmp.lt.s32.totalorder %s14096_s4, %s14143_s3 }
 0x6ff   : > { %p10773_p11 = scmp.lt.s32.totalorder %s10771_s18, %s10767_s9 }
 0x700   : > { %p10769_p7 = pnand %p10768_p6, %p10895_p4 }
 0x701   : > { %p10774_p12 = por %p10773_p11, %p10772_p10 }
 0x702   : > { %p10770_p9 = pneg %p10769_p7 }
 0x704   : > { %p10775_p13 = pnand %p10774_p12, %p10770_p9 }
 0x706   : > { %10778 = shalt.err (!%p10775_p13)
}
 0x707   : > { %9343 = dma.vmem_to_hbm [thread:$0]  (%p10895_p4), %s8140_s27, 768, %s14096_s4, %s8123_s5  }
 0x708 PF: > { %p9349_p0 = scmp.ge.s32.totalorder %s10829_s17, 2  ;;  %s8151_s23 = sand.u32 1, %s10809_s12  }
 0x709   : > { %s8152_s26 = scalar_lea.sflag [#allocation4], %s8151_s23 }
 0x70a   : > { %p9346_p1 = pnand %p9349_p0, %p10902_p8 }
 0x70c   : > { %p9347_p2 = pneg %p9346_p1 }
 0x70e   : > { %10804 = dma.done.wait (%p9347_p2), %s8152_s26, 768  }
 0x70f   : > { %10806 = vsyncadd (%p9347_p2), %s8152_s26, 4294966528  ;;  %s16_s17 = sadd.s32 1, %s10829_s17   ;;  %s14146_s12 = smov %s10813_s13 }
 0x710   : > { %p13_p3 = scmp.ge.s32.totalorder %s16_s17, 4   ;;  %s14147_s13 = smov %s10817_s14 }
 0x711   : > { %s14148_s14 = smov %s10908_s25  ;;  %s14149_s15 = smov %s10825_s16 }
 0x712   : > { %s14150_s16 = smov %s14152_s20  ;;  %15 = sbr.rel (!%p13_p3) target bundleno = 4 (0x4), region = 108 }
 0x717   :  { %8157 = vsyncpa [#allocation4], 1 }
 0x718   :  { %8159 = vsyncpa [#allocation4 + $0x1], 1 }

</bundles_post_ra>
